<compile_context>
chip_gen: v6e
topology: v6e:2x2x1
jax: 0.10.0
libtpu: 0.0.40
codegen_flags: <defaults>
</compile_context>

<pallas_src>
import jax
import jax.numpy as jnp
from jax.experimental import pallas as pl
from jax.experimental.pallas import tpu as pltpu

NEG_SLOPE = 0.1          # nn.LeakyReLU(0.1)
N_OUT = 6                # nn.Linear(1024, 6)


# ----------------------------------------------------------------------------
# Kernel 1: fused (X @ W + b) + LeakyReLU — used by the conv layers (im2col).
# ----------------------------------------------------------------------------
def _conv_mm_kernel(x_ref, w_ref, b_ref, o_ref):
    y = jnp.dot(x_ref[...], w_ref[...], preferred_element_type=jnp.float32)
    y = y + b_ref[...]
    o_ref[...] = jnp.where(y >= 0, y, NEG_SLOPE * y).astype(o_ref.dtype)


def conv_matmul_leaky(x, w, b):
    """leaky_relu(x @ w + b); x:(M,K), w:(K,N), b:(N,) — all f32."""
    M, K = x.shape
    K2, N = w.shape
    assert K == K2
    # Everything fits in VMEM; 1 step, or 2 "parallel" steps for v7x's 2nd TC.
    nsplit = 2 if (M >= 256 and M % 16 == 0) else 1
    tm = M // nsplit
    b2 = b.reshape(1, N)
    return pl.pallas_call(
        _conv_mm_kernel,
        out_shape=jax.ShapeDtypeStruct((M, N), jnp.float32),
        grid_spec=pltpu.PrefetchScalarGridSpec(
            num_scalar_prefetch=0,
            grid=(nsplit,),
            in_specs=[
                pl.BlockSpec((tm, K), lambda i: (i, 0)),
                pl.BlockSpec((K, N), lambda i: (0, 0)),
                pl.BlockSpec((1, N), lambda i: (0, 0)),
            ],
            out_specs=pl.BlockSpec((tm, N), lambda i: (i, 0)),
        ),
        compiler_params=pltpu.CompilerParams(dimension_semantics=("parallel",)),
        cost_estimate=pl.CostEstimate(
            flops=2 * M * K * N, transcendentals=0,
            bytes_accessed=4 * (M * K + K * N + M * N + N)),
    )(x, w, b2)


# ----------------------------------------------------------------------------
# Kernel 2: fused conv3 (im2col matmul + LeakyReLU) + NCHW-flatten + fc1.
# The flatten is folded into the fc weight:
#   out[b,n] = sum_{q,c} y[b*P+q, c] * Wfc[n, c*P+q]
#            = ( Rsel @ ((Y @ W96) * Mask) @ Csel )[b, n]
# with W96[c, q*N+n] = Wfc[n, c*P+q], Mask[r, q*N+n] = (r % P == q),
#      Rsel[b, r] = (r // P == b),   Csel[q*N+n, n'] = (n == n').
# Only plain 2-D matmuls / elementwise ops — no in-kernel reshape/transposes.
# ----------------------------------------------------------------------------
def _tail_kernel(cols_ref, w3_ref, b3_ref, w96_ref, mask_ref, rsel_ref,
                 csel_ref, bfc_ref, o_ref):
    y = jnp.dot(cols_ref[...], w3_ref[...], preferred_element_type=jnp.float32)
    y = y + b3_ref[...]
    y = jnp.where(y >= 0, y, NEG_SLOPE * y)                       # (B*P, Cout)
    u = jnp.dot(y, w96_ref[...], preferred_element_type=jnp.float32)
    u = u * mask_ref[...]                                         # (B*P, P*N)
    s = jnp.dot(rsel_ref[...], u, preferred_element_type=jnp.float32)   # (B, P*N)
    o = jnp.dot(s, csel_ref[...], preferred_element_type=jnp.float32)   # (B, N)
    o_ref[...] = (o + bfc_ref[...]).astype(o_ref.dtype)


def tail_conv_fc(x_nhwc, w3_oihw, b3, wfc, bfc):
    B = x_nhwc.shape[0]
    Cout, Cin, kh, kw = w3_oihw.shape
    cols, OH, OW = _im2col(x_nhwc, kh, 2, 1)              # (B*P, K)
    K = kh * kw * Cin
    P = OH * OW
    M = B * P
    w3_mat = jnp.transpose(w3_oihw, (2, 3, 1, 0)).reshape(K, Cout)
    b3_2 = b3.reshape(1, Cout)
    # fc weight permuted so it acts directly on the NHWC-ordered conv rows.
    w96 = jnp.transpose(wfc.reshape(N_OUT, Cout, P), (1, 2, 0)).reshape(Cout, P * N_OUT)
    mask = ((jnp.arange(P * N_OUT)[None, :] // N_OUT)
            == (jnp.arange(M)[:, None] % P)).astype(jnp.float32)
    rsel = ((jnp.arange(M)[None, :] // P)
            == jnp.arange(B)[:, None]).astype(jnp.float32)
    csel = ((jnp.arange(P * N_OUT)[:, None] % N_OUT)
            == jnp.arange(N_OUT)[None, :]).astype(jnp.float32)
    bfc2 = bfc.reshape(1, N_OUT)

    flops = 2 * (M * K * Cout + M * Cout * P * N_OUT
                 + B * M * P * N_OUT + B * P * N_OUT * N_OUT)
    nbytes = 4 * (M * K + K * Cout + Cout + Cout * P * N_OUT
                  + M * P * N_OUT + B * M + P * N_OUT * N_OUT + N_OUT + B * N_OUT)

    def _full(shape):
        return pl.BlockSpec(shape, lambda i: (0, 0))

    return pl.pallas_call(
        _tail_kernel,
        out_shape=jax.ShapeDtypeStruct((B, N_OUT), jnp.float32),
        grid_spec=pltpu.PrefetchScalarGridSpec(
            num_scalar_prefetch=0,
            grid=(1,),
            in_specs=[
                _full((M, K)), _full((K, Cout)), _full((1, Cout)),
                _full((Cout, P * N_OUT)), _full((M, P * N_OUT)),
                _full((B, M)), _full((P * N_OUT, N_OUT)), _full((1, N_OUT)),
            ],
            out_specs=_full((B, N_OUT)),
        ),
        compiler_params=pltpu.CompilerParams(dimension_semantics=("arbitrary",)),
        cost_estimate=pl.CostEstimate(flops=flops, transcendentals=0,
                                      bytes_accessed=nbytes),
    )(cols, w3_mat, b3_2, w96, mask, rsel, csel, bfc2)


# ----------------------------------------------------------------------------
# Glue: im2col patch extraction (XLA slices/pad only; all compute is in Pallas)
# ----------------------------------------------------------------------------
# TODO(synk): the strided (kh,kw) window gather is not cleanly expressible as a
# BlockSpec index_map, so im2col stays as XLA slices outside the kernels.
def _im2col(x, k, s, p):
    B, H, W, C = x.shape
    xp = jnp.pad(x, ((0, 0), (p, p), (p, p), (0, 0)))
    OH = (H + 2 * p - k) // s + 1
    OW = (W + 2 * p - k) // s + 1
    cols = []
    for ki in range(k):
        for kj in range(k):
            cols.append(xp[:, ki:ki + s * OH:s, kj:kj + s * OW:s, :])
    patches = jnp.concatenate(cols, axis=-1)              # (B, OH, OW, k*k*C)
    return patches.reshape(B * OH * OW, k * k * C), OH, OW


def conv2d_leaky(x_nhwc, w_oihw, b, stride=2, pad=1):
    Cout, Cin, kh, kw = w_oihw.shape
    B = x_nhwc.shape[0]
    cols, OH, OW = _im2col(x_nhwc, kh, stride, pad)
    w_mat = jnp.transpose(w_oihw, (2, 3, 1, 0)).reshape(kh * kw * Cin, Cout)
    y = conv_matmul_leaky(cols, w_mat, b)
    return y.reshape(B, OH, OW, Cout)


# ----------------------------------------------------------------------------
# Parameters (deterministic, torch-default-style uniform init)
# ----------------------------------------------------------------------------
def init_params(key):
    def uni(k, shape, fan_in):
        bound = 1.0 / (fan_in ** 0.5)
        return jax.random.uniform(k, shape, jnp.float32, -bound, bound)

    keys = iter(jax.random.split(key, 10))
    p = {}
    conv_cfg = [(3, 32), (32, 32), (32, 64), (64, 64)]
    for i, (cin, cout) in enumerate(conv_cfg):
        fan_in = cin * 4 * 4
        p[f"conv{i}_w"] = uni(next(keys), (cout, cin, 4, 4), fan_in)
        p[f"conv{i}_b"] = uni(next(keys), (cout,), fan_in)
    p["fc1_w"] = uni(next(keys), (N_OUT, 1024), 1024)     # torch Linear (out, in)
    p["fc1_b"] = uni(next(keys), (N_OUT,), 1024)
    return p


# ----------------------------------------------------------------------------
# Forward pass (Encoder_pxy.forward)
# ----------------------------------------------------------------------------
def encoder_forward(params, img_nchw):
    x = jnp.transpose(img_nchw, (0, 2, 3, 1))             # NCHW -> NHWC
    # conv0: pad Cin 3 -> 8 so the im2col K is 16*8 = 128 (lane-dense).
    x = jnp.pad(x, ((0, 0), (0, 0), (0, 0), (0, 8 - x.shape[-1])))
    w0 = jnp.pad(params["conv0_w"], ((0, 0), (0, 8 - 3), (0, 0), (0, 0)))
    x = conv2d_leaky(x, w0, params["conv0_b"])
    x = conv2d_leaky(x, params["conv1_w"], params["conv1_b"])
    x = conv2d_leaky(x, params["conv2_w"], params["conv2_b"])
    # fused conv3 + flatten(NCHW) + fc1
    return tail_conv_fc(x, params["conv3_w"], params["conv3_b"],
                        params["fc1_w"], params["fc1_b"])


# ----------------------------------------------------------------------------
# Pure-JAX reference (matches the torch module) for a loose parity check
# ----------------------------------------------------------------------------
def _reference_forward(params, img):
    x = img
    for i in range(4):
        w = params[f"conv{i}_w"]
        b = params[f"conv{i}_b"]
        x = jax.lax.conv_general_dilated(
            x, w, window_strides=(2, 2), padding=((1, 1), (1, 1)),
            dimension_numbers=("NCHW", "OIHW", "NCHW"),
            precision=jax.lax.Precision.HIGHEST)
        x = x + b[None, :, None, None]
        x = jnp.where(x >= 0, x, NEG_SLOPE * x)
    x = x.reshape(x.shape[0], -1)
    return jnp.dot(x, params["fc1_w"].T,
                   precision=jax.lax.Precision.HIGHEST) + params["fc1_b"][None]


if __name__ == "__main__":
    key = jax.random.PRNGKey(0)
    pkey, xkey = jax.random.split(key)
    params = init_params(pkey)

    # 64x64 input so the flattened conv feature size is 1024 (fc1's in_features).
    img = jax.random.normal(xkey, (2, 3, 64, 64), jnp.float32)

    fwd = jax.jit(encoder_forward)
    out = jax.block_until_ready(fwd(params, img))

    assert out.shape == (2, N_OUT)
    assert bool(jnp.all(jnp.isfinite(out)))

    ref = _reference_forward(params, img)
    rel_err = float(jnp.max(jnp.abs(out - ref)) / (jnp.max(jnp.abs(ref)) + 1e-6))
    assert rel_err < 5e-2, f"mismatch vs reference: rel err {rel_err}"
    print("KERNEL_OK")
</pallas_src>

<mosaic_0001>
module attributes {stable_mosaic.version = 11 : i64} {
  func.func @_conv_mm_kernel(%arg0: i32, %arg1: memref<1024x128xf32, #tpu.memory_space<vmem>>, %arg2: memref<128x32xf32, #tpu.memory_space<vmem>>, %arg3: memref<1x32xf32, #tpu.memory_space<vmem>>, %arg4: memref<1024x32xf32, #tpu.memory_space<vmem>>) attributes {dimension_semantics = [#tpu.dimension_semantics<parallel>], iteration_bounds = array<i64: 2>, scalar_prefetch = 0 : i64, scratch_operands = 0 : i64, tpu.core_type = #tpu.core_type<tc>, window_params = [{transform_indices = @transform_0, window_bounds = array<i64: 1024, 128>}, {pipeline_mode = #tpu.pipeline_mode<synchronous>, transform_indices = @transform_1, window_bounds = array<i64: 128, 32>}, {pipeline_mode = #tpu.pipeline_mode<synchronous>, transform_indices = @transform_2, window_bounds = array<i64: 1, 32>}, {transform_indices = @transform_3, window_bounds = array<i64: 1024, 32>}]} {
    %c0 = arith.constant 0 : index
    %c0_0 = arith.constant 0 : index
    %0 = vector.load %arg1[%c0, %c0_0] : memref<1024x128xf32, #tpu.memory_space<vmem>>, vector<1024x128xf32>
    %c0_1 = arith.constant 0 : index
    %c0_2 = arith.constant 0 : index
    %1 = vector.load %arg2[%c0_1, %c0_2] : memref<128x32xf32, #tpu.memory_space<vmem>>, vector<128x32xf32>
    %cst = arith.constant dense<0.000000e+00> : vector<1024x32xf32>
    %2 = tpu.matmul %0, %1, %cst {dimension_numbers = #tpu.dot_dimension_numbers<[1], [0], [0], [1], [0, 0, 1, 1], [], []>} : vector<1024x128xf32>, vector<128x32xf32>, vector<1024x32xf32> -> vector<1024x32xf32>
    %c0_3 = arith.constant 0 : index
    %c0_4 = arith.constant 0 : index
    %3 = vector.load %arg3[%c0_3, %c0_4] : memref<1x32xf32, #tpu.memory_space<vmem>>, vector<1x32xf32>
    %4 = vector.broadcast %3 : vector<1x32xf32> to vector<1024x32xf32>
    %5 = arith.addf %2, %4 : vector<1024x32xf32>
    %cst_5 = arith.constant 0.000000e+00 : f32
    %6 = vector.broadcast %cst_5 : f32 to vector<1024x32xf32>
    %7 = arith.cmpf oge, %5, %6 : vector<1024x32xf32>
    %cst_6 = arith.constant 1.000000e-01 : f32
    %8 = vector.broadcast %cst_6 : f32 to vector<1024x32xf32>
    %9 = arith.mulf %8, %5 : vector<1024x32xf32>
    %10 = arith.select %7, %5, %9 : vector<1024x32xi1>, vector<1024x32xf32>
    %c0_7 = arith.constant 0 : index
    %c0_8 = arith.constant 0 : index
    %11 = vector.load %arg4[%c0_7, %c0_8] : memref<1024x32xf32, #tpu.memory_space<vmem>>, vector<1024x32xf32>
    tpu.vector_store %arg4[%c0_7, %c0_8], %10 {strides = array<i32>} : memref<1024x32xf32, #tpu.memory_space<vmem>>, vector<1024x32xf32>,
    return
  }
  func.func @transform_0(%arg0: i32) -> (i32, i32) {
    %c0_i32 = arith.constant 0 : i32
    %c0_i32_0 = arith.constant 0 : i32
    return %arg0, %c0_i32 : i32, i32
  }
  func.func @transform_1(%arg0: i32) -> (i32, i32) {
    %c0_i32 = arith.constant 0 : i32
    %c0_i32_0 = arith.constant 0 : i32
    %c0_i32_1 = arith.constant 0 : i32
    return %c0_i32, %c0_i32_0 : i32, i32
  }
  func.func @transform_2(%arg0: i32) -> (i32, i32) {
    %c0_i32 = arith.constant 0 : i32
    %c0_i32_0 = arith.constant 0 : i32
    %c0_i32_1 = arith.constant 0 : i32
    return %c0_i32, %c0_i32_0 : i32, i32
  }
  func.func @transform_3(%arg0: i32) -> (i32, i32) {
    %c0_i32 = arith.constant 0 : i32
    %c0_i32_0 = arith.constant 0 : i32
    return %arg0, %c0_i32 : i32, i32
  }
}

module attributes {stable_mosaic.version = 11 : i64} {
  func.func @_conv_mm_kernel(%arg0: i32, %arg1: memref<256x512xf32, #tpu.memory_space<vmem>>, %arg2: memref<512x32xf32, #tpu.memory_space<vmem>>, %arg3: memref<1x32xf32, #tpu.memory_space<vmem>>, %arg4: memref<256x32xf32, #tpu.memory_space<vmem>>) attributes {dimension_semantics = [#tpu.dimension_semantics<parallel>], iteration_bounds = array<i64: 2>, scalar_prefetch = 0 : i64, scratch_operands = 0 : i64, tpu.core_type = #tpu.core_type<tc>, window_params = [{transform_indices = @transform_0, window_bounds = array<i64: 256, 512>}, {pipeline_mode = #tpu.pipeline_mode<synchronous>, transform_indices = @transform_1, window_bounds = array<i64: 512, 32>}, {pipeline_mode = #tpu.pipeline_mode<synchronous>, transform_indices = @transform_2, window_bounds = array<i64: 1, 32>}, {transform_indices = @transform_3, window_bounds = array<i64: 256, 32>}]} {
    %c0 = arith.constant 0 : index
    %c0_0 = arith.constant 0 : index
    %0 = vector.load %arg1[%c0, %c0_0] : memref<256x512xf32, #tpu.memory_space<vmem>>, vector<256x512xf32>
    %c0_1 = arith.constant 0 : index
    %c0_2 = arith.constant 0 : index
    %1 = vector.load %arg2[%c0_1, %c0_2] : memref<512x32xf32, #tpu.memory_space<vmem>>, vector<512x32xf32>
    %cst = arith.constant dense<0.000000e+00> : vector<256x32xf32>
    %2 = tpu.matmul %0, %1, %cst {dimension_numbers = #tpu.dot_dimension_numbers<[1], [0], [0], [1], [0, 0, 1, 1], [], []>} : vector<256x512xf32>, vector<512x32xf32>, vector<256x32xf32> -> vector<256x32xf32>
    %c0_3 = arith.constant 0 : index
    %c0_4 = arith.constant 0 : index
    %3 = vector.load %arg3[%c0_3, %c0_4] : memref<1x32xf32, #tpu.memory_space<vmem>>, vector<1x32xf32>
    %4 = vector.broadcast %3 : vector<1x32xf32> to vector<256x32xf32>
    %5 = arith.addf %2, %4 : vector<256x32xf32>
    %cst_5 = arith.constant 0.000000e+00 : f32
    %6 = vector.broadcast %cst_5 : f32 to vector<256x32xf32>
    %7 = arith.cmpf oge, %5, %6 : vector<256x32xf32>
    %cst_6 = arith.constant 1.000000e-01 : f32
    %8 = vector.broadcast %cst_6 : f32 to vector<256x32xf32>
    %9 = arith.mulf %8, %5 : vector<256x32xf32>
    %10 = arith.select %7, %5, %9 : vector<256x32xi1>, vector<256x32xf32>
    %c0_7 = arith.constant 0 : index
    %c0_8 = arith.constant 0 : index
    %11 = vector.load %arg4[%c0_7, %c0_8] : memref<256x32xf32, #tpu.memory_space<vmem>>, vector<256x32xf32>
    tpu.vector_store %arg4[%c0_7, %c0_8], %10 {strides = array<i32>} : memref<256x32xf32, #tpu.memory_space<vmem>>, vector<256x32xf32>,
    return
  }
  func.func @transform_0(%arg0: i32) -> (i32, i32) {
    %c0_i32 = arith.constant 0 : i32
    %c0_i32_0 = arith.constant 0 : i32
    return %arg0, %c0_i32 : i32, i32
  }
  func.func @transform_1(%arg0: i32) -> (i32, i32) {
    %c0_i32 = arith.constant 0 : i32
    %c0_i32_0 = arith.constant 0 : i32
    %c0_i32_1 = arith.constant 0 : i32
    return %c0_i32, %c0_i32_0 : i32, i32
  }
  func.func @transform_2(%arg0: i32) -> (i32, i32) {
    %c0_i32 = arith.constant 0 : i32
    %c0_i32_0 = arith.constant 0 : i32
    %c0_i32_1 = arith.constant 0 : i32
    return %c0_i32, %c0_i32_0 : i32, i32
  }
  func.func @transform_3(%arg0: i32) -> (i32, i32) {
    %c0_i32 = arith.constant 0 : i32
    %c0_i32_0 = arith.constant 0 : i32
    return %arg0, %c0_i32 : i32, i32
  }
}

module attributes {stable_mosaic.version = 11 : i64} {
  func.func @_conv_mm_kernel(%arg0: i32, %arg1: memref<128x512xf32, #tpu.memory_space<vmem>>, %arg2: memref<512x64xf32, #tpu.memory_space<vmem>>, %arg3: memref<1x64xf32, #tpu.memory_space<vmem>>, %arg4: memref<128x64xf32, #tpu.memory_space<vmem>>) attributes {dimension_semantics = [#tpu.dimension_semantics<parallel>], iteration_bounds = array<i64: 1>, scalar_prefetch = 0 : i64, scratch_operands = 0 : i64, tpu.core_type = #tpu.core_type<tc>, window_params = [{transform_indices = @transform_0, window_bounds = array<i64: 128, 512>}, {pipeline_mode = #tpu.pipeline_mode<synchronous>, transform_indices = @transform_1, window_bounds = array<i64: 512, 64>}, {pipeline_mode = #tpu.pipeline_mode<synchronous>, transform_indices = @transform_2, window_bounds = array<i64: 1, 64>}, {transform_indices = @transform_3, window_bounds = array<i64: 128, 64>}]} {
    %c0 = arith.constant 0 : index
    %c0_0 = arith.constant 0 : index
    %0 = vector.load %arg1[%c0, %c0_0] : memref<128x512xf32, #tpu.memory_space<vmem>>, vector<128x512xf32>
    %c0_1 = arith.constant 0 : index
    %c0_2 = arith.constant 0 : index
    %1 = vector.load %arg2[%c0_1, %c0_2] : memref<512x64xf32, #tpu.memory_space<vmem>>, vector<512x64xf32>
    %cst = arith.constant dense<0.000000e+00> : vector<128x64xf32>
    %2 = tpu.matmul %0, %1, %cst {dimension_numbers = #tpu.dot_dimension_numbers<[1], [0], [0], [1], [0, 0, 1, 1], [], []>} : vector<128x512xf32>, vector<512x64xf32>, vector<128x64xf32> -> vector<128x64xf32>
    %c0_3 = arith.constant 0 : index
    %c0_4 = arith.constant 0 : index
    %3 = vector.load %arg3[%c0_3, %c0_4] : memref<1x64xf32, #tpu.memory_space<vmem>>, vector<1x64xf32>
    %4 = vector.broadcast %3 : vector<1x64xf32> to vector<128x64xf32>
    %5 = arith.addf %2, %4 : vector<128x64xf32>
    %cst_5 = arith.constant 0.000000e+00 : f32
    %6 = vector.broadcast %cst_5 : f32 to vector<128x64xf32>
    %7 = arith.cmpf oge, %5, %6 : vector<128x64xf32>
    %cst_6 = arith.constant 1.000000e-01 : f32
    %8 = vector.broadcast %cst_6 : f32 to vector<128x64xf32>
    %9 = arith.mulf %8, %5 : vector<128x64xf32>
    %10 = arith.select %7, %5, %9 : vector<128x64xi1>, vector<128x64xf32>
    %c0_7 = arith.constant 0 : index
    %c0_8 = arith.constant 0 : index
    %11 = vector.load %arg4[%c0_7, %c0_8] : memref<128x64xf32, #tpu.memory_space<vmem>>, vector<128x64xf32>
    tpu.vector_store %arg4[%c0_7, %c0_8], %10 {strides = array<i32>} : memref<128x64xf32, #tpu.memory_space<vmem>>, vector<128x64xf32>,
    return
  }
  func.func @transform_0(%arg0: i32) -> (i32, i32) {
    %c0_i32 = arith.constant 0 : i32
    %c0_i32_0 = arith.constant 0 : i32
    return %arg0, %c0_i32 : i32, i32
  }
  func.func @transform_1(%arg0: i32) -> (i32, i32) {
    %c0_i32 = arith.constant 0 : i32
    %c0_i32_0 = arith.constant 0 : i32
    %c0_i32_1 = arith.constant 0 : i32
    return %c0_i32, %c0_i32_0 : i32, i32
  }
  func.func @transform_2(%arg0: i32) -> (i32, i32) {
    %c0_i32 = arith.constant 0 : i32
    %c0_i32_0 = arith.constant 0 : i32
    %c0_i32_1 = arith.constant 0 : i32
    return %c0_i32, %c0_i32_0 : i32, i32
  }
  func.func @transform_3(%arg0: i32) -> (i32, i32) {
    %c0_i32 = arith.constant 0 : i32
    %c0_i32_0 = arith.constant 0 : i32
    return %arg0, %c0_i32 : i32, i32
  }
}

module attributes {stable_mosaic.version = 11 : i64} {
  func.func @_tail_kernel(%arg0: i32, %arg1: memref<32x1024xf32, #tpu.memory_space<vmem>>, %arg2: memref<1024x64xf32, #tpu.memory_space<vmem>>, %arg3: memref<1x64xf32, #tpu.memory_space<vmem>>, %arg4: memref<64x96xf32, #tpu.memory_space<vmem>>, %arg5: memref<32x96xf32, #tpu.memory_space<vmem>>, %arg6: memref<2x32xf32, #tpu.memory_space<vmem>>, %arg7: memref<96x6xf32, #tpu.memory_space<vmem>>, %arg8: memref<1x6xf32, #tpu.memory_space<vmem>>, %arg9: memref<2x6xf32, #tpu.memory_space<vmem>>) attributes {dimension_semantics = [#tpu.dimension_semantics<arbitrary>], iteration_bounds = array<i64: 1>, scalar_prefetch = 0 : i64, scratch_operands = 0 : i64, tpu.core_type = #tpu.core_type<tc>, window_params = [{pipeline_mode = #tpu.pipeline_mode<synchronous>, transform_indices = @transform_0, window_bounds = array<i64: 32, 1024>}, {pipeline_mode = #tpu.pipeline_mode<synchronous>, transform_indices = @transform_1, window_bounds = array<i64: 1024, 64>}, {pipeline_mode = #tpu.pipeline_mode<synchronous>, transform_indices = @transform_2, window_bounds = array<i64: 1, 64>}, {pipeline_mode = #tpu.pipeline_mode<synchronous>, transform_indices = @transform_3, window_bounds = array<i64: 64, 96>}, {pipeline_mode = #tpu.pipeline_mode<synchronous>, transform_indices = @transform_4, window_bounds = array<i64: 32, 96>}, {pipeline_mode = #tpu.pipeline_mode<synchronous>, transform_indices = @transform_5, window_bounds = array<i64: 2, 32>}, {pipeline_mode = #tpu.pipeline_mode<synchronous>, transform_indices = @transform_6, window_bounds = array<i64: 96, 6>}, {pipeline_mode = #tpu.pipeline_mode<synchronous>, transform_indices = @transform_7, window_bounds = array<i64: 1, 6>}, {pipeline_mode = #tpu.pipeline_mode<synchronous>, transform_indices = @transform_8, window_bounds = array<i64: 2, 6>}]} {
    %c0 = arith.constant 0 : index
    %c0_0 = arith.constant 0 : index
    %0 = vector.load %arg1[%c0, %c0_0] : memref<32x1024xf32, #tpu.memory_space<vmem>>, vector<32x1024xf32>
    %c0_1 = arith.constant 0 : index
    %c0_2 = arith.constant 0 : index
    %1 = vector.load %arg2[%c0_1, %c0_2] : memref<1024x64xf32, #tpu.memory_space<vmem>>, vector<1024x64xf32>
    %cst = arith.constant dense<0.000000e+00> : vector<32x64xf32>
    %2 = tpu.matmul %0, %1, %cst {dimension_numbers = #tpu.dot_dimension_numbers<[1], [0], [0], [1], [0, 0, 1, 1], [], []>} : vector<32x1024xf32>, vector<1024x64xf32>, vector<32x64xf32> -> vector<32x64xf32>
    %c0_3 = arith.constant 0 : index
    %c0_4 = arith.constant 0 : index
    %3 = vector.load %arg3[%c0_3, %c0_4] : memref<1x64xf32, #tpu.memory_space<vmem>>, vector<1x64xf32>
    %4 = vector.broadcast %3 : vector<1x64xf32> to vector<32x64xf32>
    %5 = arith.addf %2, %4 : vector<32x64xf32>
    %cst_5 = arith.constant 0.000000e+00 : f32
    %6 = vector.broadcast %cst_5 : f32 to vector<32x64xf32>
    %7 = arith.cmpf oge, %5, %6 : vector<32x64xf32>
    %cst_6 = arith.constant 1.000000e-01 : f32
    %8 = vector.broadcast %cst_6 : f32 to vector<32x64xf32>
    %9 = arith.mulf %8, %5 : vector<32x64xf32>
    %10 = arith.select %7, %5, %9 : vector<32x64xi1>, vector<32x64xf32>
    %c0_7 = arith.constant 0 : index
    %c0_8 = arith.constant 0 : index
    %11 = vector.load %arg4[%c0_7, %c0_8] : memref<64x96xf32, #tpu.memory_space<vmem>>, vector<64x96xf32>
    %cst_9 = arith.constant dense<0.000000e+00> : vector<32x96xf32>
    %12 = tpu.matmul %10, %11, %cst_9 {dimension_numbers = #tpu.dot_dimension_numbers<[1], [0], [0], [1], [0, 0, 1, 1], [], []>} : vector<32x64xf32>, vector<64x96xf32>, vector<32x96xf32> -> vector<32x96xf32>
    %c0_10 = arith.constant 0 : index
    %c0_11 = arith.constant 0 : index
    %13 = vector.load %arg5[%c0_10, %c0_11] : memref<32x96xf32, #tpu.memory_space<vmem>>, vector<32x96xf32>
    %14 = arith.mulf %12, %13 : vector<32x96xf32>
    %c0_12 = arith.constant 0 : index
    %c0_13 = arith.constant 0 : index
    %15 = vector.load %arg6[%c0_12, %c0_13] : memref<2x32xf32, #tpu.memory_space<vmem>>, vector<2x32xf32>
    %cst_14 = arith.constant dense<0.000000e+00> : vector<2x96xf32>
    %16 = tpu.matmul %15, %14, %cst_14 {dimension_numbers = #tpu.dot_dimension_numbers<[1], [0], [0], [1], [0, 0, 1, 1], [], []>} : vector<2x32xf32>, vector<32x96xf32>, vector<2x96xf32> -> vector<2x96xf32>
    %c0_15 = arith.constant 0 : index
    %c0_16 = arith.constant 0 : index
    %17 = vector.load %arg7[%c0_15, %c0_16] : memref<96x6xf32, #tpu.memory_space<vmem>>, vector<96x6xf32>
    %cst_17 = arith.constant dense<0.000000e+00> : vector<2x6xf32>
    %18 = tpu.matmul %16, %17, %cst_17 {dimension_numbers = #tpu.dot_dimension_numbers<[1], [0], [0], [1], [0, 0, 1, 1], [], []>} : vector<2x96xf32>, vector<96x6xf32>, vector<2x6xf32> -> vector<2x6xf32>
    %c0_18 = arith.constant 0 : index
    %c0_19 = arith.constant 0 : index
    %19 = vector.load %arg8[%c0_18, %c0_19] : memref<1x6xf32, #tpu.memory_space<vmem>>, vector<1x6xf32>
    %20 = vector.broadcast %19 : vector<1x6xf32> to vector<2x6xf32>
    %21 = arith.addf %18, %20 : vector<2x6xf32>
    %c0_20 = arith.constant 0 : index
    %c0_21 = arith.constant 0 : index
    %22 = vector.load %arg9[%c0_20, %c0_21] : memref<2x6xf32, #tpu.memory_space<vmem>>, vector<2x6xf32>
    tpu.vector_store %arg9[%c0_20, %c0_21], %21 {strides = array<i32>} : memref<2x6xf32, #tpu.memory_space<vmem>>, vector<2x6xf32>,
    return
  }
  func.func @transform_0(%arg0: i32) -> (i32, i32) {
    %c0_i32 = arith.constant 0 : i32
    %c0_i32_0 = arith.constant 0 : i32
    %c0_i32_1 = arith.constant 0 : i32
    return %c0_i32, %c0_i32_0 : i32, i32
  }
  func.func @transform_1(%arg0: i32) -> (i32, i32) {
    %c0_i32 = arith.constant 0 : i32
    %c0_i32_0 = arith.constant 0 : i32
    %c0_i32_1 = arith.constant 0 : i32
    return %c0_i32, %c0_i32_0 : i32, i32
  }
  func.func @transform_2(%arg0: i32) -> (i32, i32) {
    %c0_i32 = arith.constant 0 : i32
    %c0_i32_0 = arith.constant 0 : i32
    %c0_i32_1 = arith.constant 0 : i32
    return %c0_i32, %c0_i32_0 : i32, i32
  }
  func.func @transform_3(%arg0: i32) -> (i32, i32) {
    %c0_i32 = arith.constant 0 : i32
    %c0_i32_0 = arith.constant 0 : i32
    %c0_i32_1 = arith.constant 0 : i32
    return %c0_i32, %c0_i32_0 : i32, i32
  }
  func.func @transform_4(%arg0: i32) -> (i32, i32) {
    %c0_i32 = arith.constant 0 : i32
    %c0_i32_0 = arith.constant 0 : i32
    %c0_i32_1 = arith.constant 0 : i32
    return %c0_i32, %c0_i32_0 : i32, i32
  }
  func.func @transform_5(%arg0: i32) -> (i32, i32) {
    %c0_i32 = arith.constant 0 : i32
    %c0_i32_0 = arith.constant 0 : i32
    %c0_i32_1 = arith.constant 0 : i32
    return %c0_i32, %c0_i32_0 : i32, i32
  }
  func.func @transform_6(%arg0: i32) -> (i32, i32) {
    %c0_i32 = arith.constant 0 : i32
    %c0_i32_0 = arith.constant 0 : i32
    %c0_i32_1 = arith.constant 0 : i32
    return %c0_i32, %c0_i32_0 : i32, i32
  }
  func.func @transform_7(%arg0: i32) -> (i32, i32) {
    %c0_i32 = arith.constant 0 : i32
    %c0_i32_0 = arith.constant 0 : i32
    %c0_i32_1 = arith.constant 0 : i32
    return %c0_i32, %c0_i32_0 : i32, i32
  }
  func.func @transform_8(%arg0: i32) -> (i32, i32) {
    %c0_i32 = arith.constant 0 : i32
    %c0_i32_0 = arith.constant 0 : i32
    %c0_i32_1 = arith.constant 0 : i32
    return %c0_i32, %c0_i32_0 : i32, i32
  }
}

</mosaic_0001>

<bundles_post_ra>
// kernel: encoder_forward.4
= control target key start
LH: loop header
LB: loop body
LE: loop exit
PB: predicated region body
PF: predicated region fallthrough
CT: control target
= control target key end

     0   :  { %s2048_s12 = smov 0   ;;  %s2648_s0 = inlined_call_operand.vmem [shape: f32[2048,128], index: 0, kind: input, shape index: {}]   ;;  %s2649_s1 = inlined_call_operand.vmem [shape: f32[128,32], index: 1, kind: input, shape index: {}]   ;;  %s2650_s2 = inlined_call_operand.vmem [shape: f32[1,32], index: 2, kind: input, shape index: {}]   ;;  %s2651_s3 = inlined_call_operand.vmem [shape: f32[2048,32], index: 3, kind: output, shape index: {}]  }
   0x1 LB: > { %s1599_s13 = sadd.s32 4294967295, %s2026_s12   ;;  %p1603_p0 = scmp.ge.s32.totalorder %s2026_s12, 1  ;;  %s2026_s12 = sphi %s2048_s12, %s13_s12  }
   0x2   : > { %p138_p1 = scmp.lt.s32.totalorder %s2026_s12, 3 }
   0x4   : > { %p139_p2 = pnand %p1603_p0, %p138_p1 }
   0x5   : > { %s1604_s30 = sshll.u32 (!%p139_p2), %s1599_s13, 7 }
   0x6   : > { %142 = sbr.rel (%p139_p2) target bundleno = 371 (0x173), region = 32  ;;  %p163_p3 = scmp.lt.s32.totalorder (!%p139_p2), %s1604_s30, 255 }
   0xb   : > { %v317_v0 = vld [vmem:[%s2649_s1 + $0x78] sm:$0xff]  ;;  %v316_v1 = vld [vmem:[%s2649_s1 + $0x70] sm:$0xff]  ;;  %v315_v2 = vld [vmem:[%s2649_s1 + $0x68] sm:$0xff]  ;;  %s2653_s30 = smov (!%p163_p3, %s1604_s30), 255  ;;  %vm1414_vm0 = vcmask 261120  }
   0xc   : > { %1755 = vmatprep.subr.mxu0 %v317_v0  ;;  %1979 = vmatprep.subr.mxu1 %v317_v0  ;;  %v314_v3 = vld [vmem:[%s2649_s1 + $0x60] sm:$0xff]  ;;  %v313_v4 = vld [vmem:[%s2649_s1 + $0x58] sm:$0xff]  ;;  %v312_v5 = vld [vmem:[%s2649_s1 + $0x50] sm:$0xff]  ;;  %s1605_s17 = sshll.u32 %s2653_s30, 3 }
   0xd   : > { %1756 = vmatpush3.msra.mxu0 %v317_v0  ;;  %1995 = vmatpush3.msra.mxu1 %v317_v0  ;;  %v311_v6 = vld [vmem:[%s2649_s1 + $0x48] sm:$0xff]  ;;  %v310_v7 = vld [vmem:[%s2649_s1 + $0x40] sm:$0xff]  ;;  %v309_v8 = vld [vmem:[%s2649_s1 + $0x38] sm:$0xff]  ;;  %s2111_s22 = scalar_lea.vmem %s2648_s0, %s1605_s17  ;;  %s2256_s29 = scalar_lea.vmem %s2651_s3, %s1605_s17 }
   0xe   : > { %1757 = vmatprep.subr.mxu0 %v316_v1  ;;  %1980 = vmatprep.subr.mxu1 %v316_v1  ;;  %v308_v9 = vld [vmem:[%s2649_s1 + $0x30] sm:$0xff]  ;;  %v307_v10 = vld [vmem:[%s2649_s1 + $0x28] sm:$0xff]  ;;  %v306_v11 = vld [vmem:[%s2649_s1 + $0x20] sm:$0xff] }
   0xf   : > { %1758 = vmatpush3.msra.mxu0 %v316_v1  ;;  %1996 = vmatpush3.msra.mxu1 %v316_v1  ;;  %v305_v12 = vld [vmem:[%s2649_s1 + $0x18] sm:$0xff]  ;;  %v304_v13 = vld [vmem:[%s2649_s1 + $0x10] sm:$0xff]  ;;  %v303_v14 = vld [vmem:[%s2649_s1 + $0x8] sm:$0xff] }
  0x10   : > { %1759 = vmatprep.subr.mxu0 %v315_v2  ;;  %1981 = vmatprep.subr.mxu1 %v315_v2  ;;  %v302_v15 = vld [vmem:[%s2649_s1] sm:$0xff]  ;;  %v175_v18 = vld [vmem:[%s2111_s22 + $0x8] sm:$0xff]  ;;  %v176_v20 = vld [vmem:[%s2111_s22 + $0x10] sm:$0xff] }
  0x11   : > { %1760 = vmatpush3.msra.mxu0 %v315_v2  ;;  %1997 = vmatpush3.msra.mxu1 %v315_v2  ;;  %v174_v16 = vld [vmem:[%s2111_s22] sm:$0xff]  ;;  %v239_v19 = vld [vmem:[%s2111_s22 + $0x208] sm:$0xff]  ;;  %v240_v21 = vld [vmem:[%s2111_s22 + $0x210] sm:$0xff] }
  0x12   : > { %1761 = vmatprep.subr.mxu0 %v314_v3  ;;  %1982 = vmatprep.subr.mxu1 %v314_v3  ;;  %v238_v17 = vld [vmem:[%s2111_s22 + $0x200] sm:$0xff]  ;;  %v177_v22 = vld [vmem:[%s2111_s22 + $0x18] sm:$0xff]  ;;  %v179_v26 = vld [vmem:[%s2111_s22 + $0x28] sm:$0xff] }
  0x13   : > { %1762 = vmatpush3.msra.mxu0 %v314_v3  ;;  %1998 = vmatpush3.msra.mxu1 %v314_v3  ;;  %v241_v23 = vld [vmem:[%s2111_s22 + $0x218] sm:$0xff]  ;;  %v178_v24 = vld [vmem:[%s2111_s22 + $0x20] sm:$0xff]  ;;  %v243_v27 = vld [vmem:[%s2111_s22 + $0x228] sm:$0xff] }
  0x14   : > { %1763 = vmatprep.subr.mxu0 %v313_v4  ;;  %1983 = vmatprep.subr.mxu1 %v313_v4  ;;  %v242_v25 = vld [vmem:[%s2111_s22 + $0x220] sm:$0xff]  ;;  %v180_v28 = vld [vmem:[%s2111_s22 + $0x30] sm:$0xff]  ;;  %v181_v30 = vld [vmem:[%s2111_s22 + $0x38] sm:$0xff] }
  0x15   : > { %1764 = vmatpush3.msra.mxu0 %v313_v4  ;;  %1999 = vmatpush3.msra.mxu1 %v313_v4  ;;  %v244_v29 = vld [vmem:[%s2111_s22 + $0x230] sm:$0xff]  ;;  %v245_v31 = vld [vmem:[%s2111_s22 + $0x238] sm:$0xff]  ;;  %v182_v32 = vld [vmem:[%s2111_s22 + $0x40] sm:$0xff] }
  0x16   : > { %1765 = vmatprep.subr.mxu0 %v312_v5  ;;  %1984 = vmatprep.subr.mxu1 %v312_v5  ;;  %v246_v33 = vld [vmem:[%s2111_s22 + $0x240] sm:$0xff]  ;;  %v183_v34 = vld [vmem:[%s2111_s22 + $0x48] sm:$0xff]  ;;  %v184_v36 = vld [vmem:[%s2111_s22 + $0x50] sm:$0xff] }
  0x17   : > { %1766 = vmatpush3.msra.mxu0 %v312_v5  ;;  %2000 = vmatpush3.msra.mxu1 %v312_v5  ;;  %v247_v35 = vld [vmem:[%s2111_s22 + $0x248] sm:$0xff]  ;;  %v248_v37 = vld [vmem:[%s2111_s22 + $0x250] sm:$0xff]  ;;  %v185_v38 = vld [vmem:[%s2111_s22 + $0x58] sm:$0xff] }
  0x18   : > { %1767 = vmatprep.subr.mxu0 %v311_v6  ;;  %1985 = vmatprep.subr.mxu1 %v311_v6  ;;  %v249_v39 = vld [vmem:[%s2111_s22 + $0x258] sm:$0xff]  ;;  %v186_v40 = vld [vmem:[%s2111_s22 + $0x60] sm:$0xff]  ;;  %v187_v42 = vld [vmem:[%s2111_s22 + $0x68] sm:$0xff] }
  0x19   : > { %1768 = vmatpush3.msra.mxu0 %v311_v6  ;;  %2001 = vmatpush3.msra.mxu1 %v311_v6  ;;  %v250_v41 = vld [vmem:[%s2111_s22 + $0x260] sm:$0xff]  ;;  %v251_v43 = vld [vmem:[%s2111_s22 + $0x268] sm:$0xff]  ;;  %v188_v44 = vld [vmem:[%s2111_s22 + $0x70] sm:$0xff] }
  0x1a   : > { %1769 = vmatprep.subr.mxu0 %v310_v7  ;;  %1986 = vmatprep.subr.mxu1 %v310_v7  ;;  %v252_v45 = vld [vmem:[%s2111_s22 + $0x270] sm:$0xff]  ;;  %v189_v46 = vld [vmem:[%s2111_s22 + $0x78] sm:$0xff]  ;;  %v190_v48 = vld [vmem:[%s2111_s22 + $0x80] sm:$0xff] }
  0x1b   : > { %1770 = vmatpush3.msra.mxu0 %v310_v7  ;;  %2002 = vmatpush3.msra.mxu1 %v310_v7  ;;  %v253_v47 = vld [vmem:[%s2111_s22 + $0x278] sm:$0xff]  ;;  %v254_v49 = vld [vmem:[%s2111_s22 + $0x280] sm:$0xff]  ;;  %v191_v50 = vld [vmem:[%s2111_s22 + $0x88] sm:$0xff] }
  0x1c   : > { %1771 = vmatprep.subr.mxu0 %v309_v8  ;;  %1987 = vmatprep.subr.mxu1 %v309_v8  ;;  %v255_v51 = vld [vmem:[%s2111_s22 + $0x288] sm:$0xff]  ;;  %v192_v52 = vld [vmem:[%s2111_s22 + $0x90] sm:$0xff]  ;;  %v193_v54 = vld [vmem:[%s2111_s22 + $0x98] sm:$0xff] }
  0x1d   : > { %1772 = vmatpush3.msra.mxu0 %v309_v8  ;;  %2003 = vmatpush3.msra.mxu1 %v309_v8  ;;  %v256_v53 = vld [vmem:[%s2111_s22 + $0x290] sm:$0xff]  ;;  %v257_v55 = vld [vmem:[%s2111_s22 + $0x298] sm:$0xff]  ;;  %v194_v56 = vld [vmem:[%s2111_s22 + $0xa0] sm:$0xff] }
  0x1e   : > { %1773 = vmatprep.subr.mxu0 %v308_v9  ;;  %1988 = vmatprep.subr.mxu1 %v308_v9  ;;  %v258_v57 = vld [vmem:[%s2111_s22 + $0x2a0] sm:$0xff]  ;;  %v195_v58 = vld [vmem:[%s2111_s22 + $0xa8] sm:$0xff]  ;;  %v196_v60 = vld [vmem:[%s2111_s22 + $0xb0] sm:$0xff] }
  0x1f   : > { %1774 = vmatpush3.msra.mxu0 %v308_v9  ;;  %2004 = vmatpush3.msra.mxu1 %v308_v9  ;;  %v259_v59 = vld [vmem:[%s2111_s22 + $0x2a8] sm:$0xff]  ;;  %v260_v61 = vld [vmem:[%s2111_s22 + $0x2b0] sm:$0xff]  ;;  %v197_v62 = vld [vmem:[%s2111_s22 + $0xb8] sm:$0xff] }
  0x20   : > { %1775 = vmatprep.subr.mxu0 %v307_v10  ;;  %1989 = vmatprep.subr.mxu1 %v307_v10  ;;  %v261_v63 = vld [vmem:[%s2111_s22 + $0x2b8] sm:$0xff]  ;;  %v198_v0 = vld [vmem:[%s2111_s22 + $0xc0] sm:$0xff]  ;;  %v199_v2 = vld [vmem:[%s2111_s22 + $0xc8] sm:$0xff] }
  0x21   : > { %1776 = vmatpush3.msra.mxu0 %v307_v10  ;;  %2005 = vmatpush3.msra.mxu1 %v307_v10  ;;  %v262_v1 = vld [vmem:[%s2111_s22 + $0x2c0] sm:$0xff]  ;;  %v263_v3 = vld [vmem:[%s2111_s22 + $0x2c8] sm:$0xff]  ;;  %v200_v4 = vld [vmem:[%s2111_s22 + $0xd0] sm:$0xff] }
  0x22   : > { %1777 = vmatprep.subr.mxu0 %v306_v11  ;;  %1990 = vmatprep.subr.mxu1 %v306_v11  ;;  %v264_v5 = vld [vmem:[%s2111_s22 + $0x2d0] sm:$0xff]  ;;  %v201_v6 = vld [vmem:[%s2111_s22 + $0xd8] sm:$0xff]  ;;  %v202_v8 = vld [vmem:[%s2111_s22 + $0xe0] sm:$0xff] }
  0x23   : > { %1778 = vmatpush3.msra.mxu0 %v306_v11  ;;  %2006 = vmatpush3.msra.mxu1 %v306_v11  ;;  %v265_v7 = vld [vmem:[%s2111_s22 + $0x2d8] sm:$0xff]  ;;  %v266_v9 = vld [vmem:[%s2111_s22 + $0x2e0] sm:$0xff]  ;;  %v203_v10 = vld [vmem:[%s2111_s22 + $0xe8] sm:$0xff] }
  0x24   : > { %1779 = vmatprep.subr.mxu0 %v305_v12  ;;  %1991 = vmatprep.subr.mxu1 %v305_v12  ;;  %v267_v11 = vld [vmem:[%s2111_s22 + $0x2e8] sm:$0xff] }
  0x25   : > { %1780 = vmatpush3.msra.mxu0 %v305_v12  ;;  %2007 = vmatpush3.msra.mxu1 %v305_v12  ;;  %v204_v12 = vld [vmem:[%s2111_s22 + $0xf0] sm:$0xff] }
  0x26   : > { %1781 = vmatprep.subr.mxu0 %v304_v13  ;;  %1992 = vmatprep.subr.mxu1 %v304_v13 }
  0x27   : > { %1782 = vmatpush3.msra.mxu0 %v304_v13  ;;  %2008 = vmatpush3.msra.mxu1 %v304_v13  ;;  %v268_v13 = vld [vmem:[%s2111_s22 + $0x2f0] sm:$0xff] }
  0x28   : > { %1783 = vmatprep.subr.mxu0 %v303_v14  ;;  %1993 = vmatprep.subr.mxu1 %v303_v14 }
  0x29   : > { %1784 = vmatpush3.msra.mxu0 %v303_v14  ;;  %2009 = vmatpush3.msra.mxu1 %v303_v14  ;;  %v205_v14 = vld [vmem:[%s2111_s22 + $0xf8] sm:$0xff] }
  0x2a   : > { %1785 = vmatprep.subr.mxu0 %v302_v15  ;;  %1994 = vmatprep.subr.mxu1 %v302_v15 }
  0x2b   : > { %1786 = vmatpush3.msra.mxu0 %v302_v15  ;;  %2010 = vmatpush3.msra.mxu1 %v302_v15  ;;  %v269_v15 = vld [vmem:[%s2111_s22 + $0x2f8] sm:$0xff] }
  0x2c   : > { %1787 = vmatprep.mubr.f32.mxu0 %v174_v16  ;;  %1883 = vmatprep.mubr.f32.mxu1 %v238_v17  ;;  %v206_v16 = vld [vmem:[%s2111_s22 + $0x100] sm:$0xff] }
  0x2d   : > { %1788 = vmatmul.mubr.f32.vlgmr.msra.gmra.mxu0 %v175_v18  ;;  %1884 = vmatmul.mubr.f32.vlgmr.msra.gmra.mxu1 %v239_v19  ;;  %v270_v17 = vld [vmem:[%s2111_s22 + $0x300] sm:$0xff]  ;;  %v207_v18 = vld [vmem:[%s2111_s22 + $0x108] sm:$0xff] }
  0x2e   : > { %1790 = vmatprep.mubr.f32.mxu0 %v176_v20  ;;  %1886 = vmatprep.mubr.f32.mxu1 %v240_v21  ;;  %v271_v19 = vld [vmem:[%s2111_s22 + $0x308] sm:$0xff]  ;;  %v208_v20 = vld [vmem:[%s2111_s22 + $0x110] sm:$0xff] }
  0x2f   : > { %v272_v21 = vld [vmem:[%s2111_s22 + $0x310] sm:$0xff] }
  0x31   : > { %1791 = vmatmul.mubr.f32.gmra.mxu0 %v177_v22  ;;  %1887 = vmatmul.mubr.f32.gmra.mxu1 %v241_v23  ;;  %v209_v22 = vld [vmem:[%s2111_s22 + $0x118] sm:$0xff] }
  0x32   : > { %1793 = vmatprep.mubr.f32.mxu0 %v178_v24  ;;  %1889 = vmatprep.mubr.f32.mxu1 %v242_v25  ;;  %v273_v23 = vld [vmem:[%s2111_s22 + $0x318] sm:$0xff]  ;;  %v210_v24 = vld [vmem:[%s2111_s22 + $0x120] sm:$0xff] }
  0x33   : > { %v274_v25 = vld [vmem:[%s2111_s22 + $0x320] sm:$0xff] }
  0x35   : > { %1794 = vmatmul.mubr.f32.gmra.mxu0 %v179_v26  ;;  %1890 = vmatmul.mubr.f32.gmra.mxu1 %v243_v27  ;;  %v211_v26 = vld [vmem:[%s2111_s22 + $0x128] sm:$0xff] }
  0x36   : > { %1796 = vmatprep.mubr.f32.mxu0 %v180_v28  ;;  %1892 = vmatprep.mubr.f32.mxu1 %v244_v29  ;;  %v275_v27 = vld [vmem:[%s2111_s22 + $0x328] sm:$0xff]  ;;  %v212_v28 = vld [vmem:[%s2111_s22 + $0x130] sm:$0xff] }
  0x37   : > { %v276_v29 = vld [vmem:[%s2111_s22 + $0x330] sm:$0xff] }
  0x39   : > { %1797 = vmatmul.mubr.f32.gmra.mxu0 %v181_v30  ;;  %1893 = vmatmul.mubr.f32.gmra.mxu1 %v245_v31  ;;  %v213_v30 = vld [vmem:[%s2111_s22 + $0x138] sm:$0xff] }
  0x3a   : > { %1799 = vmatprep.mubr.f32.mxu0 %v182_v32  ;;  %1895 = vmatprep.mubr.f32.mxu1 %v246_v33  ;;  %v277_v31 = vld [vmem:[%s2111_s22 + $0x338] sm:$0xff]  ;;  %v214_v32 = vld [vmem:[%s2111_s22 + $0x140] sm:$0xff] }
  0x3b   : > { %v278_v33 = vld [vmem:[%s2111_s22 + $0x340] sm:$0xff] }
  0x3d   : > { %1800 = vmatmul.mubr.f32.gmra.mxu0 %v183_v34  ;;  %1896 = vmatmul.mubr.f32.gmra.mxu1 %v247_v35  ;;  %v215_v34 = vld [vmem:[%s2111_s22 + $0x148] sm:$0xff] }
  0x3e   : > { %1802 = vmatprep.mubr.f32.mxu0 %v184_v36  ;;  %1898 = vmatprep.mubr.f32.mxu1 %v248_v37  ;;  %v279_v35 = vld [vmem:[%s2111_s22 + $0x348] sm:$0xff]  ;;  %v216_v36 = vld [vmem:[%s2111_s22 + $0x150] sm:$0xff] }
  0x3f   : > { %v280_v37 = vld [vmem:[%s2111_s22 + $0x350] sm:$0xff] }
  0x41   : > { %1803 = vmatmul.mubr.f32.gmra.mxu0 %v185_v38  ;;  %1899 = vmatmul.mubr.f32.gmra.mxu1 %v249_v39  ;;  %v217_v38 = vld [vmem:[%s2111_s22 + $0x158] sm:$0xff] }
  0x42   : > { %1805 = vmatprep.mubr.f32.mxu0 %v186_v40  ;;  %1901 = vmatprep.mubr.f32.mxu1 %v250_v41  ;;  %v281_v39 = vld [vmem:[%s2111_s22 + $0x358] sm:$0xff]  ;;  %v218_v40 = vld [vmem:[%s2111_s22 + $0x160] sm:$0xff] }
  0x43   : > { %v282_v41 = vld [vmem:[%s2111_s22 + $0x360] sm:$0xff] }
  0x45   : > { %1806 = vmatmul.mubr.f32.gmra.mxu0 %v187_v42  ;;  %1902 = vmatmul.mubr.f32.gmra.mxu1 %v251_v43  ;;  %v219_v42 = vld [vmem:[%s2111_s22 + $0x168] sm:$0xff] }
  0x46   : > { %1808 = vmatprep.mubr.f32.mxu0 %v188_v44  ;;  %1904 = vmatprep.mubr.f32.mxu1 %v252_v45  ;;  %v283_v43 = vld [vmem:[%s2111_s22 + $0x368] sm:$0xff]  ;;  %v220_v44 = vld [vmem:[%s2111_s22 + $0x170] sm:$0xff] }
  0x47   : > { %v284_v45 = vld [vmem:[%s2111_s22 + $0x370] sm:$0xff] }
  0x49   : > { %1809 = vmatmul.mubr.f32.gmra.mxu0 %v189_v46  ;;  %1905 = vmatmul.mubr.f32.gmra.mxu1 %v253_v47  ;;  %v221_v46 = vld [vmem:[%s2111_s22 + $0x178] sm:$0xff] }
  0x4a   : > { %1811 = vmatprep.mubr.f32.mxu0 %v190_v48  ;;  %1907 = vmatprep.mubr.f32.mxu1 %v254_v49  ;;  %v285_v47 = vld [vmem:[%s2111_s22 + $0x378] sm:$0xff]  ;;  %v222_v48 = vld [vmem:[%s2111_s22 + $0x180] sm:$0xff] }
  0x4b   : > { %v286_v49 = vld [vmem:[%s2111_s22 + $0x380] sm:$0xff] }
  0x4d   : > { %1812 = vmatmul.mubr.f32.gmra.mxu0 %v191_v50  ;;  %1908 = vmatmul.mubr.f32.gmra.mxu1 %v255_v51  ;;  %v223_v50 = vld [vmem:[%s2111_s22 + $0x188] sm:$0xff] }
  0x4e   : > { %1814 = vmatprep.mubr.f32.mxu0 %v192_v52  ;;  %1910 = vmatprep.mubr.f32.mxu1 %v256_v53  ;;  %v287_v51 = vld [vmem:[%s2111_s22 + $0x388] sm:$0xff]  ;;  %v224_v52 = vld [vmem:[%s2111_s22 + $0x190] sm:$0xff] }
  0x4f   : > { %v288_v53 = vld [vmem:[%s2111_s22 + $0x390] sm:$0xff] }
  0x51   : > { %1815 = vmatmul.mubr.f32.gmra.mxu0 %v193_v54  ;;  %1911 = vmatmul.mubr.f32.gmra.mxu1 %v257_v55  ;;  %v225_v54 = vld [vmem:[%s2111_s22 + $0x198] sm:$0xff] }
  0x52   : > { %1817 = vmatprep.mubr.f32.mxu0 %v194_v56  ;;  %1913 = vmatprep.mubr.f32.mxu1 %v258_v57  ;;  %v289_v55 = vld [vmem:[%s2111_s22 + $0x398] sm:$0xff]  ;;  %v226_v56 = vld [vmem:[%s2111_s22 + $0x1a0] sm:$0xff] }
  0x53   : > { %v290_v57 = vld [vmem:[%s2111_s22 + $0x3a0] sm:$0xff] }
  0x55   : > { %1818 = vmatmul.mubr.f32.gmra.mxu0 %v195_v58  ;;  %1914 = vmatmul.mubr.f32.gmra.mxu1 %v259_v59  ;;  %v227_v58 = vld [vmem:[%s2111_s22 + $0x1a8] sm:$0xff] }
  0x56   : > { %1820 = vmatprep.mubr.f32.mxu0 %v196_v60  ;;  %1916 = vmatprep.mubr.f32.mxu1 %v260_v61  ;;  %v291_v59 = vld [vmem:[%s2111_s22 + $0x3a8] sm:$0xff]  ;;  %v228_v60 = vld [vmem:[%s2111_s22 + $0x1b0] sm:$0xff] }
  0x57   : > { %v292_v61 = vld [vmem:[%s2111_s22 + $0x3b0] sm:$0xff] }
  0x59   : > { %1821 = vmatmul.mubr.f32.gmra.mxu0 %v197_v62  ;;  %1917 = vmatmul.mubr.f32.gmra.mxu1 %v261_v63  ;;  %v229_v62 = vld [vmem:[%s2111_s22 + $0x1b8] sm:$0xff] }
  0x5a   : > { %1823 = vmatprep.mubr.f32.mxu0 %v198_v0  ;;  %1919 = vmatprep.mubr.f32.mxu1 %v262_v1  ;;  %v293_v63 = vld [vmem:[%s2111_s22 + $0x3b8] sm:$0xff]  ;;  %v230_v0 = vld [vmem:[%s2111_s22 + $0x1c0] sm:$0xff] }
  0x5b   : > { %v294_v1 = vld [vmem:[%s2111_s22 + $0x3c0] sm:$0xff] }
  0x5d   : > { %1824 = vmatmul.mubr.f32.gmra.mxu0 %v199_v2  ;;  %1920 = vmatmul.mubr.f32.gmra.mxu1 %v263_v3  ;;  %v231_v2 = vld [vmem:[%s2111_s22 + $0x1c8] sm:$0xff] }
  0x5e   : > { %1826 = vmatprep.mubr.f32.mxu0 %v200_v4  ;;  %1922 = vmatprep.mubr.f32.mxu1 %v264_v5  ;;  %v295_v3 = vld [vmem:[%s2111_s22 + $0x3c8] sm:$0xff]  ;;  %v232_v4 = vld [vmem:[%s2111_s22 + $0x1d0] sm:$0xff] }
  0x5f   : > { %v296_v5 = vld [vmem:[%s2111_s22 + $0x3d0] sm:$0xff] }
  0x61   : > { %1827 = vmatmul.mubr.f32.gmra.mxu0 %v201_v6  ;;  %1923 = vmatmul.mubr.f32.gmra.mxu1 %v265_v7  ;;  %v233_v6 = vld [vmem:[%s2111_s22 + $0x1d8] sm:$0xff] }
  0x62   : > { %1829 = vmatprep.mubr.f32.mxu0 %v202_v8  ;;  %1925 = vmatprep.mubr.f32.mxu1 %v266_v9  ;;  %v297_v7 = vld [vmem:[%s2111_s22 + $0x3d8] sm:$0xff]  ;;  %v234_v8 = vld [vmem:[%s2111_s22 + $0x1e0] sm:$0xff] }
  0x63   : > { %v298_v9 = vld [vmem:[%s2111_s22 + $0x3e0] sm:$0xff] }
  0x65   : > { %1830 = vmatmul.mubr.f32.gmra.mxu0 %v203_v10  ;;  %1926 = vmatmul.mubr.f32.gmra.mxu1 %v267_v11  ;;  %v235_v10 = vld [vmem:[%s2111_s22 + $0x1e8] sm:$0xff] }
  0x66   : > { %1832 = vmatprep.mubr.f32.mxu0 %v204_v12  ;;  %1928 = vmatprep.mubr.f32.mxu1 %v268_v13  ;;  %v299_v11 = vld [vmem:[%s2111_s22 + $0x3e8] sm:$0xff]  ;;  %v236_v12 = vld [vmem:[%s2111_s22 + $0x1f0] sm:$0xff] }
  0x67   : > { %v300_v13 = vld [vmem:[%s2111_s22 + $0x3f0] sm:$0xff] }
  0x69   : > { %1833 = vmatmul.mubr.f32.gmra.mxu0 %v205_v14  ;;  %1929 = vmatmul.mubr.f32.gmra.mxu1 %v269_v15  ;;  %v237_v14 = vld [vmem:[%s2111_s22 + $0x1f8] sm:$0xff] }
  0x6a   : > { %1835 = vmatprep.mubr.f32.mxu0 %v206_v16  ;;  %1931 = vmatprep.mubr.f32.mxu1 %v270_v17  ;;  %v301_v15 = vld [vmem:[%s2111_s22 + $0x3f8] sm:$0xff]  ;;  %v2247_v16 = vld [vmem:[%s2650_s2] ss:$0 sm:$0xff] }
  0x6d   : > { %1836 = vmatmul.mubr.f32.gmra.mxu0 %v207_v18  ;;  %1932 = vmatmul.mubr.f32.gmra.mxu1 %v271_v19 }
  0x6e   : > { %1838 = vmatprep.mubr.f32.mxu0 %v208_v20  ;;  %1934 = vmatprep.mubr.f32.mxu1 %v272_v21 }
  0x71   : > { %1839 = vmatmul.mubr.f32.gmra.mxu0 %v209_v22  ;;  %1935 = vmatmul.mubr.f32.gmra.mxu1 %v273_v23 }
  0x72   : > { %1841 = vmatprep.mubr.f32.mxu0 %v210_v24  ;;  %1937 = vmatprep.mubr.f32.mxu1 %v274_v25 }
  0x75   : > { %1842 = vmatmul.mubr.f32.gmra.mxu0 %v211_v26  ;;  %1938 = vmatmul.mubr.f32.gmra.mxu1 %v275_v27 }
  0x76   : > { %1844 = vmatprep.mubr.f32.mxu0 %v212_v28  ;;  %1940 = vmatprep.mubr.f32.mxu1 %v276_v29 }
  0x79   : > { %1845 = vmatmul.mubr.f32.gmra.mxu0 %v213_v30  ;;  %1941 = vmatmul.mubr.f32.gmra.mxu1 %v277_v31 }
  0x7a   : > { %1847 = vmatprep.mubr.f32.mxu0 %v214_v32  ;;  %1943 = vmatprep.mubr.f32.mxu1 %v278_v33 }
  0x7d   : > { %1848 = vmatmul.mubr.f32.gmra.mxu0 %v215_v34  ;;  %1944 = vmatmul.mubr.f32.gmra.mxu1 %v279_v35 }
  0x7e   : > { %1850 = vmatprep.mubr.f32.mxu0 %v216_v36  ;;  %1946 = vmatprep.mubr.f32.mxu1 %v280_v37 }
  0x81   : > { %1851 = vmatmul.mubr.f32.gmra.mxu0 %v217_v38  ;;  %1947 = vmatmul.mubr.f32.gmra.mxu1 %v281_v39 }
  0x82   : > { %1853 = vmatprep.mubr.f32.mxu0 %v218_v40  ;;  %1949 = vmatprep.mubr.f32.mxu1 %v282_v41 }
  0x85   : > { %1854 = vmatmul.mubr.f32.gmra.mxu0 %v219_v42  ;;  %1950 = vmatmul.mubr.f32.gmra.mxu1 %v283_v43 }
  0x86   : > { %1856 = vmatprep.mubr.f32.mxu0 %v220_v44  ;;  %1952 = vmatprep.mubr.f32.mxu1 %v284_v45 }
  0x89   : > { %1857 = vmatmul.mubr.f32.gmra.mxu0 %v221_v46  ;;  %1953 = vmatmul.mubr.f32.gmra.mxu1 %v285_v47 }
  0x8a   : > { %1859 = vmatprep.mubr.f32.mxu0 %v222_v48  ;;  %1955 = vmatprep.mubr.f32.mxu1 %v286_v49 }
  0x8d   : > { %1860 = vmatmul.mubr.f32.gmra.mxu0 %v223_v50  ;;  %1956 = vmatmul.mubr.f32.gmra.mxu1 %v287_v51 }
  0x8e   : > { %1862 = vmatprep.mubr.f32.mxu0 %v224_v52  ;;  %1958 = vmatprep.mubr.f32.mxu1 %v288_v53 }
  0x91   : > { %1863 = vmatmul.mubr.f32.gmra.mxu0 %v225_v54  ;;  %1959 = vmatmul.mubr.f32.gmra.mxu1 %v289_v55 }
  0x92   : > { %1865 = vmatprep.mubr.f32.mxu0 %v226_v56  ;;  %1961 = vmatprep.mubr.f32.mxu1 %v290_v57 }
  0x95   : > { %1866 = vmatmul.mubr.f32.gmra.mxu0 %v227_v58  ;;  %1962 = vmatmul.mubr.f32.gmra.mxu1 %v291_v59 }
  0x96   : > { %1868 = vmatprep.mubr.f32.mxu0 %v228_v60  ;;  %1964 = vmatprep.mubr.f32.mxu1 %v292_v61 }
  0x99   : > { %1869 = vmatmul.mubr.f32.gmra.mxu0 %v229_v62  ;;  %1965 = vmatmul.mubr.f32.gmra.mxu1 %v293_v63 }
  0x9a   : > { %1871 = vmatprep.mubr.f32.mxu0 %v230_v0  ;;  %1967 = vmatprep.mubr.f32.mxu1 %v294_v1 }
  0x9d   : > { %1872 = vmatmul.mubr.f32.gmra.mxu0 %v231_v2  ;;  %1968 = vmatmul.mubr.f32.gmra.mxu1 %v295_v3 }
  0x9e   : > { %1874 = vmatprep.mubr.f32.mxu0 %v232_v4  ;;  %1970 = vmatprep.mubr.f32.mxu1 %v296_v5 }
  0xa1   : > { %1875 = vmatmul.mubr.f32.gmra.mxu0 %v233_v6  ;;  %1971 = vmatmul.mubr.f32.gmra.mxu1 %v297_v7 }
  0xa2   : > { %1877 = vmatprep.mubr.f32.mxu0 %v234_v8  ;;  %1973 = vmatprep.mubr.f32.mxu1 %v298_v9 }
  0xa5   : > { %1878 = vmatmul.mubr.f32.gmra.mxu0 %v235_v10  ;;  %1974 = vmatmul.mubr.f32.gmra.mxu1 %v299_v11 }
  0xa6   : > { %1880 = vmatprep.mubr.f32.mxu0 %v236_v12  ;;  %1976 = vmatprep.mubr.f32.mxu1 %v300_v13 }
  0xa9   : > { %1881 = vmatmul.mubr.f32.gmra.mxu0 %v237_v14  ;;  %1977 = vmatmul.mubr.f32.gmra.mxu1 %v301_v15 }
  0xed   : > { %v1789_v17 = vpop.f32.mrf.mxu0  ;;  %v1885_v18 = vpop.f32.mrf.mxu1 }
  0xee   : > { %v397_v19 = vadd.f32 %v1789_v17, %v2247_v16  ;;  %v717_v20 = vadd.f32 %v1885_v18, %v2247_v16 }
  0xef   : > { %v391_v21 = vpop.f32.mrf.mxu0  ;;  %v711_v22 = vpop.f32.mrf.mxu1 }
  0xf0   : > { %vm1031_vm1 = vcmp.ge.f32.partialorder %v397_v19, 0.0  ;;  %v1159_v23 = vmul.f32 0.1, %v397_v19  ;;  %vm1095_vm2 = vcmp.ge.f32.partialorder %v717_v20, 0.0  ;;  %v1223_v24 = vmul.f32 0.1, %v717_v20 }
  0xf1   : > { %v392_v25 = vadd.f32 %v2247_v16, %v391_v21  ;;  %v712_v26 = vadd.f32 %v2247_v16, %v711_v22  ;;  %v1792_v27 = vpop.f32.mrf.mxu0  ;;  %v1888_v28 = vpop.f32.mrf.mxu1 }
  0xf2   : > { %v1287_v29 = vsel %vm1031_vm1, %v397_v19, %v1159_v23  ;;  %v1351_v30 = vsel %vm1095_vm2, %v717_v20, %v1223_v24  ;;  %v407_v31 = vadd.f32 %v1792_v27, %v2247_v16  ;;  %v727_v32 = vadd.f32 %v1888_v28, %v2247_v16 }
  0xf3   : > { %1416 = vst.msk [vmem:[%s2256_s29 + $0x8] sm:$0xff] %vm1414_vm0, %v1287_v29  ;;  %1480 = vst.msk [vmem:[%s2256_s29 + $0x208] sm:$0xff] %vm1414_vm0, %v1351_v30  ;;  %vm1030_vm3 = vcmp.ge.f32.partialorder %v392_v25, 0.0  ;;  %v1158_v33 = vmul.f32 0.1, %v392_v25  ;;  %vm1094_vm4 = vcmp.ge.f32.partialorder %v712_v26, 0.0  ;;  %v401_v35 = vpop.f32.mrf.mxu0  ;;  %v721_v36 = vpop.f32.mrf.mxu1 }
  0xf4   : > { %v1222_v34 = vmul.f32 0.1, %v712_v26  ;;  %vm1033_vm5 = vcmp.ge.f32.partialorder %v407_v31, 0.0  ;;  %v1161_v37 = vmul.f32 0.1, %v407_v31  ;;  %vm1097_vm6 = vcmp.ge.f32.partialorder %v727_v32, 0.0 }
  0xf5   : > { %v1225_v38 = vmul.f32 0.1, %v727_v32  ;;  %v1286_v39 = vsel %vm1030_vm3, %v392_v25, %v1158_v33  ;;  %v402_v41 = vadd.f32 %v2247_v16, %v401_v35  ;;  %v722_v42 = vadd.f32 %v2247_v16, %v721_v36  ;;  %v1795_v43 = vpop.f32.mrf.mxu0  ;;  %v1891_v44 = vpop.f32.mrf.mxu1 }
  0xf6   : > { %v1350_v40 = vsel %vm1094_vm4, %v712_v26, %v1222_v34  ;;  %1415 = vst.msk [vmem:[%s2256_s29] sm:$0xff] %vm1414_vm0, %v1286_v39  ;;  %v1289_v45 = vsel %vm1033_vm5, %v407_v31, %v1161_v37  ;;  %v417_v47 = vadd.f32 %v1795_v43, %v2247_v16  ;;  %v737_v48 = vadd.f32 %v1891_v44, %v2247_v16 }
  0xf7   : > { %1479 = vst.msk [vmem:[%s2256_s29 + $0x200] sm:$0xff] %vm1414_vm0, %v1350_v40  ;;  %v1353_v46 = vsel %vm1097_vm6, %v727_v32, %v1225_v38  ;;  %1418 = vst.msk [vmem:[%s2256_s29 + $0x18] sm:$0xff] %vm1414_vm0, %v1289_v45  ;;  %vm1032_vm7 = vcmp.ge.f32.partialorder %v402_v41, 0.0  ;;  %v1160_v49 = vmul.f32 0.1, %v402_v41  ;;  %vm1096_vm8 = vcmp.ge.f32.partialorder %v722_v42, 0.0  ;;  %v411_v51 = vpop.f32.mrf.mxu0  ;;  %v731_v52 = vpop.f32.mrf.mxu1 }
  0xf8   : > { %1482 = vst.msk [vmem:[%s2256_s29 + $0x218] sm:$0xff] %vm1414_vm0, %v1353_v46  ;;  %v1224_v50 = vmul.f32 0.1, %v722_v42  ;;  %vm1035_vm9 = vcmp.ge.f32.partialorder %v417_v47, 0.0  ;;  %v1163_v53 = vmul.f32 0.1, %v417_v47  ;;  %v412_v57 = vadd.f32 %v2247_v16, %v411_v51 }
  0xf9   : > { %vm1099_vm10 = vcmp.ge.f32.partialorder %v737_v48, 0.0  ;;  %v1227_v54 = vmul.f32 0.1, %v737_v48  ;;  %v1288_v55 = vsel %vm1032_vm7, %v402_v41, %v1160_v49  ;;  %v732_v58 = vadd.f32 %v2247_v16, %v731_v52  ;;  %v1798_v59 = vpop.f32.mrf.mxu0  ;;  %v1894_v60 = vpop.f32.mrf.mxu1 }
  0xfa   : > { %v1352_v56 = vsel %vm1096_vm8, %v722_v42, %v1224_v50  ;;  %1417 = vst.msk [vmem:[%s2256_s29 + $0x10] sm:$0xff] %vm1414_vm0, %v1288_v55  ;;  %v1291_v61 = vsel %vm1035_vm9, %v417_v47, %v1163_v53  ;;  %v427_v63 = vadd.f32 %v1798_v59, %v2247_v16  ;;  %v747_v0 = vadd.f32 %v1894_v60, %v2247_v16 }
  0xfb   : > { %1481 = vst.msk [vmem:[%s2256_s29 + $0x210] sm:$0xff] %vm1414_vm0, %v1352_v56  ;;  %v1355_v62 = vsel %vm1099_vm10, %v737_v48, %v1227_v54  ;;  %1420 = vst.msk [vmem:[%s2256_s29 + $0x28] sm:$0xff] %vm1414_vm0, %v1291_v61  ;;  %vm1034_vm11 = vcmp.ge.f32.partialorder %v412_v57, 0.0  ;;  %v1162_v1 = vmul.f32 0.1, %v412_v57  ;;  %vm1098_vm12 = vcmp.ge.f32.partialorder %v732_v58, 0.0  ;;  %v421_v3 = vpop.f32.mrf.mxu0  ;;  %v741_v4 = vpop.f32.mrf.mxu1 }
  0xfc   : > { %1484 = vst.msk [vmem:[%s2256_s29 + $0x228] sm:$0xff] %vm1414_vm0, %v1355_v62  ;;  %v1226_v2 = vmul.f32 0.1, %v732_v58  ;;  %vm1037_vm13 = vcmp.ge.f32.partialorder %v427_v63, 0.0  ;;  %v1165_v5 = vmul.f32 0.1, %v427_v63  ;;  %v422_v9 = vadd.f32 %v2247_v16, %v421_v3 }
  0xfd   : > { %vm1101_vm14 = vcmp.ge.f32.partialorder %v747_v0, 0.0  ;;  %v1229_v6 = vmul.f32 0.1, %v747_v0  ;;  %v1290_v7 = vsel %vm1034_vm11, %v412_v57, %v1162_v1  ;;  %v742_v10 = vadd.f32 %v2247_v16, %v741_v4  ;;  %v1801_v11 = vpop.f32.mrf.mxu0  ;;  %v1897_v12 = vpop.f32.mrf.mxu1 }
  0xfe   : > { %v1354_v8 = vsel %vm1098_vm12, %v732_v58, %v1226_v2  ;;  %1419 = vst.msk [vmem:[%s2256_s29 + $0x20] sm:$0xff] %vm1414_vm0, %v1290_v7  ;;  %v1293_v13 = vsel %vm1037_vm13, %v427_v63, %v1165_v5  ;;  %v437_v15 = vadd.f32 %v1801_v11, %v2247_v16  ;;  %v757_v17 = vadd.f32 %v1897_v12, %v2247_v16 }
  0xff   : > { %1483 = vst.msk [vmem:[%s2256_s29 + $0x220] sm:$0xff] %vm1414_vm0, %v1354_v8  ;;  %v1357_v14 = vsel %vm1101_vm14, %v747_v0, %v1229_v6  ;;  %1422 = vst.msk [vmem:[%s2256_s29 + $0x38] sm:$0xff] %vm1414_vm0, %v1293_v13  ;;  %vm1036_vm15 = vcmp.ge.f32.partialorder %v422_v9, 0.0  ;;  %v1164_v18 = vmul.f32 0.1, %v422_v9  ;;  %vm1100_vm1 = vcmp.ge.f32.partialorder %v742_v10, 0.0  ;;  %v431_v20 = vpop.f32.mrf.mxu0  ;;  %v751_v21 = vpop.f32.mrf.mxu1 }
 0x100   : > { %1486 = vst.msk [vmem:[%s2256_s29 + $0x238] sm:$0xff] %vm1414_vm0, %v1357_v14  ;;  %v1228_v19 = vmul.f32 0.1, %v742_v10  ;;  %vm1039_vm2 = vcmp.ge.f32.partialorder %v437_v15, 0.0  ;;  %v1167_v22 = vmul.f32 0.1, %v437_v15  ;;  %v432_v26 = vadd.f32 %v2247_v16, %v431_v20 }
 0x101   : > { %vm1103_vm3 = vcmp.ge.f32.partialorder %v757_v17, 0.0  ;;  %v1231_v23 = vmul.f32 0.1, %v757_v17  ;;  %v1292_v24 = vsel %vm1036_vm15, %v422_v9, %v1164_v18  ;;  %v752_v27 = vadd.f32 %v2247_v16, %v751_v21  ;;  %v1804_v28 = vpop.f32.mrf.mxu0  ;;  %v1900_v29 = vpop.f32.mrf.mxu1 }
 0x102   : > { %v1356_v25 = vsel %vm1100_vm1, %v742_v10, %v1228_v19  ;;  %1421 = vst.msk [vmem:[%s2256_s29 + $0x30] sm:$0xff] %vm1414_vm0, %v1292_v24  ;;  %v1295_v30 = vsel %vm1039_vm2, %v437_v15, %v1167_v22  ;;  %v447_v32 = vadd.f32 %v1804_v28, %v2247_v16  ;;  %v767_v33 = vadd.f32 %v1900_v29, %v2247_v16 }
 0x103   : > { %1485 = vst.msk [vmem:[%s2256_s29 + $0x230] sm:$0xff] %vm1414_vm0, %v1356_v25  ;;  %v1359_v31 = vsel %vm1103_vm3, %v757_v17, %v1231_v23  ;;  %1424 = vst.msk [vmem:[%s2256_s29 + $0x48] sm:$0xff] %vm1414_vm0, %v1295_v30  ;;  %vm1038_vm4 = vcmp.ge.f32.partialorder %v432_v26, 0.0  ;;  %v1166_v34 = vmul.f32 0.1, %v432_v26  ;;  %vm1102_vm5 = vcmp.ge.f32.partialorder %v752_v27, 0.0  ;;  %v441_v36 = vpop.f32.mrf.mxu0  ;;  %v761_v37 = vpop.f32.mrf.mxu1 }
 0x104   : > { %1488 = vst.msk [vmem:[%s2256_s29 + $0x248] sm:$0xff] %vm1414_vm0, %v1359_v31  ;;  %v1230_v35 = vmul.f32 0.1, %v752_v27  ;;  %vm1041_vm6 = vcmp.ge.f32.partialorder %v447_v32, 0.0  ;;  %v1169_v38 = vmul.f32 0.1, %v447_v32  ;;  %v442_v42 = vadd.f32 %v2247_v16, %v441_v36 }
 0x105   : > { %vm1105_vm7 = vcmp.ge.f32.partialorder %v767_v33, 0.0  ;;  %v1233_v39 = vmul.f32 0.1, %v767_v33  ;;  %v1294_v40 = vsel %vm1038_vm4, %v432_v26, %v1166_v34  ;;  %v762_v43 = vadd.f32 %v2247_v16, %v761_v37  ;;  %v1807_v44 = vpop.f32.mrf.mxu0  ;;  %v1903_v45 = vpop.f32.mrf.mxu1 }
 0x106   : > { %v1358_v41 = vsel %vm1102_vm5, %v752_v27, %v1230_v35  ;;  %1423 = vst.msk [vmem:[%s2256_s29 + $0x40] sm:$0xff] %vm1414_vm0, %v1294_v40  ;;  %v1297_v46 = vsel %vm1041_vm6, %v447_v32, %v1169_v38  ;;  %v457_v48 = vadd.f32 %v1807_v44, %v2247_v16  ;;  %v777_v49 = vadd.f32 %v1903_v45, %v2247_v16 }
 0x107   : > { %1487 = vst.msk [vmem:[%s2256_s29 + $0x240] sm:$0xff] %vm1414_vm0, %v1358_v41  ;;  %v1361_v47 = vsel %vm1105_vm7, %v767_v33, %v1233_v39  ;;  %1426 = vst.msk [vmem:[%s2256_s29 + $0x58] sm:$0xff] %vm1414_vm0, %v1297_v46  ;;  %vm1040_vm8 = vcmp.ge.f32.partialorder %v442_v42, 0.0  ;;  %v1168_v50 = vmul.f32 0.1, %v442_v42  ;;  %vm1104_vm9 = vcmp.ge.f32.partialorder %v762_v43, 0.0  ;;  %v451_v52 = vpop.f32.mrf.mxu0  ;;  %v771_v53 = vpop.f32.mrf.mxu1 }
 0x108   : > { %1490 = vst.msk [vmem:[%s2256_s29 + $0x258] sm:$0xff] %vm1414_vm0, %v1361_v47  ;;  %v1232_v51 = vmul.f32 0.1, %v762_v43  ;;  %vm1043_vm10 = vcmp.ge.f32.partialorder %v457_v48, 0.0  ;;  %v1171_v54 = vmul.f32 0.1, %v457_v48  ;;  %v452_v58 = vadd.f32 %v2247_v16, %v451_v52 }
 0x109   : > { %vm1107_vm11 = vcmp.ge.f32.partialorder %v777_v49, 0.0  ;;  %v1235_v55 = vmul.f32 0.1, %v777_v49  ;;  %v1296_v56 = vsel %vm1040_vm8, %v442_v42, %v1168_v50  ;;  %v772_v59 = vadd.f32 %v2247_v16, %v771_v53  ;;  %v1810_v60 = vpop.f32.mrf.mxu0  ;;  %v1906_v61 = vpop.f32.mrf.mxu1 }
 0x10a   : > { %v1360_v57 = vsel %vm1104_vm9, %v762_v43, %v1232_v51  ;;  %1425 = vst.msk [vmem:[%s2256_s29 + $0x50] sm:$0xff] %vm1414_vm0, %v1296_v56  ;;  %v1299_v62 = vsel %vm1043_vm10, %v457_v48, %v1171_v54  ;;  %v467_v0 = vadd.f32 %v1810_v60, %v2247_v16  ;;  %v787_v1 = vadd.f32 %v1906_v61, %v2247_v16 }
 0x10b   : > { %1489 = vst.msk [vmem:[%s2256_s29 + $0x250] sm:$0xff] %vm1414_vm0, %v1360_v57  ;;  %v1363_v63 = vsel %vm1107_vm11, %v777_v49, %v1235_v55  ;;  %1428 = vst.msk [vmem:[%s2256_s29 + $0x68] sm:$0xff] %vm1414_vm0, %v1299_v62  ;;  %vm1042_vm12 = vcmp.ge.f32.partialorder %v452_v58, 0.0  ;;  %v1170_v2 = vmul.f32 0.1, %v452_v58  ;;  %vm1106_vm13 = vcmp.ge.f32.partialorder %v772_v59, 0.0  ;;  %v461_v4 = vpop.f32.mrf.mxu0  ;;  %v781_v5 = vpop.f32.mrf.mxu1 }
 0x10c   : > { %1492 = vst.msk [vmem:[%s2256_s29 + $0x268] sm:$0xff] %vm1414_vm0, %v1363_v63  ;;  %v1234_v3 = vmul.f32 0.1, %v772_v59  ;;  %vm1045_vm14 = vcmp.ge.f32.partialorder %v467_v0, 0.0  ;;  %v1173_v6 = vmul.f32 0.1, %v467_v0  ;;  %v462_v10 = vadd.f32 %v2247_v16, %v461_v4 }
 0x10d   : > { %vm1109_vm15 = vcmp.ge.f32.partialorder %v787_v1, 0.0  ;;  %v1237_v7 = vmul.f32 0.1, %v787_v1  ;;  %v1298_v8 = vsel %vm1042_vm12, %v452_v58, %v1170_v2  ;;  %v782_v11 = vadd.f32 %v2247_v16, %v781_v5  ;;  %v1813_v12 = vpop.f32.mrf.mxu0  ;;  %v1909_v13 = vpop.f32.mrf.mxu1 }
 0x10e   : > { %v1362_v9 = vsel %vm1106_vm13, %v772_v59, %v1234_v3  ;;  %1427 = vst.msk [vmem:[%s2256_s29 + $0x60] sm:$0xff] %vm1414_vm0, %v1298_v8  ;;  %v1301_v14 = vsel %vm1045_vm14, %v467_v0, %v1173_v6  ;;  %v477_v17 = vadd.f32 %v1813_v12, %v2247_v16  ;;  %v797_v18 = vadd.f32 %v1909_v13, %v2247_v16 }
 0x10f   : > { %1491 = vst.msk [vmem:[%s2256_s29 + $0x260] sm:$0xff] %vm1414_vm0, %v1362_v9  ;;  %v1365_v15 = vsel %vm1109_vm15, %v787_v1, %v1237_v7  ;;  %1430 = vst.msk [vmem:[%s2256_s29 + $0x78] sm:$0xff] %vm1414_vm0, %v1301_v14  ;;  %vm1044_vm1 = vcmp.ge.f32.partialorder %v462_v10, 0.0  ;;  %v1172_v19 = vmul.f32 0.1, %v462_v10  ;;  %vm1108_vm2 = vcmp.ge.f32.partialorder %v782_v11, 0.0  ;;  %v471_v21 = vpop.f32.mrf.mxu0  ;;  %v791_v22 = vpop.f32.mrf.mxu1 }
 0x110   : > { %1494 = vst.msk [vmem:[%s2256_s29 + $0x278] sm:$0xff] %vm1414_vm0, %v1365_v15  ;;  %v1236_v20 = vmul.f32 0.1, %v782_v11  ;;  %vm1047_vm3 = vcmp.ge.f32.partialorder %v477_v17, 0.0  ;;  %v1175_v23 = vmul.f32 0.1, %v477_v17  ;;  %v472_v27 = vadd.f32 %v2247_v16, %v471_v21 }
 0x111   : > { %vm1111_vm4 = vcmp.ge.f32.partialorder %v797_v18, 0.0  ;;  %v1239_v24 = vmul.f32 0.1, %v797_v18  ;;  %v1300_v25 = vsel %vm1044_vm1, %v462_v10, %v1172_v19  ;;  %v792_v28 = vadd.f32 %v2247_v16, %v791_v22  ;;  %v1816_v29 = vpop.f32.mrf.mxu0  ;;  %v1912_v30 = vpop.f32.mrf.mxu1 }
 0x112   : > { %v1364_v26 = vsel %vm1108_vm2, %v782_v11, %v1236_v20  ;;  %1429 = vst.msk [vmem:[%s2256_s29 + $0x70] sm:$0xff] %vm1414_vm0, %v1300_v25  ;;  %v1303_v31 = vsel %vm1047_vm3, %v477_v17, %v1175_v23  ;;  %v487_v33 = vadd.f32 %v1816_v29, %v2247_v16  ;;  %v807_v34 = vadd.f32 %v1912_v30, %v2247_v16 }
 0x113   : > { %1493 = vst.msk [vmem:[%s2256_s29 + $0x270] sm:$0xff] %vm1414_vm0, %v1364_v26  ;;  %v1367_v32 = vsel %vm1111_vm4, %v797_v18, %v1239_v24  ;;  %1432 = vst.msk [vmem:[%s2256_s29 + $0x88] sm:$0xff] %vm1414_vm0, %v1303_v31  ;;  %vm1046_vm5 = vcmp.ge.f32.partialorder %v472_v27, 0.0  ;;  %v1174_v35 = vmul.f32 0.1, %v472_v27  ;;  %vm1110_vm6 = vcmp.ge.f32.partialorder %v792_v28, 0.0  ;;  %v481_v37 = vpop.f32.mrf.mxu0  ;;  %v801_v38 = vpop.f32.mrf.mxu1 }
 0x114   : > { %1496 = vst.msk [vmem:[%s2256_s29 + $0x288] sm:$0xff] %vm1414_vm0, %v1367_v32  ;;  %v1238_v36 = vmul.f32 0.1, %v792_v28  ;;  %vm1049_vm7 = vcmp.ge.f32.partialorder %v487_v33, 0.0  ;;  %v1177_v39 = vmul.f32 0.1, %v487_v33  ;;  %v482_v43 = vadd.f32 %v2247_v16, %v481_v37 }
 0x115   : > { %vm1113_vm8 = vcmp.ge.f32.partialorder %v807_v34, 0.0  ;;  %v1241_v40 = vmul.f32 0.1, %v807_v34  ;;  %v1302_v41 = vsel %vm1046_vm5, %v472_v27, %v1174_v35  ;;  %v802_v44 = vadd.f32 %v2247_v16, %v801_v38  ;;  %v1819_v45 = vpop.f32.mrf.mxu0  ;;  %v1915_v46 = vpop.f32.mrf.mxu1 }
 0x116   : > { %v1366_v42 = vsel %vm1110_vm6, %v792_v28, %v1238_v36  ;;  %1431 = vst.msk [vmem:[%s2256_s29 + $0x80] sm:$0xff] %vm1414_vm0, %v1302_v41  ;;  %v1305_v47 = vsel %vm1049_vm7, %v487_v33, %v1177_v39  ;;  %v497_v49 = vadd.f32 %v1819_v45, %v2247_v16  ;;  %v817_v50 = vadd.f32 %v1915_v46, %v2247_v16 }
 0x117   : > { %1495 = vst.msk [vmem:[%s2256_s29 + $0x280] sm:$0xff] %vm1414_vm0, %v1366_v42  ;;  %v1369_v48 = vsel %vm1113_vm8, %v807_v34, %v1241_v40  ;;  %1434 = vst.msk [vmem:[%s2256_s29 + $0x98] sm:$0xff] %vm1414_vm0, %v1305_v47  ;;  %vm1048_vm9 = vcmp.ge.f32.partialorder %v482_v43, 0.0  ;;  %v1176_v51 = vmul.f32 0.1, %v482_v43  ;;  %vm1112_vm10 = vcmp.ge.f32.partialorder %v802_v44, 0.0  ;;  %v491_v53 = vpop.f32.mrf.mxu0  ;;  %v811_v54 = vpop.f32.mrf.mxu1 }
 0x118   : > { %1498 = vst.msk [vmem:[%s2256_s29 + $0x298] sm:$0xff] %vm1414_vm0, %v1369_v48  ;;  %v1240_v52 = vmul.f32 0.1, %v802_v44  ;;  %vm1051_vm11 = vcmp.ge.f32.partialorder %v497_v49, 0.0  ;;  %v1179_v55 = vmul.f32 0.1, %v497_v49  ;;  %v492_v59 = vadd.f32 %v2247_v16, %v491_v53 }
 0x119   : > { %vm1115_vm12 = vcmp.ge.f32.partialorder %v817_v50, 0.0  ;;  %v1243_v56 = vmul.f32 0.1, %v817_v50  ;;  %v1304_v57 = vsel %vm1048_vm9, %v482_v43, %v1176_v51  ;;  %v812_v60 = vadd.f32 %v2247_v16, %v811_v54  ;;  %v1822_v61 = vpop.f32.mrf.mxu0  ;;  %v1918_v62 = vpop.f32.mrf.mxu1 }
 0x11a   : > { %v1368_v58 = vsel %vm1112_vm10, %v802_v44, %v1240_v52  ;;  %1433 = vst.msk [vmem:[%s2256_s29 + $0x90] sm:$0xff] %vm1414_vm0, %v1304_v57  ;;  %v1307_v63 = vsel %vm1051_vm11, %v497_v49, %v1179_v55  ;;  %v507_v1 = vadd.f32 %v1822_v61, %v2247_v16  ;;  %v827_v2 = vadd.f32 %v1918_v62, %v2247_v16 }
 0x11b   : > { %1497 = vst.msk [vmem:[%s2256_s29 + $0x290] sm:$0xff] %vm1414_vm0, %v1368_v58  ;;  %v1371_v0 = vsel %vm1115_vm12, %v817_v50, %v1243_v56  ;;  %1436 = vst.msk [vmem:[%s2256_s29 + $0xa8] sm:$0xff] %vm1414_vm0, %v1307_v63  ;;  %vm1050_vm13 = vcmp.ge.f32.partialorder %v492_v59, 0.0  ;;  %v1178_v3 = vmul.f32 0.1, %v492_v59  ;;  %vm1114_vm14 = vcmp.ge.f32.partialorder %v812_v60, 0.0  ;;  %v501_v5 = vpop.f32.mrf.mxu0  ;;  %v821_v6 = vpop.f32.mrf.mxu1 }
 0x11c   : > { %1500 = vst.msk [vmem:[%s2256_s29 + $0x2a8] sm:$0xff] %vm1414_vm0, %v1371_v0  ;;  %v1242_v4 = vmul.f32 0.1, %v812_v60  ;;  %vm1053_vm15 = vcmp.ge.f32.partialorder %v507_v1, 0.0  ;;  %v1181_v7 = vmul.f32 0.1, %v507_v1  ;;  %v502_v11 = vadd.f32 %v2247_v16, %v501_v5 }
 0x11d   : > { %vm1117_vm1 = vcmp.ge.f32.partialorder %v827_v2, 0.0  ;;  %v1245_v8 = vmul.f32 0.1, %v827_v2  ;;  %v1306_v9 = vsel %vm1050_vm13, %v492_v59, %v1178_v3  ;;  %v822_v12 = vadd.f32 %v2247_v16, %v821_v6  ;;  %v1825_v13 = vpop.f32.mrf.mxu0  ;;  %v1921_v14 = vpop.f32.mrf.mxu1 }
 0x11e   : > { %v1370_v10 = vsel %vm1114_vm14, %v812_v60, %v1242_v4  ;;  %1435 = vst.msk [vmem:[%s2256_s29 + $0xa0] sm:$0xff] %vm1414_vm0, %v1306_v9  ;;  %v1309_v15 = vsel %vm1053_vm15, %v507_v1, %v1181_v7  ;;  %v517_v18 = vadd.f32 %v1825_v13, %v2247_v16  ;;  %v837_v19 = vadd.f32 %v1921_v14, %v2247_v16 }
 0x11f   : > { %1499 = vst.msk [vmem:[%s2256_s29 + $0x2a0] sm:$0xff] %vm1414_vm0, %v1370_v10  ;;  %v1373_v17 = vsel %vm1117_vm1, %v827_v2, %v1245_v8  ;;  %1438 = vst.msk [vmem:[%s2256_s29 + $0xb8] sm:$0xff] %vm1414_vm0, %v1309_v15  ;;  %vm1052_vm2 = vcmp.ge.f32.partialorder %v502_v11, 0.0  ;;  %v1180_v20 = vmul.f32 0.1, %v502_v11  ;;  %vm1116_vm3 = vcmp.ge.f32.partialorder %v822_v12, 0.0  ;;  %v511_v22 = vpop.f32.mrf.mxu0  ;;  %v831_v23 = vpop.f32.mrf.mxu1 }
 0x120   : > { %1502 = vst.msk [vmem:[%s2256_s29 + $0x2b8] sm:$0xff] %vm1414_vm0, %v1373_v17  ;;  %v1244_v21 = vmul.f32 0.1, %v822_v12  ;;  %vm1055_vm4 = vcmp.ge.f32.partialorder %v517_v18, 0.0  ;;  %v1183_v24 = vmul.f32 0.1, %v517_v18  ;;  %v512_v28 = vadd.f32 %v2247_v16, %v511_v22 }
 0x121   : > { %vm1119_vm5 = vcmp.ge.f32.partialorder %v837_v19, 0.0  ;;  %v1247_v25 = vmul.f32 0.1, %v837_v19  ;;  %v1308_v26 = vsel %vm1052_vm2, %v502_v11, %v1180_v20  ;;  %v832_v29 = vadd.f32 %v2247_v16, %v831_v23  ;;  %v1828_v30 = vpop.f32.mrf.mxu0  ;;  %v1924_v31 = vpop.f32.mrf.mxu1 }
 0x122   : > { %v1372_v27 = vsel %vm1116_vm3, %v822_v12, %v1244_v21  ;;  %1437 = vst.msk [vmem:[%s2256_s29 + $0xb0] sm:$0xff] %vm1414_vm0, %v1308_v26  ;;  %v1311_v32 = vsel %vm1055_vm4, %v517_v18, %v1183_v24  ;;  %v527_v34 = vadd.f32 %v1828_v30, %v2247_v16  ;;  %v847_v35 = vadd.f32 %v1924_v31, %v2247_v16 }
 0x123   : > { %1501 = vst.msk [vmem:[%s2256_s29 + $0x2b0] sm:$0xff] %vm1414_vm0, %v1372_v27  ;;  %v1375_v33 = vsel %vm1119_vm5, %v837_v19, %v1247_v25  ;;  %1440 = vst.msk [vmem:[%s2256_s29 + $0xc8] sm:$0xff] %vm1414_vm0, %v1311_v32  ;;  %vm1054_vm6 = vcmp.ge.f32.partialorder %v512_v28, 0.0  ;;  %v1182_v36 = vmul.f32 0.1, %v512_v28  ;;  %vm1118_vm7 = vcmp.ge.f32.partialorder %v832_v29, 0.0  ;;  %v521_v38 = vpop.f32.mrf.mxu0  ;;  %v841_v39 = vpop.f32.mrf.mxu1 }
 0x124   : > { %1504 = vst.msk [vmem:[%s2256_s29 + $0x2c8] sm:$0xff] %vm1414_vm0, %v1375_v33  ;;  %v1246_v37 = vmul.f32 0.1, %v832_v29  ;;  %vm1057_vm8 = vcmp.ge.f32.partialorder %v527_v34, 0.0  ;;  %v1185_v40 = vmul.f32 0.1, %v527_v34  ;;  %v522_v44 = vadd.f32 %v2247_v16, %v521_v38 }
 0x125   : > { %vm1121_vm9 = vcmp.ge.f32.partialorder %v847_v35, 0.0  ;;  %v1249_v41 = vmul.f32 0.1, %v847_v35  ;;  %v1310_v42 = vsel %vm1054_vm6, %v512_v28, %v1182_v36  ;;  %v842_v45 = vadd.f32 %v2247_v16, %v841_v39  ;;  %v1831_v46 = vpop.f32.mrf.mxu0  ;;  %v1927_v47 = vpop.f32.mrf.mxu1 }
 0x126   : > { %v1374_v43 = vsel %vm1118_vm7, %v832_v29, %v1246_v37  ;;  %1439 = vst.msk [vmem:[%s2256_s29 + $0xc0] sm:$0xff] %vm1414_vm0, %v1310_v42  ;;  %v1313_v48 = vsel %vm1057_vm8, %v527_v34, %v1185_v40  ;;  %v537_v50 = vadd.f32 %v1831_v46, %v2247_v16  ;;  %v857_v51 = vadd.f32 %v1927_v47, %v2247_v16 }
 0x127   : > { %1503 = vst.msk [vmem:[%s2256_s29 + $0x2c0] sm:$0xff] %vm1414_vm0, %v1374_v43  ;;  %v1377_v49 = vsel %vm1121_vm9, %v847_v35, %v1249_v41  ;;  %1442 = vst.msk [vmem:[%s2256_s29 + $0xd8] sm:$0xff] %vm1414_vm0, %v1313_v48  ;;  %vm1056_vm10 = vcmp.ge.f32.partialorder %v522_v44, 0.0  ;;  %v1184_v52 = vmul.f32 0.1, %v522_v44  ;;  %vm1120_vm11 = vcmp.ge.f32.partialorder %v842_v45, 0.0  ;;  %v531_v54 = vpop.f32.mrf.mxu0  ;;  %v851_v55 = vpop.f32.mrf.mxu1 }
 0x128   : > { %1506 = vst.msk [vmem:[%s2256_s29 + $0x2d8] sm:$0xff] %vm1414_vm0, %v1377_v49  ;;  %v1248_v53 = vmul.f32 0.1, %v842_v45  ;;  %vm1059_vm12 = vcmp.ge.f32.partialorder %v537_v50, 0.0  ;;  %v1187_v56 = vmul.f32 0.1, %v537_v50  ;;  %v532_v60 = vadd.f32 %v2247_v16, %v531_v54 }
 0x129   : > { %vm1123_vm13 = vcmp.ge.f32.partialorder %v857_v51, 0.0  ;;  %v1251_v57 = vmul.f32 0.1, %v857_v51  ;;  %v1312_v58 = vsel %vm1056_vm10, %v522_v44, %v1184_v52  ;;  %v852_v61 = vadd.f32 %v2247_v16, %v851_v55  ;;  %v1834_v62 = vpop.f32.mrf.mxu0  ;;  %v1930_v63 = vpop.f32.mrf.mxu1 }
 0x12a   : > { %v1376_v59 = vsel %vm1120_vm11, %v842_v45, %v1248_v53  ;;  %1441 = vst.msk [vmem:[%s2256_s29 + $0xd0] sm:$0xff] %vm1414_vm0, %v1312_v58  ;;  %v1315_v0 = vsel %vm1059_vm12, %v537_v50, %v1187_v56  ;;  %v547_v2 = vadd.f32 %v1834_v62, %v2247_v16  ;;  %v867_v3 = vadd.f32 %v1930_v63, %v2247_v16 }
 0x12b   : > { %1505 = vst.msk [vmem:[%s2256_s29 + $0x2d0] sm:$0xff] %vm1414_vm0, %v1376_v59  ;;  %v1379_v1 = vsel %vm1123_vm13, %v857_v51, %v1251_v57  ;;  %1444 = vst.msk [vmem:[%s2256_s29 + $0xe8] sm:$0xff] %vm1414_vm0, %v1315_v0  ;;  %vm1058_vm14 = vcmp.ge.f32.partialorder %v532_v60, 0.0  ;;  %v1186_v4 = vmul.f32 0.1, %v532_v60  ;;  %vm1122_vm15 = vcmp.ge.f32.partialorder %v852_v61, 0.0  ;;  %v541_v6 = vpop.f32.mrf.mxu0  ;;  %v861_v7 = vpop.f32.mrf.mxu1 }
 0x12c   : > { %1508 = vst.msk [vmem:[%s2256_s29 + $0x2e8] sm:$0xff] %vm1414_vm0, %v1379_v1  ;;  %v1250_v5 = vmul.f32 0.1, %v852_v61  ;;  %vm1061_vm1 = vcmp.ge.f32.partialorder %v547_v2, 0.0  ;;  %v1189_v8 = vmul.f32 0.1, %v547_v2  ;;  %v542_v12 = vadd.f32 %v2247_v16, %v541_v6 }
 0x12d   : > { %vm1125_vm2 = vcmp.ge.f32.partialorder %v867_v3, 0.0  ;;  %v1253_v9 = vmul.f32 0.1, %v867_v3  ;;  %v1314_v10 = vsel %vm1058_vm14, %v532_v60, %v1186_v4  ;;  %v862_v13 = vadd.f32 %v2247_v16, %v861_v7  ;;  %v1837_v14 = vpop.f32.mrf.mxu0  ;;  %v1933_v15 = vpop.f32.mrf.mxu1 }
 0x12e   : > { %v1378_v11 = vsel %vm1122_vm15, %v852_v61, %v1250_v5  ;;  %1443 = vst.msk [vmem:[%s2256_s29 + $0xe0] sm:$0xff] %vm1414_vm0, %v1314_v10  ;;  %v1317_v17 = vsel %vm1061_vm1, %v547_v2, %v1189_v8  ;;  %v557_v19 = vadd.f32 %v1837_v14, %v2247_v16  ;;  %v877_v20 = vadd.f32 %v1933_v15, %v2247_v16 }
 0x12f   : > { %1507 = vst.msk [vmem:[%s2256_s29 + $0x2e0] sm:$0xff] %vm1414_vm0, %v1378_v11  ;;  %v1381_v18 = vsel %vm1125_vm2, %v867_v3, %v1253_v9  ;;  %1446 = vst.msk [vmem:[%s2256_s29 + $0xf8] sm:$0xff] %vm1414_vm0, %v1317_v17  ;;  %vm1060_vm3 = vcmp.ge.f32.partialorder %v542_v12, 0.0  ;;  %v1188_v21 = vmul.f32 0.1, %v542_v12  ;;  %vm1124_vm4 = vcmp.ge.f32.partialorder %v862_v13, 0.0  ;;  %v551_v23 = vpop.f32.mrf.mxu0  ;;  %v871_v24 = vpop.f32.mrf.mxu1 }
 0x130   : > { %1510 = vst.msk [vmem:[%s2256_s29 + $0x2f8] sm:$0xff] %vm1414_vm0, %v1381_v18  ;;  %v1252_v22 = vmul.f32 0.1, %v862_v13  ;;  %vm1063_vm5 = vcmp.ge.f32.partialorder %v557_v19, 0.0  ;;  %v1191_v25 = vmul.f32 0.1, %v557_v19  ;;  %v552_v29 = vadd.f32 %v2247_v16, %v551_v23 }
 0x131   : > { %vm1127_vm6 = vcmp.ge.f32.partialorder %v877_v20, 0.0  ;;  %v1255_v26 = vmul.f32 0.1, %v877_v20  ;;  %v1316_v27 = vsel %vm1060_vm3, %v542_v12, %v1188_v21  ;;  %v872_v30 = vadd.f32 %v2247_v16, %v871_v24  ;;  %v1840_v31 = vpop.f32.mrf.mxu0  ;;  %v1936_v32 = vpop.f32.mrf.mxu1 }
 0x132   : > { %v1380_v28 = vsel %vm1124_vm4, %v862_v13, %v1252_v22  ;;  %1445 = vst.msk [vmem:[%s2256_s29 + $0xf0] sm:$0xff] %vm1414_vm0, %v1316_v27  ;;  %v1319_v33 = vsel %vm1063_vm5, %v557_v19, %v1191_v25  ;;  %v567_v35 = vadd.f32 %v1840_v31, %v2247_v16  ;;  %v887_v36 = vadd.f32 %v1936_v32, %v2247_v16 }
 0x133   : > { %1509 = vst.msk [vmem:[%s2256_s29 + $0x2f0] sm:$0xff] %vm1414_vm0, %v1380_v28  ;;  %v1383_v34 = vsel %vm1127_vm6, %v877_v20, %v1255_v26  ;;  %1448 = vst.msk [vmem:[%s2256_s29 + $0x108] sm:$0xff] %vm1414_vm0, %v1319_v33  ;;  %vm1062_vm7 = vcmp.ge.f32.partialorder %v552_v29, 0.0  ;;  %v1190_v37 = vmul.f32 0.1, %v552_v29  ;;  %vm1126_vm8 = vcmp.ge.f32.partialorder %v872_v30, 0.0  ;;  %v561_v39 = vpop.f32.mrf.mxu0  ;;  %v881_v40 = vpop.f32.mrf.mxu1 }
 0x134   : > { %1512 = vst.msk [vmem:[%s2256_s29 + $0x308] sm:$0xff] %vm1414_vm0, %v1383_v34  ;;  %v1254_v38 = vmul.f32 0.1, %v872_v30  ;;  %vm1065_vm9 = vcmp.ge.f32.partialorder %v567_v35, 0.0  ;;  %v1193_v41 = vmul.f32 0.1, %v567_v35  ;;  %v562_v45 = vadd.f32 %v2247_v16, %v561_v39 }
 0x135   : > { %vm1129_vm10 = vcmp.ge.f32.partialorder %v887_v36, 0.0  ;;  %v1257_v42 = vmul.f32 0.1, %v887_v36  ;;  %v1318_v43 = vsel %vm1062_vm7, %v552_v29, %v1190_v37  ;;  %v882_v46 = vadd.f32 %v2247_v16, %v881_v40  ;;  %v1843_v47 = vpop.f32.mrf.mxu0  ;;  %v1939_v48 = vpop.f32.mrf.mxu1 }
 0x136   : > { %v1382_v44 = vsel %vm1126_vm8, %v872_v30, %v1254_v38  ;;  %1447 = vst.msk [vmem:[%s2256_s29 + $0x100] sm:$0xff] %vm1414_vm0, %v1318_v43  ;;  %v1321_v49 = vsel %vm1065_vm9, %v567_v35, %v1193_v41  ;;  %v577_v51 = vadd.f32 %v1843_v47, %v2247_v16  ;;  %v897_v52 = vadd.f32 %v1939_v48, %v2247_v16 }
 0x137   : > { %1511 = vst.msk [vmem:[%s2256_s29 + $0x300] sm:$0xff] %vm1414_vm0, %v1382_v44  ;;  %v1385_v50 = vsel %vm1129_vm10, %v887_v36, %v1257_v42  ;;  %1450 = vst.msk [vmem:[%s2256_s29 + $0x118] sm:$0xff] %vm1414_vm0, %v1321_v49  ;;  %vm1064_vm11 = vcmp.ge.f32.partialorder %v562_v45, 0.0  ;;  %v1192_v53 = vmul.f32 0.1, %v562_v45  ;;  %vm1128_vm12 = vcmp.ge.f32.partialorder %v882_v46, 0.0  ;;  %v571_v55 = vpop.f32.mrf.mxu0  ;;  %v891_v56 = vpop.f32.mrf.mxu1 }
 0x138   : > { %1514 = vst.msk [vmem:[%s2256_s29 + $0x318] sm:$0xff] %vm1414_vm0, %v1385_v50  ;;  %v1256_v54 = vmul.f32 0.1, %v882_v46  ;;  %vm1067_vm13 = vcmp.ge.f32.partialorder %v577_v51, 0.0  ;;  %v1195_v57 = vmul.f32 0.1, %v577_v51  ;;  %v572_v61 = vadd.f32 %v2247_v16, %v571_v55 }
 0x139   : > { %vm1131_vm14 = vcmp.ge.f32.partialorder %v897_v52, 0.0  ;;  %v1259_v58 = vmul.f32 0.1, %v897_v52  ;;  %v1320_v59 = vsel %vm1064_vm11, %v562_v45, %v1192_v53  ;;  %v892_v62 = vadd.f32 %v2247_v16, %v891_v56  ;;  %v1846_v63 = vpop.f32.mrf.mxu0  ;;  %v1942_v0 = vpop.f32.mrf.mxu1  ;;  %v2509_v45 = vld [vmem:[%s2650_s2] ss:$0 sm:$0xff] }
 0x13a   : > { %v1384_v60 = vsel %vm1128_vm12, %v882_v46, %v1256_v54  ;;  %1449 = vst.msk [vmem:[%s2256_s29 + $0x110] sm:$0xff] %vm1414_vm0, %v1320_v59  ;;  %v1323_v1 = vsel %vm1067_vm13, %v577_v51, %v1195_v57  ;;  %v587_v3 = vadd.f32 %v1846_v63, %v2247_v16  ;;  %v907_v4 = vadd.f32 %v1942_v0, %v2247_v16 }
 0x13b   : > { %1513 = vst.msk [vmem:[%s2256_s29 + $0x310] sm:$0xff] %vm1414_vm0, %v1384_v60  ;;  %v1387_v2 = vsel %vm1131_vm14, %v897_v52, %v1259_v58  ;;  %1452 = vst.msk [vmem:[%s2256_s29 + $0x128] sm:$0xff] %vm1414_vm0, %v1323_v1  ;;  %vm1066_vm15 = vcmp.ge.f32.partialorder %v572_v61, 0.0  ;;  %v1194_v5 = vmul.f32 0.1, %v572_v61  ;;  %vm1130_vm1 = vcmp.ge.f32.partialorder %v892_v62, 0.0  ;;  %v581_v7 = vpop.f32.mrf.mxu0  ;;  %v901_v8 = vpop.f32.mrf.mxu1 }
 0x13c   : > { %1516 = vst.msk [vmem:[%s2256_s29 + $0x328] sm:$0xff] %vm1414_vm0, %v1387_v2  ;;  %v1258_v6 = vmul.f32 0.1, %v892_v62  ;;  %vm1069_vm2 = vcmp.ge.f32.partialorder %v587_v3, 0.0  ;;  %v1197_v9 = vmul.f32 0.1, %v587_v3  ;;  %v582_v13 = vadd.f32 %v2247_v16, %v581_v7 }
 0x13d   : > { %vm1133_vm3 = vcmp.ge.f32.partialorder %v907_v4, 0.0  ;;  %v1261_v10 = vmul.f32 0.1, %v907_v4  ;;  %v1322_v11 = vsel %vm1066_vm15, %v572_v61, %v1194_v5  ;;  %v902_v14 = vadd.f32 %v2247_v16, %v901_v8  ;;  %v1849_v15 = vpop.f32.mrf.mxu0  ;;  %v1945_v17 = vpop.f32.mrf.mxu1 }
 0x13e   : > { %v1386_v12 = vsel %vm1130_vm1, %v892_v62, %v1258_v6  ;;  %1451 = vst.msk [vmem:[%s2256_s29 + $0x120] sm:$0xff] %vm1414_vm0, %v1322_v11  ;;  %v1325_v18 = vsel %vm1069_vm2, %v587_v3, %v1197_v9  ;;  %v597_v20 = vadd.f32 %v1849_v15, %v2247_v16  ;;  %v917_v21 = vadd.f32 %v1945_v17, %v2247_v16 }
 0x13f   : > { %1515 = vst.msk [vmem:[%s2256_s29 + $0x320] sm:$0xff] %vm1414_vm0, %v1386_v12  ;;  %v1389_v19 = vsel %vm1133_vm3, %v907_v4, %v1261_v10  ;;  %1454 = vst.msk [vmem:[%s2256_s29 + $0x138] sm:$0xff] %vm1414_vm0, %v1325_v18  ;;  %vm1068_vm4 = vcmp.ge.f32.partialorder %v582_v13, 0.0  ;;  %v1196_v22 = vmul.f32 0.1, %v582_v13  ;;  %vm1132_vm5 = vcmp.ge.f32.partialorder %v902_v14, 0.0  ;;  %v591_v24 = vpop.f32.mrf.mxu0  ;;  %v911_v25 = vpop.f32.mrf.mxu1 }
 0x140   : > { %1518 = vst.msk [vmem:[%s2256_s29 + $0x338] sm:$0xff] %vm1414_vm0, %v1389_v19  ;;  %v1260_v23 = vmul.f32 0.1, %v902_v14  ;;  %vm1071_vm6 = vcmp.ge.f32.partialorder %v597_v20, 0.0  ;;  %v1199_v26 = vmul.f32 0.1, %v597_v20  ;;  %v592_v30 = vadd.f32 %v2247_v16, %v591_v24 }
 0x141   : > { %vm1135_vm7 = vcmp.ge.f32.partialorder %v917_v21, 0.0  ;;  %v1263_v27 = vmul.f32 0.1, %v917_v21  ;;  %v1324_v28 = vsel %vm1068_vm4, %v582_v13, %v1196_v22  ;;  %v912_v31 = vadd.f32 %v2247_v16, %v911_v25  ;;  %v1852_v32 = vpop.f32.mrf.mxu0  ;;  %v1948_v33 = vpop.f32.mrf.mxu1 }
 0x142   : > { %v1388_v29 = vsel %vm1132_vm5, %v902_v14, %v1260_v23  ;;  %1453 = vst.msk [vmem:[%s2256_s29 + $0x130] sm:$0xff] %vm1414_vm0, %v1324_v28  ;;  %v1327_v34 = vsel %vm1071_vm6, %v597_v20, %v1199_v26  ;;  %v607_v36 = vadd.f32 %v1852_v32, %v2247_v16  ;;  %v927_v37 = vadd.f32 %v1948_v33, %v2247_v16 }
 0x143   : > { %1517 = vst.msk [vmem:[%s2256_s29 + $0x330] sm:$0xff] %vm1414_vm0, %v1388_v29  ;;  %v1391_v35 = vsel %vm1135_vm7, %v917_v21, %v1263_v27  ;;  %1456 = vst.msk [vmem:[%s2256_s29 + $0x148] sm:$0xff] %vm1414_vm0, %v1327_v34  ;;  %vm1070_vm8 = vcmp.ge.f32.partialorder %v592_v30, 0.0  ;;  %v1198_v38 = vmul.f32 0.1, %v592_v30  ;;  %vm1134_vm9 = vcmp.ge.f32.partialorder %v912_v31, 0.0  ;;  %v601_v40 = vpop.f32.mrf.mxu0  ;;  %v921_v41 = vpop.f32.mrf.mxu1 }
 0x144   : > { %1520 = vst.msk [vmem:[%s2256_s29 + $0x348] sm:$0xff] %vm1414_vm0, %v1391_v35  ;;  %v1262_v39 = vmul.f32 0.1, %v912_v31  ;;  %vm1073_vm10 = vcmp.ge.f32.partialorder %v607_v36, 0.0  ;;  %v1201_v42 = vmul.f32 0.1, %v607_v36  ;;  %v602_v46 = vadd.f32 %v2509_v45, %v601_v40 }
 0x145   : > { %vm1137_vm11 = vcmp.ge.f32.partialorder %v927_v37, 0.0  ;;  %v1265_v43 = vmul.f32 0.1, %v927_v37  ;;  %v1326_v44 = vsel %vm1070_vm8, %v592_v30, %v1198_v38  ;;  %v922_v47 = vadd.f32 %v2509_v45, %v921_v41  ;;  %v1855_v48 = vpop.f32.mrf.mxu0  ;;  %v1951_v49 = vpop.f32.mrf.mxu1 }
 0x146   : > { %v1390_v16 = vsel %vm1134_vm9, %v912_v31, %v1262_v39  ;;  %1455 = vst.msk [vmem:[%s2256_s29 + $0x140] sm:$0xff] %vm1414_vm0, %v1326_v44  ;;  %v1329_v50 = vsel %vm1073_vm10, %v607_v36, %v1201_v42  ;;  %v617_v52 = vadd.f32 %v2509_v45, %v1855_v48  ;;  %v937_v53 = vadd.f32 %v2509_v45, %v1951_v49 }
 0x147   : > { %1519 = vst.msk [vmem:[%s2256_s29 + $0x340] sm:$0xff] %vm1414_vm0, %v1390_v16  ;;  %v1393_v51 = vsel %vm1137_vm11, %v927_v37, %v1265_v43  ;;  %1458 = vst.msk [vmem:[%s2256_s29 + $0x158] sm:$0xff] %vm1414_vm0, %v1329_v50  ;;  %vm1072_vm12 = vcmp.ge.f32.partialorder %v602_v46, 0.0  ;;  %v1200_v54 = vmul.f32 0.1, %v602_v46  ;;  %vm1136_vm13 = vcmp.ge.f32.partialorder %v922_v47, 0.0  ;;  %v611_v56 = vpop.f32.mrf.mxu0  ;;  %v931_v57 = vpop.f32.mrf.mxu1 }
 0x148   : > { %1522 = vst.msk [vmem:[%s2256_s29 + $0x358] sm:$0xff] %vm1414_vm0, %v1393_v51  ;;  %v1264_v55 = vmul.f32 0.1, %v922_v47  ;;  %vm1075_vm14 = vcmp.ge.f32.partialorder %v617_v52, 0.0  ;;  %v1203_v58 = vmul.f32 0.1, %v617_v52  ;;  %v612_v62 = vadd.f32 %v2509_v45, %v611_v56 }
 0x149   : > { %vm1139_vm15 = vcmp.ge.f32.partialorder %v937_v53, 0.0  ;;  %v1267_v59 = vmul.f32 0.1, %v937_v53  ;;  %v1328_v60 = vsel %vm1072_vm12, %v602_v46, %v1200_v54  ;;  %v932_v63 = vadd.f32 %v2509_v45, %v931_v57  ;;  %v1858_v0 = vpop.f32.mrf.mxu0  ;;  %v1954_v1 = vpop.f32.mrf.mxu1 }
 0x14a   : > { %v1392_v61 = vsel %vm1136_vm13, %v922_v47, %v1264_v55  ;;  %1457 = vst.msk [vmem:[%s2256_s29 + $0x150] sm:$0xff] %vm1414_vm0, %v1328_v60  ;;  %v1331_v2 = vsel %vm1075_vm14, %v617_v52, %v1203_v58  ;;  %v627_v4 = vadd.f32 %v2509_v45, %v1858_v0  ;;  %v947_v5 = vadd.f32 %v2509_v45, %v1954_v1 }
 0x14b   : > { %1521 = vst.msk [vmem:[%s2256_s29 + $0x350] sm:$0xff] %vm1414_vm0, %v1392_v61  ;;  %v1395_v3 = vsel %vm1139_vm15, %v937_v53, %v1267_v59  ;;  %1460 = vst.msk [vmem:[%s2256_s29 + $0x168] sm:$0xff] %vm1414_vm0, %v1331_v2  ;;  %vm1074_vm1 = vcmp.ge.f32.partialorder %v612_v62, 0.0  ;;  %v1202_v6 = vmul.f32 0.1, %v612_v62  ;;  %vm1138_vm2 = vcmp.ge.f32.partialorder %v932_v63, 0.0  ;;  %v621_v8 = vpop.f32.mrf.mxu0  ;;  %v941_v9 = vpop.f32.mrf.mxu1 }
 0x14c   : > { %1524 = vst.msk [vmem:[%s2256_s29 + $0x368] sm:$0xff] %vm1414_vm0, %v1395_v3  ;;  %v1266_v7 = vmul.f32 0.1, %v932_v63  ;;  %vm1077_vm3 = vcmp.ge.f32.partialorder %v627_v4, 0.0  ;;  %v1205_v10 = vmul.f32 0.1, %v627_v4  ;;  %v622_v14 = vadd.f32 %v2509_v45, %v621_v8 }
 0x14d   : > { %vm1141_vm4 = vcmp.ge.f32.partialorder %v947_v5, 0.0  ;;  %v1269_v11 = vmul.f32 0.1, %v947_v5  ;;  %v1330_v12 = vsel %vm1074_vm1, %v612_v62, %v1202_v6  ;;  %v942_v15 = vadd.f32 %v2509_v45, %v941_v9  ;;  %v1861_v17 = vpop.f32.mrf.mxu0  ;;  %v1957_v18 = vpop.f32.mrf.mxu1 }
 0x14e   : > { %v1394_v13 = vsel %vm1138_vm2, %v932_v63, %v1266_v7  ;;  %1459 = vst.msk [vmem:[%s2256_s29 + $0x160] sm:$0xff] %vm1414_vm0, %v1330_v12  ;;  %v1333_v19 = vsel %vm1077_vm3, %v627_v4, %v1205_v10  ;;  %v637_v21 = vadd.f32 %v2509_v45, %v1861_v17  ;;  %v957_v22 = vadd.f32 %v2509_v45, %v1957_v18 }
 0x14f   : > { %1523 = vst.msk [vmem:[%s2256_s29 + $0x360] sm:$0xff] %vm1414_vm0, %v1394_v13  ;;  %v1397_v20 = vsel %vm1141_vm4, %v947_v5, %v1269_v11  ;;  %1462 = vst.msk [vmem:[%s2256_s29 + $0x178] sm:$0xff] %vm1414_vm0, %v1333_v19  ;;  %vm1076_vm5 = vcmp.ge.f32.partialorder %v622_v14, 0.0  ;;  %v1204_v23 = vmul.f32 0.1, %v622_v14  ;;  %vm1140_vm6 = vcmp.ge.f32.partialorder %v942_v15, 0.0  ;;  %v631_v25 = vpop.f32.mrf.mxu0  ;;  %v951_v26 = vpop.f32.mrf.mxu1 }
 0x150   : > { %1526 = vst.msk [vmem:[%s2256_s29 + $0x378] sm:$0xff] %vm1414_vm0, %v1397_v20  ;;  %v1268_v24 = vmul.f32 0.1, %v942_v15  ;;  %vm1079_vm7 = vcmp.ge.f32.partialorder %v637_v21, 0.0  ;;  %v1207_v27 = vmul.f32 0.1, %v637_v21  ;;  %v632_v31 = vadd.f32 %v2509_v45, %v631_v25 }
 0x151   : > { %vm1143_vm8 = vcmp.ge.f32.partialorder %v957_v22, 0.0  ;;  %v1271_v28 = vmul.f32 0.1, %v957_v22  ;;  %v1332_v29 = vsel %vm1076_vm5, %v622_v14, %v1204_v23  ;;  %v952_v32 = vadd.f32 %v2509_v45, %v951_v26  ;;  %v1864_v33 = vpop.f32.mrf.mxu0  ;;  %v1960_v34 = vpop.f32.mrf.mxu1 }
 0x152   : > { %v1396_v30 = vsel %vm1140_vm6, %v942_v15, %v1268_v24  ;;  %1461 = vst.msk [vmem:[%s2256_s29 + $0x170] sm:$0xff] %vm1414_vm0, %v1332_v29  ;;  %v1335_v35 = vsel %vm1079_vm7, %v637_v21, %v1207_v27  ;;  %v647_v37 = vadd.f32 %v2509_v45, %v1864_v33  ;;  %v967_v38 = vadd.f32 %v2509_v45, %v1960_v34 }
 0x153   : > { %1525 = vst.msk [vmem:[%s2256_s29 + $0x370] sm:$0xff] %vm1414_vm0, %v1396_v30  ;;  %v1399_v36 = vsel %vm1143_vm8, %v957_v22, %v1271_v28  ;;  %1464 = vst.msk [vmem:[%s2256_s29 + $0x188] sm:$0xff] %vm1414_vm0, %v1335_v35  ;;  %vm1078_vm9 = vcmp.ge.f32.partialorder %v632_v31, 0.0  ;;  %v1206_v39 = vmul.f32 0.1, %v632_v31  ;;  %vm1142_vm10 = vcmp.ge.f32.partialorder %v952_v32, 0.0  ;;  %v641_v41 = vpop.f32.mrf.mxu0  ;;  %v961_v42 = vpop.f32.mrf.mxu1 }
 0x154   : > { %1528 = vst.msk [vmem:[%s2256_s29 + $0x388] sm:$0xff] %vm1414_vm0, %v1399_v36  ;;  %v1270_v40 = vmul.f32 0.1, %v952_v32  ;;  %vm1081_vm11 = vcmp.ge.f32.partialorder %v647_v37, 0.0  ;;  %v1209_v43 = vmul.f32 0.1, %v647_v37  ;;  %v642_v47 = vadd.f32 %v2509_v45, %v641_v41 }
 0x155   : > { %vm1145_vm12 = vcmp.ge.f32.partialorder %v967_v38, 0.0  ;;  %v1273_v44 = vmul.f32 0.1, %v967_v38  ;;  %v1334_v16 = vsel %vm1078_vm9, %v632_v31, %v1206_v39  ;;  %v962_v48 = vadd.f32 %v2509_v45, %v961_v42  ;;  %v1867_v49 = vpop.f32.mrf.mxu0  ;;  %v1963_v50 = vpop.f32.mrf.mxu1 }
 0x156   : > { %v1398_v46 = vsel %vm1142_vm10, %v952_v32, %v1270_v40  ;;  %1463 = vst.msk [vmem:[%s2256_s29 + $0x180] sm:$0xff] %vm1414_vm0, %v1334_v16  ;;  %v1337_v51 = vsel %vm1081_vm11, %v647_v37, %v1209_v43  ;;  %v657_v53 = vadd.f32 %v2509_v45, %v1867_v49  ;;  %v977_v54 = vadd.f32 %v2509_v45, %v1963_v50 }
 0x157   : > { %1527 = vst.msk [vmem:[%s2256_s29 + $0x380] sm:$0xff] %vm1414_vm0, %v1398_v46  ;;  %v1401_v52 = vsel %vm1145_vm12, %v967_v38, %v1273_v44  ;;  %1466 = vst.msk [vmem:[%s2256_s29 + $0x198] sm:$0xff] %vm1414_vm0, %v1337_v51  ;;  %vm1080_vm13 = vcmp.ge.f32.partialorder %v642_v47, 0.0  ;;  %v1208_v55 = vmul.f32 0.1, %v642_v47  ;;  %vm1144_vm14 = vcmp.ge.f32.partialorder %v962_v48, 0.0  ;;  %v651_v57 = vpop.f32.mrf.mxu0  ;;  %v971_v58 = vpop.f32.mrf.mxu1 }
 0x158   : > { %1530 = vst.msk [vmem:[%s2256_s29 + $0x398] sm:$0xff] %vm1414_vm0, %v1401_v52  ;;  %v1272_v56 = vmul.f32 0.1, %v962_v48  ;;  %vm1083_vm15 = vcmp.ge.f32.partialorder %v657_v53, 0.0  ;;  %v1211_v59 = vmul.f32 0.1, %v657_v53  ;;  %v652_v63 = vadd.f32 %v2509_v45, %v651_v57 }
 0x159   : > { %vm1147_vm1 = vcmp.ge.f32.partialorder %v977_v54, 0.0  ;;  %v1275_v60 = vmul.f32 0.1, %v977_v54  ;;  %v1336_v61 = vsel %vm1080_vm13, %v642_v47, %v1208_v55  ;;  %v972_v0 = vadd.f32 %v2509_v45, %v971_v58  ;;  %v1870_v1 = vpop.f32.mrf.mxu0  ;;  %v1966_v2 = vpop.f32.mrf.mxu1 }
 0x15a   : > { %v1400_v62 = vsel %vm1144_vm14, %v962_v48, %v1272_v56  ;;  %1465 = vst.msk [vmem:[%s2256_s29 + $0x190] sm:$0xff] %vm1414_vm0, %v1336_v61  ;;  %v1339_v3 = vsel %vm1083_vm15, %v657_v53, %v1211_v59  ;;  %v667_v5 = vadd.f32 %v2509_v45, %v1870_v1  ;;  %v987_v6 = vadd.f32 %v2509_v45, %v1966_v2 }
 0x15b   : > { %1529 = vst.msk [vmem:[%s2256_s29 + $0x390] sm:$0xff] %vm1414_vm0, %v1400_v62  ;;  %v1403_v4 = vsel %vm1147_vm1, %v977_v54, %v1275_v60  ;;  %1468 = vst.msk [vmem:[%s2256_s29 + $0x1a8] sm:$0xff] %vm1414_vm0, %v1339_v3  ;;  %vm1082_vm2 = vcmp.ge.f32.partialorder %v652_v63, 0.0  ;;  %v1210_v7 = vmul.f32 0.1, %v652_v63  ;;  %vm1146_vm3 = vcmp.ge.f32.partialorder %v972_v0, 0.0  ;;  %v661_v9 = vpop.f32.mrf.mxu0  ;;  %v981_v10 = vpop.f32.mrf.mxu1 }
 0x15c   : > { %1532 = vst.msk [vmem:[%s2256_s29 + $0x3a8] sm:$0xff] %vm1414_vm0, %v1403_v4  ;;  %v1274_v8 = vmul.f32 0.1, %v972_v0  ;;  %vm1085_vm4 = vcmp.ge.f32.partialorder %v667_v5, 0.0  ;;  %v1213_v11 = vmul.f32 0.1, %v667_v5  ;;  %v662_v15 = vadd.f32 %v2509_v45, %v661_v9 }
 0x15d   : > { %vm1149_vm5 = vcmp.ge.f32.partialorder %v987_v6, 0.0  ;;  %v1277_v12 = vmul.f32 0.1, %v987_v6  ;;  %v1338_v13 = vsel %vm1082_vm2, %v652_v63, %v1210_v7  ;;  %v982_v17 = vadd.f32 %v2509_v45, %v981_v10  ;;  %v1873_v18 = vpop.f32.mrf.mxu0  ;;  %v1969_v19 = vpop.f32.mrf.mxu1 }
 0x15e   : > { %v1402_v14 = vsel %vm1146_vm3, %v972_v0, %v1274_v8  ;;  %1467 = vst.msk [vmem:[%s2256_s29 + $0x1a0] sm:$0xff] %vm1414_vm0, %v1338_v13  ;;  %v1341_v20 = vsel %vm1085_vm4, %v667_v5, %v1213_v11  ;;  %v677_v22 = vadd.f32 %v2509_v45, %v1873_v18  ;;  %v997_v23 = vadd.f32 %v2509_v45, %v1969_v19 }
 0x15f   : > { %1531 = vst.msk [vmem:[%s2256_s29 + $0x3a0] sm:$0xff] %vm1414_vm0, %v1402_v14  ;;  %v1405_v21 = vsel %vm1149_vm5, %v987_v6, %v1277_v12  ;;  %1470 = vst.msk [vmem:[%s2256_s29 + $0x1b8] sm:$0xff] %vm1414_vm0, %v1341_v20  ;;  %vm1084_vm6 = vcmp.ge.f32.partialorder %v662_v15, 0.0  ;;  %v1212_v24 = vmul.f32 0.1, %v662_v15  ;;  %vm1148_vm7 = vcmp.ge.f32.partialorder %v982_v17, 0.0  ;;  %v671_v26 = vpop.f32.mrf.mxu0  ;;  %v991_v27 = vpop.f32.mrf.mxu1 }
 0x160   : > { %1534 = vst.msk [vmem:[%s2256_s29 + $0x3b8] sm:$0xff] %vm1414_vm0, %v1405_v21  ;;  %v1276_v25 = vmul.f32 0.1, %v982_v17  ;;  %vm1087_vm8 = vcmp.ge.f32.partialorder %v677_v22, 0.0  ;;  %v1215_v28 = vmul.f32 0.1, %v677_v22  ;;  %v672_v32 = vadd.f32 %v2509_v45, %v671_v26 }
 0x161   : > { %vm1151_vm9 = vcmp.ge.f32.partialorder %v997_v23, 0.0  ;;  %v1279_v29 = vmul.f32 0.1, %v997_v23  ;;  %v1340_v30 = vsel %vm1084_vm6, %v662_v15, %v1212_v24  ;;  %v992_v33 = vadd.f32 %v2509_v45, %v991_v27  ;;  %v1876_v34 = vpop.f32.mrf.mxu0  ;;  %v1972_v35 = vpop.f32.mrf.mxu1 }
 0x162   : > { %v1404_v31 = vsel %vm1148_vm7, %v982_v17, %v1276_v25  ;;  %1469 = vst.msk [vmem:[%s2256_s29 + $0x1b0] sm:$0xff] %vm1414_vm0, %v1340_v30  ;;  %v1343_v36 = vsel %vm1087_vm8, %v677_v22, %v1215_v28  ;;  %v687_v38 = vadd.f32 %v2509_v45, %v1876_v34  ;;  %v1007_v39 = vadd.f32 %v2509_v45, %v1972_v35 }
 0x163   : > { %1533 = vst.msk [vmem:[%s2256_s29 + $0x3b0] sm:$0xff] %vm1414_vm0, %v1404_v31  ;;  %v1407_v37 = vsel %vm1151_vm9, %v997_v23, %v1279_v29  ;;  %1472 = vst.msk [vmem:[%s2256_s29 + $0x1c8] sm:$0xff] %vm1414_vm0, %v1343_v36  ;;  %vm1086_vm10 = vcmp.ge.f32.partialorder %v672_v32, 0.0  ;;  %v1214_v40 = vmul.f32 0.1, %v672_v32  ;;  %vm1150_vm11 = vcmp.ge.f32.partialorder %v992_v33, 0.0  ;;  %v681_v42 = vpop.f32.mrf.mxu0  ;;  %v1001_v43 = vpop.f32.mrf.mxu1 }
 0x164   : > { %1536 = vst.msk [vmem:[%s2256_s29 + $0x3c8] sm:$0xff] %vm1414_vm0, %v1407_v37  ;;  %v1278_v41 = vmul.f32 0.1, %v992_v33  ;;  %vm1089_vm12 = vcmp.ge.f32.partialorder %v687_v38, 0.0  ;;  %v1217_v44 = vmul.f32 0.1, %v687_v38  ;;  %v682_v48 = vadd.f32 %v2509_v45, %v681_v42 }
 0x165   : > { %vm1153_vm13 = vcmp.ge.f32.partialorder %v1007_v39, 0.0  ;;  %v1281_v16 = vmul.f32 0.1, %v1007_v39  ;;  %v1342_v46 = vsel %vm1086_vm10, %v672_v32, %v1214_v40  ;;  %v1002_v49 = vadd.f32 %v2509_v45, %v1001_v43  ;;  %v1879_v50 = vpop.f32.mrf.mxu0  ;;  %v1975_v51 = vpop.f32.mrf.mxu1 }
 0x166   : > { %v1406_v47 = vsel %vm1150_vm11, %v992_v33, %v1278_v41  ;;  %1471 = vst.msk [vmem:[%s2256_s29 + $0x1c0] sm:$0xff] %vm1414_vm0, %v1342_v46  ;;  %v1345_v52 = vsel %vm1089_vm12, %v687_v38, %v1217_v44  ;;  %v697_v54 = vadd.f32 %v2509_v45, %v1879_v50  ;;  %v1017_v55 = vadd.f32 %v2509_v45, %v1975_v51 }
 0x167   : > { %1535 = vst.msk [vmem:[%s2256_s29 + $0x3c0] sm:$0xff] %vm1414_vm0, %v1406_v47  ;;  %v1409_v53 = vsel %vm1153_vm13, %v1007_v39, %v1281_v16  ;;  %1474 = vst.msk [vmem:[%s2256_s29 + $0x1d8] sm:$0xff] %vm1414_vm0, %v1345_v52  ;;  %vm1088_vm14 = vcmp.ge.f32.partialorder %v682_v48, 0.0  ;;  %v1216_v56 = vmul.f32 0.1, %v682_v48  ;;  %vm1152_vm15 = vcmp.ge.f32.partialorder %v1002_v49, 0.0  ;;  %v691_v58 = vpop.f32.mrf.mxu0  ;;  %v1011_v59 = vpop.f32.mrf.mxu1 }
 0x168   : > { %1538 = vst.msk [vmem:[%s2256_s29 + $0x3d8] sm:$0xff] %vm1414_vm0, %v1409_v53  ;;  %v1280_v57 = vmul.f32 0.1, %v1002_v49  ;;  %vm1091_vm1 = vcmp.ge.f32.partialorder %v697_v54, 0.0  ;;  %v1219_v60 = vmul.f32 0.1, %v697_v54  ;;  %v692_v0 = vadd.f32 %v2509_v45, %v691_v58 }
 0x169   : > { %vm1155_vm2 = vcmp.ge.f32.partialorder %v1017_v55, 0.0  ;;  %v1283_v61 = vmul.f32 0.1, %v1017_v55  ;;  %v1344_v62 = vsel %vm1088_vm14, %v682_v48, %v1216_v56  ;;  %v1012_v1 = vadd.f32 %v2509_v45, %v1011_v59  ;;  %v1882_v2 = vpop.f32.mrf.mxu0  ;;  %v1978_v3 = vpop.f32.mrf.mxu1 }
 0x16a   : > { %v1408_v63 = vsel %vm1152_vm15, %v1002_v49, %v1280_v57  ;;  %1473 = vst.msk [vmem:[%s2256_s29 + $0x1d0] sm:$0xff] %vm1414_vm0, %v1344_v62  ;;  %v1347_v4 = vsel %vm1091_vm1, %v697_v54, %v1219_v60  ;;  %v707_v6 = vadd.f32 %v2509_v45, %v1882_v2  ;;  %v1027_v7 = vadd.f32 %v2509_v45, %v1978_v3 }
 0x16b   : > { %1537 = vst.msk [vmem:[%s2256_s29 + $0x3d0] sm:$0xff] %vm1414_vm0, %v1408_v63  ;;  %v1411_v5 = vsel %vm1155_vm2, %v1017_v55, %v1283_v61  ;;  %1476 = vst.msk [vmem:[%s2256_s29 + $0x1e8] sm:$0xff] %vm1414_vm0, %v1347_v4  ;;  %vm1090_vm3 = vcmp.ge.f32.partialorder %v692_v0, 0.0  ;;  %v1218_v8 = vmul.f32 0.1, %v692_v0  ;;  %vm1154_vm4 = vcmp.ge.f32.partialorder %v1012_v1, 0.0  ;;  %v701_v10 = vpop.f32.mrf.mxu0  ;;  %v1021_v11 = vpop.f32.mrf.mxu1 }
 0x16c   : > { %1540 = vst.msk [vmem:[%s2256_s29 + $0x3e8] sm:$0xff] %vm1414_vm0, %v1411_v5  ;;  %v1282_v9 = vmul.f32 0.1, %v1012_v1  ;;  %vm1093_vm5 = vcmp.ge.f32.partialorder %v707_v6, 0.0  ;;  %v1221_v12 = vmul.f32 0.1, %v707_v6  ;;  %v702_v17 = vadd.f32 %v2509_v45, %v701_v10 }
 0x16d   : > { %vm1157_vm6 = vcmp.ge.f32.partialorder %v1027_v7, 0.0  ;;  %v1285_v13 = vmul.f32 0.1, %v1027_v7  ;;  %v1346_v14 = vsel %vm1090_vm3, %v692_v0, %v1218_v8  ;;  %v1022_v18 = vadd.f32 %v2509_v45, %v1021_v11 }
 0x16e   : > { %v1410_v15 = vsel %vm1154_vm4, %v1012_v1, %v1282_v9  ;;  %1475 = vst.msk [vmem:[%s2256_s29 + $0x1e0] sm:$0xff] %vm1414_vm0, %v1346_v14  ;;  %v1349_v19 = vsel %vm1093_vm5, %v707_v6, %v1221_v12  ;;  %vm1092_vm7 = vcmp.ge.f32.partialorder %v702_v17, 0.0  ;;  %v1220_v21 = vmul.f32 0.1, %v702_v17 }
 0x16f   : > { %1539 = vst.msk [vmem:[%s2256_s29 + $0x3e0] sm:$0xff] %vm1414_vm0, %v1410_v15  ;;  %v1413_v20 = vsel %vm1157_vm6, %v1027_v7, %v1285_v13  ;;  %1478 = vst.msk [vmem:[%s2256_s29 + $0x1f8] sm:$0xff] %vm1414_vm0, %v1349_v19  ;;  %vm1156_vm8 = vcmp.ge.f32.partialorder %v1022_v18, 0.0  ;;  %v1284_v22 = vmul.f32 0.1, %v1022_v18 }
 0x170   : > { %1542 = vst.msk [vmem:[%s2256_s29 + $0x3f8] sm:$0xff] %vm1414_vm0, %v1413_v20  ;;  %v1348_v23 = vsel %vm1092_vm7, %v702_v17, %v1220_v21 }
 0x171   : > { %v1412_v24 = vsel %vm1156_vm8, %v1022_v18, %v1284_v22  ;;  %1477 = vst.msk [vmem:[%s2256_s29 + $0x1f0] sm:$0xff] %vm1414_vm0, %v1348_v23 }
 0x172   : > { %1541 = vst.msk [vmem:[%s2256_s29 + $0x3f0] sm:$0xff] %vm1414_vm0, %v1412_v24 }
 0x173 PF: > { %s13_s12 = sadd.s32 1, %s2026_s12  }
 0x174   : > { %p10_p4 = scmp.ge.s32.totalorder %s13_s12, 4  }
 0x176   :  { %12 = sbr.rel (!%p10_p4) target bundleno = 1 (0x1), region = 62 }

// kernel: encoder_forward.5
= control target key start
LH: loop header
LB: loop body
LE: loop exit
PB: predicated region body
PF: predicated region fallthrough
CT: control target
= control target key end

     0   :  { %s1063_s12 = smov 0   ;;  %s1575_s0 = inlined_call_operand.vmem [shape: f32[512,512], index: 0, kind: input, shape index: {}]   ;;  %s1576_s1 = inlined_call_operand.vmem [shape: f32[512,32], index: 1, kind: input, shape index: {}]   ;;  %s1577_s2 = inlined_call_operand.vmem [shape: f32[1,32], index: 2, kind: input, shape index: {}]   ;;  %s1578_s3 = inlined_call_operand.vmem [shape: f32[512,32], index: 3, kind: output, shape index: {}]  }
   0x1 LB: > { %s1011_s13 = sadd.s32 4294967295, %s1040_s12   ;;  %p1015_p0 = scmp.ge.s32.totalorder %s1040_s12, 1  ;;  %s1040_s12 = sphi %s1063_s12, %s13_s12  }
   0x2   : > { %p139_p1 = scmp.lt.s32.totalorder %s1040_s12, 3 }
   0x4   : > { %p140_p2 = pnand %p1015_p0, %p139_p1 }
   0x5   : > { %s1016_s4 = sshll.u32 (!%p140_p2), %s1011_s13, 5 }
   0x6   : > { %143 = sbr.rel (%p140_p2) target bundleno = 402 (0x192), region = 32  ;;  %p165_p3 = scmp.lt.s32.totalorder (!%p140_p2), %s1016_s4, 63 }
   0xb   : > { %v320_v0 = vld [vmem:[%s1576_s1 + $0x78] sm:$0xff]  ;;  %v1042_v2 = vmov 0.0   ;;  %v319_v3 = vld [vmem:[%s1576_s1 + $0x70] sm:$0xff]  ;;  %v318_v5 = vld [vmem:[%s1576_s1 + $0x68] sm:$0xff]  ;;  %s1580_s4 = smov (!%p165_p3, %s1016_s4), 63  ;;  %vm922_vm1 = vcmask 261120  }
   0xc   : > { %v352_v1 = vld [vmem:[%s1576_s1 + $0x178] sm:$0xff]  ;;  %376 = vmatprep.subr.mxu0 %v1042_v2  ;;  %601 = vmatprep.subr.mxu1 %v1042_v2  ;;  %v351_v4 = vld [vmem:[%s1576_s1 + $0x170] sm:$0xff]  ;;  %v350_v6 = vld [vmem:[%s1576_s1 + $0x168] sm:$0xff]  ;;  %s1024_s30 = sshll.u32 %s1580_s4, 5  ;;  %s1020_s23 = sshll.u32 %s1580_s4, 3 }
   0xd   : > { %377 = vmatpush1.msra.mxu0 %v320_v0  ;;  %602 = vmatpush1.msra.mxu1 %v352_v1  ;;  %v317_v7 = vld [vmem:[%s1576_s1 + $0x60] sm:$0xff]  ;;  %v316_v9 = vld [vmem:[%s1576_s1 + $0x58] sm:$0xff]  ;;  %v315_v11 = vld [vmem:[%s1576_s1 + $0x50] sm:$0xff]  ;;  %s1317_s10 = scalar_lea.vmem %s1575_s0, %s1024_s30  ;;  %s1475_s26 = scalar_lea.vmem %s1578_s3, %s1020_s23 }
   0xe   : > { %378 = vmatprep.subr.mxu0 %v1042_v2  ;;  %603 = vmatprep.subr.mxu1 %v1042_v2  ;;  %v349_v8 = vld [vmem:[%s1576_s1 + $0x160] sm:$0xff]  ;;  %v348_v10 = vld [vmem:[%s1576_s1 + $0x158] sm:$0xff]  ;;  %v347_v12 = vld [vmem:[%s1576_s1 + $0x150] sm:$0xff] }
   0xf   : > { %379 = vmatpush1.msra.mxu0 %v319_v3  ;;  %604 = vmatpush1.msra.mxu1 %v351_v4  ;;  %v314_v13 = vld [vmem:[%s1576_s1 + $0x48] sm:$0xff]  ;;  %v313_v15 = vld [vmem:[%s1576_s1 + $0x40] sm:$0xff]  ;;  %v312_v17 = vld [vmem:[%s1576_s1 + $0x38] sm:$0xff] }
  0x10   : > { %380 = vmatprep.subr.mxu0 %v1042_v2  ;;  %605 = vmatprep.subr.mxu1 %v1042_v2  ;;  %v346_v14 = vld [vmem:[%s1576_s1 + $0x148] sm:$0xff]  ;;  %v345_v16 = vld [vmem:[%s1576_s1 + $0x140] sm:$0xff]  ;;  %v344_v18 = vld [vmem:[%s1576_s1 + $0x138] sm:$0xff] }
  0x11   : > { %381 = vmatpush1.msra.mxu0 %v318_v5  ;;  %606 = vmatpush1.msra.mxu1 %v350_v6  ;;  %v311_v19 = vld [vmem:[%s1576_s1 + $0x30] sm:$0xff]  ;;  %v310_v21 = vld [vmem:[%s1576_s1 + $0x28] sm:$0xff]  ;;  %v309_v23 = vld [vmem:[%s1576_s1 + $0x20] sm:$0xff] }
  0x12   : > { %382 = vmatprep.subr.mxu0 %v1042_v2  ;;  %607 = vmatprep.subr.mxu1 %v1042_v2  ;;  %v343_v20 = vld [vmem:[%s1576_s1 + $0x130] sm:$0xff]  ;;  %v342_v22 = vld [vmem:[%s1576_s1 + $0x128] sm:$0xff]  ;;  %v341_v24 = vld [vmem:[%s1576_s1 + $0x120] sm:$0xff] }
  0x13   : > { %383 = vmatpush1.msra.mxu0 %v317_v7  ;;  %608 = vmatpush1.msra.mxu1 %v349_v8  ;;  %v308_v25 = vld [vmem:[%s1576_s1 + $0x18] sm:$0xff]  ;;  %v307_v27 = vld [vmem:[%s1576_s1 + $0x10] sm:$0xff]  ;;  %v306_v29 = vld [vmem:[%s1576_s1 + $0x8] sm:$0xff] }
  0x14   : > { %384 = vmatprep.subr.mxu0 %v1042_v2  ;;  %609 = vmatprep.subr.mxu1 %v1042_v2  ;;  %v340_v26 = vld [vmem:[%s1576_s1 + $0x118] sm:$0xff]  ;;  %v339_v28 = vld [vmem:[%s1576_s1 + $0x110] sm:$0xff]  ;;  %v338_v30 = vld [vmem:[%s1576_s1 + $0x108] sm:$0xff] }
  0x15   : > { %385 = vmatpush1.msra.mxu0 %v316_v9  ;;  %610 = vmatpush1.msra.mxu1 %v348_v10  ;;  %v305_v31 = vld [vmem:[%s1576_s1] sm:$0xff]  ;;  %v336_v33 = vld [vmem:[%s1576_s1 + $0xf8] sm:$0xff]  ;;  %v335_v35 = vld [vmem:[%s1576_s1 + $0xf0] sm:$0xff] }
  0x16   : > { %386 = vmatprep.subr.mxu0 %v1042_v2  ;;  %611 = vmatprep.subr.mxu1 %v1042_v2  ;;  %v337_v32 = vld [vmem:[%s1576_s1 + $0x100] sm:$0xff]  ;;  %v368_v34 = vld [vmem:[%s1576_s1 + $0x1f8] sm:$0xff]  ;;  %v367_v36 = vld [vmem:[%s1576_s1 + $0x1f0] sm:$0xff] }
  0x17   : > { %387 = vmatpush1.msra.mxu0 %v315_v11  ;;  %612 = vmatpush1.msra.mxu1 %v347_v12  ;;  %v334_v37 = vld [vmem:[%s1576_s1 + $0xe8] sm:$0xff]  ;;  %v333_v39 = vld [vmem:[%s1576_s1 + $0xe0] sm:$0xff]  ;;  %v332_v41 = vld [vmem:[%s1576_s1 + $0xd8] sm:$0xff] }
  0x18   : > { %388 = vmatprep.subr.mxu0 %v1042_v2  ;;  %613 = vmatprep.subr.mxu1 %v1042_v2  ;;  %v366_v38 = vld [vmem:[%s1576_s1 + $0x1e8] sm:$0xff]  ;;  %v365_v40 = vld [vmem:[%s1576_s1 + $0x1e0] sm:$0xff]  ;;  %v364_v42 = vld [vmem:[%s1576_s1 + $0x1d8] sm:$0xff] }
  0x19   : > { %389 = vmatpush1.msra.mxu0 %v314_v13  ;;  %614 = vmatpush1.msra.mxu1 %v346_v14  ;;  %v331_v43 = vld [vmem:[%s1576_s1 + $0xd0] sm:$0xff]  ;;  %v330_v45 = vld [vmem:[%s1576_s1 + $0xc8] sm:$0xff]  ;;  %v329_v47 = vld [vmem:[%s1576_s1 + $0xc0] sm:$0xff] }
  0x1a   : > { %390 = vmatprep.subr.mxu0 %v1042_v2  ;;  %615 = vmatprep.subr.mxu1 %v1042_v2  ;;  %v363_v44 = vld [vmem:[%s1576_s1 + $0x1d0] sm:$0xff]  ;;  %v362_v46 = vld [vmem:[%s1576_s1 + $0x1c8] sm:$0xff]  ;;  %v361_v48 = vld [vmem:[%s1576_s1 + $0x1c0] sm:$0xff] }
  0x1b   : > { %391 = vmatpush1.msra.mxu0 %v313_v15  ;;  %616 = vmatpush1.msra.mxu1 %v345_v16  ;;  %v328_v49 = vld [vmem:[%s1576_s1 + $0xb8] sm:$0xff]  ;;  %v327_v51 = vld [vmem:[%s1576_s1 + $0xb0] sm:$0xff]  ;;  %v326_v53 = vld [vmem:[%s1576_s1 + $0xa8] sm:$0xff] }
  0x1c   : > { %392 = vmatprep.subr.mxu0 %v1042_v2  ;;  %617 = vmatprep.subr.mxu1 %v1042_v2  ;;  %v360_v50 = vld [vmem:[%s1576_s1 + $0x1b8] sm:$0xff]  ;;  %v359_v52 = vld [vmem:[%s1576_s1 + $0x1b0] sm:$0xff]  ;;  %v358_v54 = vld [vmem:[%s1576_s1 + $0x1a8] sm:$0xff] }
  0x1d   : > { %393 = vmatpush1.msra.mxu0 %v312_v17  ;;  %618 = vmatpush1.msra.mxu1 %v344_v18  ;;  %v325_v55 = vld [vmem:[%s1576_s1 + $0xa0] sm:$0xff]  ;;  %v324_v57 = vld [vmem:[%s1576_s1 + $0x98] sm:$0xff]  ;;  %v323_v59 = vld [vmem:[%s1576_s1 + $0x90] sm:$0xff] }
  0x1e   : > { %394 = vmatprep.subr.mxu0 %v1042_v2  ;;  %619 = vmatprep.subr.mxu1 %v1042_v2  ;;  %v357_v56 = vld [vmem:[%s1576_s1 + $0x1a0] sm:$0xff]  ;;  %v356_v58 = vld [vmem:[%s1576_s1 + $0x198] sm:$0xff]  ;;  %v355_v60 = vld [vmem:[%s1576_s1 + $0x190] sm:$0xff] }
  0x1f   : > { %395 = vmatpush1.msra.mxu0 %v311_v19  ;;  %620 = vmatpush1.msra.mxu1 %v343_v20  ;;  %v322_v61 = vld [vmem:[%s1576_s1 + $0x88] sm:$0xff]  ;;  %v321_v63 = vld [vmem:[%s1576_s1 + $0x80] sm:$0xff]  ;;  %v180_v3 = vld [vmem:[%s1317_s10 + $0x18] sm:$0xff] }
  0x20   : > { %396 = vmatprep.subr.mxu0 %v1042_v2  ;;  %621 = vmatprep.subr.mxu1 %v1042_v2  ;;  %v354_v62 = vld [vmem:[%s1576_s1 + $0x188] sm:$0xff]  ;;  %v353_v1 = vld [vmem:[%s1576_s1 + $0x180] sm:$0xff]  ;;  %v179_v5 = vld [vmem:[%s1317_s10 + $0x10] sm:$0xff] }
  0x21   : > { %397 = vmatpush1.msra.mxu0 %v310_v21  ;;  %622 = vmatpush1.msra.mxu1 %v342_v22  ;;  %v178_v0 = vld [vmem:[%s1317_s10 + $0x8] sm:$0xff]  ;;  %v177_v4 = vld [vmem:[%s1317_s10] sm:$0xff]  ;;  %v184_v7 = vld [vmem:[%s1317_s10 + $0x38] sm:$0xff] }
  0x22   : > { %398 = vmatprep.subr.mxu0 %v1042_v2  ;;  %623 = vmatprep.subr.mxu1 %v1042_v2  ;;  %v182_v6 = vld [vmem:[%s1317_s10 + $0x28] sm:$0xff]  ;;  %v181_v8 = vld [vmem:[%s1317_s10 + $0x20] sm:$0xff]  ;;  %v188_v10 = vld [vmem:[%s1317_s10 + $0x58] sm:$0xff] }
  0x23   : > { %399 = vmatpush1.msra.mxu0 %v309_v23  ;;  %624 = vmatpush1.msra.mxu1 %v341_v24  ;;  %v186_v9 = vld [vmem:[%s1317_s10 + $0x48] sm:$0xff]  ;;  %v185_v11 = vld [vmem:[%s1317_s10 + $0x40] sm:$0xff]  ;;  %v187_v12 = vld [vmem:[%s1317_s10 + $0x50] sm:$0xff] }
  0x24   : > { %400 = vmatprep.subr.mxu0 %v1042_v2  ;;  %625 = vmatprep.subr.mxu1 %v1042_v2  ;;  %v190_v13 = vld [vmem:[%s1317_s10 + $0x68] sm:$0xff]  ;;  %v192_v14 = vld [vmem:[%s1317_s10 + $0x78] sm:$0xff]  ;;  %v189_v15 = vld [vmem:[%s1317_s10 + $0x60] sm:$0xff] }
  0x25   : > { %401 = vmatpush1.msra.mxu0 %v308_v25  ;;  %626 = vmatpush1.msra.mxu1 %v340_v26  ;;  %v191_v16 = vld [vmem:[%s1317_s10 + $0x70] sm:$0xff]  ;;  %v194_v17 = vld [vmem:[%s1317_s10 + $0x88] sm:$0xff]  ;;  %v196_v18 = vld [vmem:[%s1317_s10 + $0x98] sm:$0xff] }
  0x26   : > { %402 = vmatprep.subr.mxu0 %v1042_v2  ;;  %627 = vmatprep.subr.mxu1 %v1042_v2  ;;  %v193_v19 = vld [vmem:[%s1317_s10 + $0x80] sm:$0xff]  ;;  %v195_v20 = vld [vmem:[%s1317_s10 + $0x90] sm:$0xff]  ;;  %v198_v21 = vld [vmem:[%s1317_s10 + $0xa8] sm:$0xff] }
  0x27   : > { %403 = vmatpush1.msra.mxu0 %v307_v27  ;;  %628 = vmatpush1.msra.mxu1 %v339_v28  ;;  %v200_v22 = vld [vmem:[%s1317_s10 + $0xb8] sm:$0xff]  ;;  %v197_v23 = vld [vmem:[%s1317_s10 + $0xa0] sm:$0xff]  ;;  %v199_v24 = vld [vmem:[%s1317_s10 + $0xb0] sm:$0xff] }
  0x28   : > { %404 = vmatprep.subr.mxu0 %v1042_v2  ;;  %629 = vmatprep.subr.mxu1 %v1042_v2  ;;  %v202_v25 = vld [vmem:[%s1317_s10 + $0xc8] sm:$0xff]  ;;  %v204_v26 = vld [vmem:[%s1317_s10 + $0xd8] sm:$0xff]  ;;  %v201_v27 = vld [vmem:[%s1317_s10 + $0xc0] sm:$0xff] }
  0x29   : > { %405 = vmatpush1.msra.mxu0 %v306_v29  ;;  %630 = vmatpush1.msra.mxu1 %v338_v30  ;;  %v203_v28 = vld [vmem:[%s1317_s10 + $0xd0] sm:$0xff]  ;;  %v206_v29 = vld [vmem:[%s1317_s10 + $0xe8] sm:$0xff]  ;;  %v208_v30 = vld [vmem:[%s1317_s10 + $0xf8] sm:$0xff] }
  0x2a   : > { %406 = vmatprep.subr.mxu0 %v1042_v2  ;;  %631 = vmatprep.subr.mxu1 %v1042_v2 }
  0x2b   : > { %407 = vmatpush1.msra.mxu0 %v305_v31  ;;  %632 = vmatpush1.msra.mxu1 %v337_v32  ;;  %v205_v31 = vld [vmem:[%s1317_s10 + $0xe0] sm:$0xff]  ;;  %v207_v32 = vld [vmem:[%s1317_s10 + $0xf0] sm:$0xff] }
  0x2c   : > { %408 = vmatprep.subr.mxu0 %v1042_v2  ;;  %633 = vmatprep.subr.mxu1 %v1042_v2 }
  0x2d   : > { %409 = vmatpush2.msra.mxu0 %v336_v33  ;;  %634 = vmatpush2.msra.mxu1 %v368_v34  ;;  %v210_v33 = vld [vmem:[%s1317_s10 + $0x108] sm:$0xff]  ;;  %v212_v34 = vld [vmem:[%s1317_s10 + $0x118] sm:$0xff] }
  0x2e   : > { %410 = vmatprep.subr.mxu0 %v1042_v2  ;;  %635 = vmatprep.subr.mxu1 %v1042_v2 }
  0x2f   : > { %411 = vmatpush2.msra.mxu0 %v335_v35  ;;  %636 = vmatpush2.msra.mxu1 %v367_v36  ;;  %v209_v35 = vld [vmem:[%s1317_s10 + $0x100] sm:$0xff]  ;;  %v211_v36 = vld [vmem:[%s1317_s10 + $0x110] sm:$0xff] }
  0x30   : > { %412 = vmatprep.subr.mxu0 %v1042_v2  ;;  %637 = vmatprep.subr.mxu1 %v1042_v2 }
  0x31   : > { %413 = vmatpush2.msra.mxu0 %v334_v37  ;;  %638 = vmatpush2.msra.mxu1 %v366_v38  ;;  %v214_v37 = vld [vmem:[%s1317_s10 + $0x128] sm:$0xff]  ;;  %v216_v38 = vld [vmem:[%s1317_s10 + $0x138] sm:$0xff] }
  0x32   : > { %414 = vmatprep.subr.mxu0 %v1042_v2  ;;  %639 = vmatprep.subr.mxu1 %v1042_v2 }
  0x33   : > { %415 = vmatpush2.msra.mxu0 %v333_v39  ;;  %640 = vmatpush2.msra.mxu1 %v365_v40  ;;  %v213_v39 = vld [vmem:[%s1317_s10 + $0x120] sm:$0xff]  ;;  %v215_v40 = vld [vmem:[%s1317_s10 + $0x130] sm:$0xff] }
  0x34   : > { %416 = vmatprep.subr.mxu0 %v1042_v2  ;;  %641 = vmatprep.subr.mxu1 %v1042_v2 }
  0x35   : > { %417 = vmatpush2.msra.mxu0 %v332_v41  ;;  %642 = vmatpush2.msra.mxu1 %v364_v42  ;;  %v218_v41 = vld [vmem:[%s1317_s10 + $0x148] sm:$0xff]  ;;  %v220_v42 = vld [vmem:[%s1317_s10 + $0x158] sm:$0xff] }
  0x36   : > { %418 = vmatprep.subr.mxu0 %v1042_v2  ;;  %643 = vmatprep.subr.mxu1 %v1042_v2 }
  0x37   : > { %419 = vmatpush2.msra.mxu0 %v331_v43  ;;  %644 = vmatpush2.msra.mxu1 %v363_v44  ;;  %v217_v43 = vld [vmem:[%s1317_s10 + $0x140] sm:$0xff]  ;;  %v219_v44 = vld [vmem:[%s1317_s10 + $0x150] sm:$0xff] }
  0x38   : > { %420 = vmatprep.subr.mxu0 %v1042_v2  ;;  %645 = vmatprep.subr.mxu1 %v1042_v2 }
  0x39   : > { %421 = vmatpush2.msra.mxu0 %v330_v45  ;;  %646 = vmatpush2.msra.mxu1 %v362_v46  ;;  %v222_v45 = vld [vmem:[%s1317_s10 + $0x168] sm:$0xff]  ;;  %v224_v46 = vld [vmem:[%s1317_s10 + $0x178] sm:$0xff] }
  0x3a   : > { %422 = vmatprep.subr.mxu0 %v1042_v2  ;;  %647 = vmatprep.subr.mxu1 %v1042_v2 }
  0x3b   : > { %423 = vmatpush2.msra.mxu0 %v329_v47  ;;  %648 = vmatpush2.msra.mxu1 %v361_v48  ;;  %v221_v47 = vld [vmem:[%s1317_s10 + $0x160] sm:$0xff]  ;;  %v223_v48 = vld [vmem:[%s1317_s10 + $0x170] sm:$0xff] }
  0x3c   : > { %424 = vmatprep.subr.mxu0 %v1042_v2  ;;  %649 = vmatprep.subr.mxu1 %v1042_v2 }
  0x3d   : > { %425 = vmatpush2.msra.mxu0 %v328_v49  ;;  %650 = vmatpush2.msra.mxu1 %v360_v50  ;;  %v226_v49 = vld [vmem:[%s1317_s10 + $0x188] sm:$0xff]  ;;  %v228_v50 = vld [vmem:[%s1317_s10 + $0x198] sm:$0xff] }
  0x3e   : > { %426 = vmatprep.subr.mxu0 %v1042_v2  ;;  %651 = vmatprep.subr.mxu1 %v1042_v2 }
  0x3f   : > { %427 = vmatpush2.msra.mxu0 %v327_v51  ;;  %652 = vmatpush2.msra.mxu1 %v359_v52  ;;  %v225_v51 = vld [vmem:[%s1317_s10 + $0x180] sm:$0xff]  ;;  %v227_v52 = vld [vmem:[%s1317_s10 + $0x190] sm:$0xff] }
  0x40   : > { %428 = vmatprep.subr.mxu0 %v1042_v2  ;;  %653 = vmatprep.subr.mxu1 %v1042_v2 }
  0x41   : > { %429 = vmatpush2.msra.mxu0 %v326_v53  ;;  %654 = vmatpush2.msra.mxu1 %v358_v54  ;;  %v230_v53 = vld [vmem:[%s1317_s10 + $0x1a8] sm:$0xff]  ;;  %v232_v54 = vld [vmem:[%s1317_s10 + $0x1b8] sm:$0xff] }
  0x42   : > { %430 = vmatprep.subr.mxu0 %v1042_v2  ;;  %655 = vmatprep.subr.mxu1 %v1042_v2 }
  0x43   : > { %431 = vmatpush2.msra.mxu0 %v325_v55  ;;  %656 = vmatpush2.msra.mxu1 %v357_v56  ;;  %v229_v55 = vld [vmem:[%s1317_s10 + $0x1a0] sm:$0xff]  ;;  %v231_v56 = vld [vmem:[%s1317_s10 + $0x1b0] sm:$0xff] }
  0x44   : > { %432 = vmatprep.subr.mxu0 %v1042_v2  ;;  %657 = vmatprep.subr.mxu1 %v1042_v2 }
  0x45   : > { %433 = vmatpush2.msra.mxu0 %v324_v57  ;;  %658 = vmatpush2.msra.mxu1 %v356_v58  ;;  %v234_v57 = vld [vmem:[%s1317_s10 + $0x1c8] sm:$0xff]  ;;  %v236_v58 = vld [vmem:[%s1317_s10 + $0x1d8] sm:$0xff] }
  0x46   : > { %434 = vmatprep.subr.mxu0 %v1042_v2  ;;  %659 = vmatprep.subr.mxu1 %v1042_v2 }
  0x47   : > { %435 = vmatpush2.msra.mxu0 %v323_v59  ;;  %660 = vmatpush2.msra.mxu1 %v355_v60  ;;  %v233_v59 = vld [vmem:[%s1317_s10 + $0x1c0] sm:$0xff]  ;;  %v235_v60 = vld [vmem:[%s1317_s10 + $0x1d0] sm:$0xff] }
  0x48   : > { %436 = vmatprep.subr.mxu0 %v1042_v2  ;;  %661 = vmatprep.subr.mxu1 %v1042_v2 }
  0x49   : > { %437 = vmatpush2.msra.mxu0 %v322_v61  ;;  %662 = vmatpush2.msra.mxu1 %v354_v62  ;;  %v238_v61 = vld [vmem:[%s1317_s10 + $0x1e8] sm:$0xff]  ;;  %v240_v62 = vld [vmem:[%s1317_s10 + $0x1f8] sm:$0xff] }
  0x4a   : > { %438 = vmatprep.subr.mxu0 %v1042_v2  ;;  %663 = vmatprep.subr.mxu1 %v1042_v2  ;;  %v183_v2 = vld [vmem:[%s1317_s10 + $0x30] sm:$0xff] }
  0x4b   : > { %439 = vmatpush2.msra.mxu0 %v321_v63  ;;  %440 = vmatprep.mubr.f32.mxu0 %v178_v0  ;;  %v237_v63 = vld [vmem:[%s1317_s10 + $0x1e0] sm:$0xff]  ;;  %v239_v0 = vld [vmem:[%s1317_s10 + $0x1f0] sm:$0xff] }
  0x4c   : > { %664 = vmatpush2.msra.mxu1 %v353_v1  ;;  %665 = vmatprep.mubr.f32.mxu1 %v180_v3  ;;  %v242_v1 = vld [vmem:[%s1317_s10 + $0x208] sm:$0xff]  ;;  %v244_v3 = vld [vmem:[%s1317_s10 + $0x218] sm:$0xff] }
  0x4d   : > { %441 = vmatmul.mubr.f32.vlgmr.msra.gmra.mxu0 %v177_v4  ;;  %666 = vmatmul.mubr.f32.vlgmr.msra.gmra.mxu1 %v179_v5  ;;  %v241_v4 = vld [vmem:[%s1317_s10 + $0x200] sm:$0xff]  ;;  %v243_v5 = vld [vmem:[%s1317_s10 + $0x210] sm:$0xff] }
  0x4e   : > { %445 = vmatprep.mubr.f32.mxu0 %v182_v6  ;;  %670 = vmatprep.mubr.f32.mxu1 %v184_v7  ;;  %v246_v6 = vld [vmem:[%s1317_s10 + $0x228] sm:$0xff]  ;;  %v248_v7 = vld [vmem:[%s1317_s10 + $0x238] sm:$0xff] }
  0x51   : > { %446 = vmatmul.mubr.f32.gmra.mxu0 %v181_v8  ;;  %671 = vmatmul.mubr.f32.gmra.mxu1 %v183_v2  ;;  %v245_v8 = vld [vmem:[%s1317_s10 + $0x220] sm:$0xff]  ;;  %v247_v2 = vld [vmem:[%s1317_s10 + $0x230] sm:$0xff] }
  0x52   : > { %450 = vmatprep.mubr.f32.mxu0 %v186_v9  ;;  %675 = vmatprep.mubr.f32.mxu1 %v188_v10  ;;  %v250_v9 = vld [vmem:[%s1317_s10 + $0x248] sm:$0xff]  ;;  %v252_v10 = vld [vmem:[%s1317_s10 + $0x258] sm:$0xff] }
  0x55   : > { %451 = vmatmul.mubr.f32.gmra.mxu0 %v185_v11  ;;  %676 = vmatmul.mubr.f32.gmra.mxu1 %v187_v12  ;;  %v249_v11 = vld [vmem:[%s1317_s10 + $0x240] sm:$0xff]  ;;  %v251_v12 = vld [vmem:[%s1317_s10 + $0x250] sm:$0xff] }
  0x56   : > { %455 = vmatprep.mubr.f32.mxu0 %v190_v13  ;;  %680 = vmatprep.mubr.f32.mxu1 %v192_v14  ;;  %v254_v13 = vld [vmem:[%s1317_s10 + $0x268] sm:$0xff]  ;;  %v256_v14 = vld [vmem:[%s1317_s10 + $0x278] sm:$0xff] }
  0x59   : > { %456 = vmatmul.mubr.f32.gmra.mxu0 %v189_v15  ;;  %681 = vmatmul.mubr.f32.gmra.mxu1 %v191_v16  ;;  %v253_v15 = vld [vmem:[%s1317_s10 + $0x260] sm:$0xff]  ;;  %v255_v16 = vld [vmem:[%s1317_s10 + $0x270] sm:$0xff] }
  0x5a   : > { %460 = vmatprep.mubr.f32.mxu0 %v194_v17  ;;  %685 = vmatprep.mubr.f32.mxu1 %v196_v18  ;;  %v258_v17 = vld [vmem:[%s1317_s10 + $0x288] sm:$0xff]  ;;  %v260_v18 = vld [vmem:[%s1317_s10 + $0x298] sm:$0xff] }
  0x5d   : > { %461 = vmatmul.mubr.f32.gmra.mxu0 %v193_v19  ;;  %686 = vmatmul.mubr.f32.gmra.mxu1 %v195_v20  ;;  %v257_v19 = vld [vmem:[%s1317_s10 + $0x280] sm:$0xff]  ;;  %v259_v20 = vld [vmem:[%s1317_s10 + $0x290] sm:$0xff] }
  0x5e   : > { %465 = vmatprep.mubr.f32.mxu0 %v198_v21  ;;  %690 = vmatprep.mubr.f32.mxu1 %v200_v22  ;;  %v262_v21 = vld [vmem:[%s1317_s10 + $0x2a8] sm:$0xff]  ;;  %v264_v22 = vld [vmem:[%s1317_s10 + $0x2b8] sm:$0xff] }
  0x61   : > { %466 = vmatmul.mubr.f32.gmra.mxu0 %v197_v23  ;;  %691 = vmatmul.mubr.f32.gmra.mxu1 %v199_v24  ;;  %v261_v23 = vld [vmem:[%s1317_s10 + $0x2a0] sm:$0xff]  ;;  %v263_v24 = vld [vmem:[%s1317_s10 + $0x2b0] sm:$0xff] }
  0x62   : > { %470 = vmatprep.mubr.f32.mxu0 %v202_v25  ;;  %695 = vmatprep.mubr.f32.mxu1 %v204_v26  ;;  %v266_v25 = vld [vmem:[%s1317_s10 + $0x2c8] sm:$0xff]  ;;  %v268_v26 = vld [vmem:[%s1317_s10 + $0x2d8] sm:$0xff] }
  0x65   : > { %471 = vmatmul.mubr.f32.gmra.mxu0 %v201_v27  ;;  %696 = vmatmul.mubr.f32.gmra.mxu1 %v203_v28  ;;  %v265_v27 = vld [vmem:[%s1317_s10 + $0x2c0] sm:$0xff]  ;;  %v267_v28 = vld [vmem:[%s1317_s10 + $0x2d0] sm:$0xff] }
  0x66   : > { %475 = vmatprep.mubr.f32.mxu0 %v206_v29  ;;  %700 = vmatprep.mubr.f32.mxu1 %v208_v30  ;;  %v270_v29 = vld [vmem:[%s1317_s10 + $0x2e8] sm:$0xff]  ;;  %v272_v30 = vld [vmem:[%s1317_s10 + $0x2f8] sm:$0xff] }
  0x69   : > { %476 = vmatmul.mubr.f32.gmra.mxu0 %v205_v31  ;;  %701 = vmatmul.mubr.f32.gmra.mxu1 %v207_v32  ;;  %v269_v31 = vld [vmem:[%s1317_s10 + $0x2e0] sm:$0xff]  ;;  %v271_v32 = vld [vmem:[%s1317_s10 + $0x2f0] sm:$0xff] }
  0x6a   : > { %480 = vmatprep.mubr.f32.mxu0 %v210_v33  ;;  %705 = vmatprep.mubr.f32.mxu1 %v212_v34  ;;  %v274_v33 = vld [vmem:[%s1317_s10 + $0x308] sm:$0xff]  ;;  %v276_v34 = vld [vmem:[%s1317_s10 + $0x318] sm:$0xff] }
  0x6d   : > { %481 = vmatmul.mubr.f32.gmra.mxu0 %v209_v35  ;;  %706 = vmatmul.mubr.f32.gmra.mxu1 %v211_v36  ;;  %v273_v35 = vld [vmem:[%s1317_s10 + $0x300] sm:$0xff]  ;;  %v275_v36 = vld [vmem:[%s1317_s10 + $0x310] sm:$0xff] }
  0x6e   : > { %485 = vmatprep.mubr.f32.mxu0 %v214_v37  ;;  %710 = vmatprep.mubr.f32.mxu1 %v216_v38  ;;  %v278_v37 = vld [vmem:[%s1317_s10 + $0x328] sm:$0xff]  ;;  %v280_v38 = vld [vmem:[%s1317_s10 + $0x338] sm:$0xff] }
  0x71   : > { %486 = vmatmul.mubr.f32.gmra.mxu0 %v213_v39  ;;  %711 = vmatmul.mubr.f32.gmra.mxu1 %v215_v40  ;;  %v277_v39 = vld [vmem:[%s1317_s10 + $0x320] sm:$0xff]  ;;  %v279_v40 = vld [vmem:[%s1317_s10 + $0x330] sm:$0xff] }
  0x72   : > { %490 = vmatprep.mubr.f32.mxu0 %v218_v41  ;;  %715 = vmatprep.mubr.f32.mxu1 %v220_v42  ;;  %v282_v41 = vld [vmem:[%s1317_s10 + $0x348] sm:$0xff]  ;;  %v284_v42 = vld [vmem:[%s1317_s10 + $0x358] sm:$0xff] }
  0x75   : > { %491 = vmatmul.mubr.f32.gmra.mxu0 %v217_v43  ;;  %716 = vmatmul.mubr.f32.gmra.mxu1 %v219_v44  ;;  %v281_v43 = vld [vmem:[%s1317_s10 + $0x340] sm:$0xff]  ;;  %v283_v44 = vld [vmem:[%s1317_s10 + $0x350] sm:$0xff] }
  0x76   : > { %495 = vmatprep.mubr.f32.mxu0 %v222_v45  ;;  %720 = vmatprep.mubr.f32.mxu1 %v224_v46  ;;  %v286_v45 = vld [vmem:[%s1317_s10 + $0x368] sm:$0xff]  ;;  %v288_v46 = vld [vmem:[%s1317_s10 + $0x378] sm:$0xff] }
  0x79   : > { %496 = vmatmul.mubr.f32.gmra.mxu0 %v221_v47  ;;  %721 = vmatmul.mubr.f32.gmra.mxu1 %v223_v48  ;;  %v285_v47 = vld [vmem:[%s1317_s10 + $0x360] sm:$0xff]  ;;  %v287_v48 = vld [vmem:[%s1317_s10 + $0x370] sm:$0xff] }
  0x7a   : > { %500 = vmatprep.mubr.f32.mxu0 %v226_v49  ;;  %725 = vmatprep.mubr.f32.mxu1 %v228_v50  ;;  %v290_v49 = vld [vmem:[%s1317_s10 + $0x388] sm:$0xff]  ;;  %v292_v50 = vld [vmem:[%s1317_s10 + $0x398] sm:$0xff] }
  0x7d   : > { %501 = vmatmul.mubr.f32.gmra.mxu0 %v225_v51  ;;  %726 = vmatmul.mubr.f32.gmra.mxu1 %v227_v52  ;;  %v289_v51 = vld [vmem:[%s1317_s10 + $0x380] sm:$0xff]  ;;  %v291_v52 = vld [vmem:[%s1317_s10 + $0x390] sm:$0xff] }
  0x7e   : > { %505 = vmatprep.mubr.f32.mxu0 %v230_v53  ;;  %730 = vmatprep.mubr.f32.mxu1 %v232_v54  ;;  %v294_v53 = vld [vmem:[%s1317_s10 + $0x3a8] sm:$0xff]  ;;  %v296_v54 = vld [vmem:[%s1317_s10 + $0x3b8] sm:$0xff] }
  0x81   : > { %506 = vmatmul.mubr.f32.gmra.mxu0 %v229_v55  ;;  %731 = vmatmul.mubr.f32.gmra.mxu1 %v231_v56  ;;  %v293_v55 = vld [vmem:[%s1317_s10 + $0x3a0] sm:$0xff]  ;;  %v295_v56 = vld [vmem:[%s1317_s10 + $0x3b0] sm:$0xff] }
  0x82   : > { %510 = vmatprep.mubr.f32.mxu0 %v234_v57  ;;  %735 = vmatprep.mubr.f32.mxu1 %v236_v58  ;;  %v298_v57 = vld [vmem:[%s1317_s10 + $0x3c8] sm:$0xff]  ;;  %v300_v58 = vld [vmem:[%s1317_s10 + $0x3d8] sm:$0xff] }
  0x85   : > { %511 = vmatmul.mubr.f32.gmra.mxu0 %v233_v59  ;;  %736 = vmatmul.mubr.f32.gmra.mxu1 %v235_v60  ;;  %v297_v59 = vld [vmem:[%s1317_s10 + $0x3c0] sm:$0xff]  ;;  %v299_v60 = vld [vmem:[%s1317_s10 + $0x3d0] sm:$0xff] }
  0x86   : > { %515 = vmatprep.mubr.f32.mxu0 %v238_v61  ;;  %740 = vmatprep.mubr.f32.mxu1 %v240_v62  ;;  %v302_v61 = vld [vmem:[%s1317_s10 + $0x3e8] sm:$0xff]  ;;  %v304_v62 = vld [vmem:[%s1317_s10 + $0x3f8] sm:$0xff] }
  0x89   : > { %516 = vmatmul.mubr.f32.gmra.mxu0 %v237_v63  ;;  %741 = vmatmul.mubr.f32.gmra.mxu1 %v239_v0  ;;  %v301_v63 = vld [vmem:[%s1317_s10 + $0x3e0] sm:$0xff]  ;;  %v303_v0 = vld [vmem:[%s1317_s10 + $0x3f0] sm:$0xff] }
  0x8a   : > { %520 = vmatprep.mubr.f32.mxu0 %v242_v1  ;;  %745 = vmatprep.mubr.f32.mxu1 %v244_v3  ;;  %v1468_v1 = vld [vmem:[%s1577_s2] ss:$0 sm:$0xff] }
  0x8d   : > { %521 = vmatmul.mubr.f32.gmra.mxu0 %v241_v4  ;;  %746 = vmatmul.mubr.f32.gmra.mxu1 %v243_v5 }
  0x8e   : > { %525 = vmatprep.mubr.f32.mxu0 %v246_v6  ;;  %750 = vmatprep.mubr.f32.mxu1 %v248_v7 }
  0x91   : > { %526 = vmatmul.mubr.f32.gmra.mxu0 %v245_v8  ;;  %751 = vmatmul.mubr.f32.gmra.mxu1 %v247_v2 }
  0x92   : > { %530 = vmatprep.mubr.f32.mxu0 %v250_v9  ;;  %755 = vmatprep.mubr.f32.mxu1 %v252_v10 }
  0x95   : > { %531 = vmatmul.mubr.f32.gmra.mxu0 %v249_v11  ;;  %756 = vmatmul.mubr.f32.gmra.mxu1 %v251_v12 }
  0x96   : > { %535 = vmatprep.mubr.f32.mxu0 %v254_v13  ;;  %760 = vmatprep.mubr.f32.mxu1 %v256_v14 }
  0x99   : > { %536 = vmatmul.mubr.f32.gmra.mxu0 %v253_v15  ;;  %761 = vmatmul.mubr.f32.gmra.mxu1 %v255_v16 }
  0x9a   : > { %540 = vmatprep.mubr.f32.mxu0 %v258_v17  ;;  %765 = vmatprep.mubr.f32.mxu1 %v260_v18 }
  0x9d   : > { %541 = vmatmul.mubr.f32.gmra.mxu0 %v257_v19  ;;  %766 = vmatmul.mubr.f32.gmra.mxu1 %v259_v20 }
  0x9e   : > { %545 = vmatprep.mubr.f32.mxu0 %v262_v21  ;;  %770 = vmatprep.mubr.f32.mxu1 %v264_v22 }
  0xa1   : > { %546 = vmatmul.mubr.f32.gmra.mxu0 %v261_v23  ;;  %771 = vmatmul.mubr.f32.gmra.mxu1 %v263_v24 }
  0xa2   : > { %550 = vmatprep.mubr.f32.mxu0 %v266_v25  ;;  %775 = vmatprep.mubr.f32.mxu1 %v268_v26 }
  0xa5   : > { %551 = vmatmul.mubr.f32.gmra.mxu0 %v265_v27  ;;  %776 = vmatmul.mubr.f32.gmra.mxu1 %v267_v28 }
  0xa6   : > { %555 = vmatprep.mubr.f32.mxu0 %v270_v29  ;;  %780 = vmatprep.mubr.f32.mxu1 %v272_v30 }
  0xa9   : > { %556 = vmatmul.mubr.f32.gmra.mxu0 %v269_v31  ;;  %781 = vmatmul.mubr.f32.gmra.mxu1 %v271_v32 }
  0xaa   : > { %560 = vmatprep.mubr.f32.mxu0 %v274_v33  ;;  %785 = vmatprep.mubr.f32.mxu1 %v276_v34 }
  0xad   : > { %561 = vmatmul.mubr.f32.gmra.mxu0 %v273_v35  ;;  %786 = vmatmul.mubr.f32.gmra.mxu1 %v275_v36 }
  0xae   : > { %565 = vmatprep.mubr.f32.mxu0 %v278_v37  ;;  %790 = vmatprep.mubr.f32.mxu1 %v280_v38 }
  0xb1   : > { %566 = vmatmul.mubr.f32.gmra.mxu0 %v277_v39  ;;  %791 = vmatmul.mubr.f32.gmra.mxu1 %v279_v40 }
  0xb2   : > { %570 = vmatprep.mubr.f32.mxu0 %v282_v41  ;;  %795 = vmatprep.mubr.f32.mxu1 %v284_v42 }
  0xb5   : > { %571 = vmatmul.mubr.f32.gmra.mxu0 %v281_v43  ;;  %796 = vmatmul.mubr.f32.gmra.mxu1 %v283_v44 }
  0xb6   : > { %575 = vmatprep.mubr.f32.mxu0 %v286_v45  ;;  %800 = vmatprep.mubr.f32.mxu1 %v288_v46 }
  0xb9   : > { %576 = vmatmul.mubr.f32.gmra.mxu0 %v285_v47  ;;  %801 = vmatmul.mubr.f32.gmra.mxu1 %v287_v48 }
  0xba   : > { %580 = vmatprep.mubr.f32.mxu0 %v290_v49  ;;  %805 = vmatprep.mubr.f32.mxu1 %v292_v50 }
  0xbd   : > { %581 = vmatmul.mubr.f32.gmra.mxu0 %v289_v51  ;;  %806 = vmatmul.mubr.f32.gmra.mxu1 %v291_v52 }
  0xbe   : > { %585 = vmatprep.mubr.f32.mxu0 %v294_v53  ;;  %810 = vmatprep.mubr.f32.mxu1 %v296_v54 }
  0xc1   : > { %586 = vmatmul.mubr.f32.gmra.mxu0 %v293_v55  ;;  %811 = vmatmul.mubr.f32.gmra.mxu1 %v295_v56 }
  0xc2   : > { %590 = vmatprep.mubr.f32.mxu0 %v298_v57  ;;  %815 = vmatprep.mubr.f32.mxu1 %v300_v58 }
  0xc5   : > { %591 = vmatmul.mubr.f32.gmra.mxu0 %v297_v59  ;;  %816 = vmatmul.mubr.f32.gmra.mxu1 %v299_v60 }
  0xc6   : > { %595 = vmatprep.mubr.f32.mxu0 %v302_v61  ;;  %820 = vmatprep.mubr.f32.mxu1 %v304_v62 }
  0xc9   : > { %596 = vmatmul.mubr.f32.gmra.mxu0 %v301_v63  ;;  %821 = vmatmul.mubr.f32.gmra.mxu1 %v303_v0 }
 0x10d   : > { %v442_v3 = vpop.f32.mrf.mxu0  ;;  %v667_v4 = vpop.f32.mrf.mxu1 }
 0x10e   : > { %v443_v5 = vadd.f32 %v1468_v1, %v442_v3 }
 0x10f   : > { %v444_v6 = vpop.f32.mrf.mxu0  ;;  %v669_v7 = vpop.f32.mrf.mxu1 }
 0x110   : > { %v668_v8 = vadd.f32 %v667_v4, %v443_v5 }
 0x111   : > { %v447_v2 = vpop.f32.mrf.mxu0  ;;  %v672_v9 = vpop.f32.mrf.mxu1 }
 0x112   : > { %vm826_vm0 = vcmp.ge.f32.partialorder %v668_v8, 0.0  ;;  %v858_v10 = vmul.f32 0.1, %v668_v8  ;;  %v448_v11 = vadd.f32 %v1468_v1, %v447_v2 }
 0x113   : > { %v449_v12 = vpop.f32.mrf.mxu0  ;;  %v674_v13 = vpop.f32.mrf.mxu1 }
 0x114   : > { %v890_v14 = vsel %vm826_vm0, %v668_v8, %v858_v10  ;;  %v673_v15 = vadd.f32 %v672_v9, %v448_v11 }
 0x115   : > { %923 = vst.msk [vmem:[%s1475_s26] sm:$0xff] %vm922_vm1, %v890_v14  ;;  %v452_v16 = vpop.f32.mrf.mxu0  ;;  %v677_v17 = vpop.f32.mrf.mxu1 }
 0x116   : > { %vm827_vm2 = vcmp.ge.f32.partialorder %v673_v15, 0.0  ;;  %v859_v18 = vmul.f32 0.1, %v673_v15  ;;  %v453_v19 = vadd.f32 %v1468_v1, %v452_v16 }
 0x117   : > { %v454_v20 = vpop.f32.mrf.mxu0  ;;  %v679_v21 = vpop.f32.mrf.mxu1 }
 0x118   : > { %v891_v22 = vsel %vm827_vm2, %v673_v15, %v859_v18  ;;  %v678_v23 = vadd.f32 %v677_v17, %v453_v19 }
 0x119   : > { %924 = vst.msk [vmem:[%s1475_s26 + $0x8] sm:$0xff] %vm922_vm1, %v891_v22  ;;  %v457_v24 = vpop.f32.mrf.mxu0  ;;  %v682_v25 = vpop.f32.mrf.mxu1 }
 0x11a   : > { %vm828_vm3 = vcmp.ge.f32.partialorder %v678_v23, 0.0  ;;  %v860_v26 = vmul.f32 0.1, %v678_v23  ;;  %v458_v27 = vadd.f32 %v1468_v1, %v457_v24 }
 0x11b   : > { %v459_v28 = vpop.f32.mrf.mxu0  ;;  %v684_v29 = vpop.f32.mrf.mxu1 }
 0x11c   : > { %v892_v30 = vsel %vm828_vm3, %v678_v23, %v860_v26  ;;  %v683_v31 = vadd.f32 %v682_v25, %v458_v27 }
 0x11d   : > { %925 = vst.msk [vmem:[%s1475_s26 + $0x10] sm:$0xff] %vm922_vm1, %v892_v30  ;;  %v462_v32 = vpop.f32.mrf.mxu0  ;;  %v687_v33 = vpop.f32.mrf.mxu1 }
 0x11e   : > { %vm829_vm4 = vcmp.ge.f32.partialorder %v683_v31, 0.0  ;;  %v861_v34 = vmul.f32 0.1, %v683_v31  ;;  %v463_v35 = vadd.f32 %v1468_v1, %v462_v32 }
 0x11f   : > { %v464_v36 = vpop.f32.mrf.mxu0  ;;  %v689_v37 = vpop.f32.mrf.mxu1 }
 0x120   : > { %v893_v38 = vsel %vm829_vm4, %v683_v31, %v861_v34  ;;  %v688_v39 = vadd.f32 %v687_v33, %v463_v35 }
 0x121   : > { %926 = vst.msk [vmem:[%s1475_s26 + $0x18] sm:$0xff] %vm922_vm1, %v893_v38  ;;  %v467_v40 = vpop.f32.mrf.mxu0  ;;  %v692_v41 = vpop.f32.mrf.mxu1 }
 0x122   : > { %vm830_vm5 = vcmp.ge.f32.partialorder %v688_v39, 0.0  ;;  %v862_v42 = vmul.f32 0.1, %v688_v39  ;;  %v468_v43 = vadd.f32 %v1468_v1, %v467_v40 }
 0x123   : > { %v469_v44 = vpop.f32.mrf.mxu0  ;;  %v694_v45 = vpop.f32.mrf.mxu1 }
 0x124   : > { %v894_v46 = vsel %vm830_vm5, %v688_v39, %v862_v42  ;;  %v693_v47 = vadd.f32 %v692_v41, %v468_v43 }
 0x125   : > { %927 = vst.msk [vmem:[%s1475_s26 + $0x20] sm:$0xff] %vm922_vm1, %v894_v46  ;;  %v472_v48 = vpop.f32.mrf.mxu0  ;;  %v697_v49 = vpop.f32.mrf.mxu1 }
 0x126   : > { %vm831_vm6 = vcmp.ge.f32.partialorder %v693_v47, 0.0  ;;  %v863_v50 = vmul.f32 0.1, %v693_v47  ;;  %v473_v51 = vadd.f32 %v1468_v1, %v472_v48 }
 0x127   : > { %v474_v52 = vpop.f32.mrf.mxu0  ;;  %v699_v53 = vpop.f32.mrf.mxu1 }
 0x128   : > { %v895_v54 = vsel %vm831_vm6, %v693_v47, %v863_v50  ;;  %v698_v55 = vadd.f32 %v697_v49, %v473_v51 }
 0x129   : > { %928 = vst.msk [vmem:[%s1475_s26 + $0x28] sm:$0xff] %vm922_vm1, %v895_v54  ;;  %v477_v56 = vpop.f32.mrf.mxu0  ;;  %v702_v57 = vpop.f32.mrf.mxu1 }
 0x12a   : > { %vm832_vm7 = vcmp.ge.f32.partialorder %v698_v55, 0.0  ;;  %v864_v58 = vmul.f32 0.1, %v698_v55  ;;  %v478_v59 = vadd.f32 %v1468_v1, %v477_v56 }
 0x12b   : > { %v479_v60 = vpop.f32.mrf.mxu0  ;;  %v704_v61 = vpop.f32.mrf.mxu1 }
 0x12c   : > { %v896_v62 = vsel %vm832_vm7, %v698_v55, %v864_v58  ;;  %v703_v63 = vadd.f32 %v702_v57, %v478_v59 }
 0x12d   : > { %929 = vst.msk [vmem:[%s1475_s26 + $0x30] sm:$0xff] %vm922_vm1, %v896_v62  ;;  %v482_v0 = vpop.f32.mrf.mxu0  ;;  %v707_v3 = vpop.f32.mrf.mxu1 }
 0x12e   : > { %vm833_vm8 = vcmp.ge.f32.partialorder %v703_v63, 0.0  ;;  %v865_v4 = vmul.f32 0.1, %v703_v63  ;;  %v483_v5 = vadd.f32 %v1468_v1, %v482_v0 }
 0x12f   : > { %v484_v6 = vpop.f32.mrf.mxu0  ;;  %v709_v7 = vpop.f32.mrf.mxu1 }
 0x130   : > { %v897_v8 = vsel %vm833_vm8, %v703_v63, %v865_v4  ;;  %v708_v2 = vadd.f32 %v707_v3, %v483_v5 }
 0x131   : > { %930 = vst.msk [vmem:[%s1475_s26 + $0x38] sm:$0xff] %vm922_vm1, %v897_v8  ;;  %v487_v9 = vpop.f32.mrf.mxu0  ;;  %v712_v10 = vpop.f32.mrf.mxu1 }
 0x132   : > { %vm834_vm9 = vcmp.ge.f32.partialorder %v708_v2, 0.0  ;;  %v866_v11 = vmul.f32 0.1, %v708_v2  ;;  %v488_v12 = vadd.f32 %v1468_v1, %v487_v9 }
 0x133   : > { %v489_v13 = vpop.f32.mrf.mxu0  ;;  %v714_v14 = vpop.f32.mrf.mxu1 }
 0x134   : > { %v898_v15 = vsel %vm834_vm9, %v708_v2, %v866_v11  ;;  %v713_v16 = vadd.f32 %v712_v10, %v488_v12 }
 0x135   : > { %931 = vst.msk [vmem:[%s1475_s26 + $0x40] sm:$0xff] %vm922_vm1, %v898_v15  ;;  %v492_v17 = vpop.f32.mrf.mxu0  ;;  %v717_v18 = vpop.f32.mrf.mxu1 }
 0x136   : > { %vm835_vm10 = vcmp.ge.f32.partialorder %v713_v16, 0.0  ;;  %v867_v19 = vmul.f32 0.1, %v713_v16  ;;  %v493_v20 = vadd.f32 %v1468_v1, %v492_v17 }
 0x137   : > { %v494_v21 = vpop.f32.mrf.mxu0  ;;  %v719_v22 = vpop.f32.mrf.mxu1 }
 0x138   : > { %v899_v23 = vsel %vm835_vm10, %v713_v16, %v867_v19  ;;  %v718_v24 = vadd.f32 %v717_v18, %v493_v20 }
 0x139   : > { %932 = vst.msk [vmem:[%s1475_s26 + $0x48] sm:$0xff] %vm922_vm1, %v899_v23  ;;  %v497_v25 = vpop.f32.mrf.mxu0  ;;  %v722_v26 = vpop.f32.mrf.mxu1 }
 0x13a   : > { %vm836_vm11 = vcmp.ge.f32.partialorder %v718_v24, 0.0  ;;  %v868_v27 = vmul.f32 0.1, %v718_v24  ;;  %v498_v28 = vadd.f32 %v1468_v1, %v497_v25 }
 0x13b   : > { %v499_v29 = vpop.f32.mrf.mxu0  ;;  %v724_v30 = vpop.f32.mrf.mxu1 }
 0x13c   : > { %v900_v31 = vsel %vm836_vm11, %v718_v24, %v868_v27  ;;  %v723_v32 = vadd.f32 %v722_v26, %v498_v28 }
 0x13d   : > { %933 = vst.msk [vmem:[%s1475_s26 + $0x50] sm:$0xff] %vm922_vm1, %v900_v31  ;;  %v502_v33 = vpop.f32.mrf.mxu0  ;;  %v727_v34 = vpop.f32.mrf.mxu1 }
 0x13e   : > { %vm837_vm12 = vcmp.ge.f32.partialorder %v723_v32, 0.0  ;;  %v869_v35 = vmul.f32 0.1, %v723_v32  ;;  %v503_v36 = vadd.f32 %v1468_v1, %v502_v33 }
 0x13f   : > { %v504_v37 = vpop.f32.mrf.mxu0  ;;  %v729_v38 = vpop.f32.mrf.mxu1 }
 0x140   : > { %v901_v39 = vsel %vm837_vm12, %v723_v32, %v869_v35  ;;  %v728_v40 = vadd.f32 %v727_v34, %v503_v36 }
 0x141   : > { %934 = vst.msk [vmem:[%s1475_s26 + $0x58] sm:$0xff] %vm922_vm1, %v901_v39  ;;  %v507_v41 = vpop.f32.mrf.mxu0  ;;  %v732_v42 = vpop.f32.mrf.mxu1 }
 0x142   : > { %vm838_vm13 = vcmp.ge.f32.partialorder %v728_v40, 0.0  ;;  %v870_v43 = vmul.f32 0.1, %v728_v40  ;;  %v508_v44 = vadd.f32 %v1468_v1, %v507_v41 }
 0x143   : > { %v509_v45 = vpop.f32.mrf.mxu0  ;;  %v734_v46 = vpop.f32.mrf.mxu1 }
 0x144   : > { %v902_v47 = vsel %vm838_vm13, %v728_v40, %v870_v43  ;;  %v733_v48 = vadd.f32 %v732_v42, %v508_v44 }
 0x145   : > { %935 = vst.msk [vmem:[%s1475_s26 + $0x60] sm:$0xff] %vm922_vm1, %v902_v47  ;;  %v512_v49 = vpop.f32.mrf.mxu0  ;;  %v737_v50 = vpop.f32.mrf.mxu1 }
 0x146   : > { %vm839_vm14 = vcmp.ge.f32.partialorder %v733_v48, 0.0  ;;  %v871_v51 = vmul.f32 0.1, %v733_v48  ;;  %v513_v52 = vadd.f32 %v1468_v1, %v512_v49 }
 0x147   : > { %v514_v53 = vpop.f32.mrf.mxu0  ;;  %v739_v54 = vpop.f32.mrf.mxu1 }
 0x148   : > { %v903_v55 = vsel %vm839_vm14, %v733_v48, %v871_v51  ;;  %v738_v56 = vadd.f32 %v737_v50, %v513_v52 }
 0x149   : > { %936 = vst.msk [vmem:[%s1475_s26 + $0x68] sm:$0xff] %vm922_vm1, %v903_v55  ;;  %v517_v57 = vpop.f32.mrf.mxu0  ;;  %v742_v58 = vpop.f32.mrf.mxu1 }
 0x14a   : > { %vm840_vm15 = vcmp.ge.f32.partialorder %v738_v56, 0.0  ;;  %v872_v59 = vmul.f32 0.1, %v738_v56  ;;  %v518_v60 = vadd.f32 %v1468_v1, %v517_v57 }
 0x14b   : > { %v519_v61 = vpop.f32.mrf.mxu0  ;;  %v744_v62 = vpop.f32.mrf.mxu1 }
 0x14c   : > { %v904_v63 = vsel %vm840_vm15, %v738_v56, %v872_v59  ;;  %v743_v0 = vadd.f32 %v742_v58, %v518_v60 }
 0x14d   : > { %937 = vst.msk [vmem:[%s1475_s26 + $0x70] sm:$0xff] %vm922_vm1, %v904_v63  ;;  %v522_v3 = vpop.f32.mrf.mxu0  ;;  %v747_v4 = vpop.f32.mrf.mxu1 }
 0x14e   : > { %vm841_vm0 = vcmp.ge.f32.partialorder %v743_v0, 0.0  ;;  %v873_v5 = vmul.f32 0.1, %v743_v0  ;;  %v523_v6 = vadd.f32 %v1468_v1, %v522_v3 }
 0x14f   : > { %v524_v7 = vpop.f32.mrf.mxu0  ;;  %v749_v8 = vpop.f32.mrf.mxu1 }
 0x150   : > { %v905_v2 = vsel %vm841_vm0, %v743_v0, %v873_v5  ;;  %v748_v9 = vadd.f32 %v747_v4, %v523_v6 }
 0x151   : > { %938 = vst.msk [vmem:[%s1475_s26 + $0x78] sm:$0xff] %vm922_vm1, %v905_v2  ;;  %v527_v10 = vpop.f32.mrf.mxu0  ;;  %v752_v11 = vpop.f32.mrf.mxu1 }
 0x152   : > { %vm842_vm2 = vcmp.ge.f32.partialorder %v748_v9, 0.0  ;;  %v874_v12 = vmul.f32 0.1, %v748_v9  ;;  %v528_v13 = vadd.f32 %v1468_v1, %v527_v10 }
 0x153   : > { %v529_v14 = vpop.f32.mrf.mxu0  ;;  %v754_v15 = vpop.f32.mrf.mxu1 }
 0x154   : > { %v906_v16 = vsel %vm842_vm2, %v748_v9, %v874_v12  ;;  %v753_v17 = vadd.f32 %v752_v11, %v528_v13 }
 0x155   : > { %939 = vst.msk [vmem:[%s1475_s26 + $0x80] sm:$0xff] %vm922_vm1, %v906_v16  ;;  %v532_v18 = vpop.f32.mrf.mxu0  ;;  %v757_v19 = vpop.f32.mrf.mxu1 }
 0x156   : > { %vm843_vm3 = vcmp.ge.f32.partialorder %v753_v17, 0.0  ;;  %v875_v20 = vmul.f32 0.1, %v753_v17  ;;  %v533_v21 = vadd.f32 %v1468_v1, %v532_v18 }
 0x157   : > { %v534_v22 = vpop.f32.mrf.mxu0  ;;  %v759_v23 = vpop.f32.mrf.mxu1 }
 0x158   : > { %v907_v24 = vsel %vm843_vm3, %v753_v17, %v875_v20  ;;  %v758_v25 = vadd.f32 %v757_v19, %v533_v21 }
 0x159   : > { %940 = vst.msk [vmem:[%s1475_s26 + $0x88] sm:$0xff] %vm922_vm1, %v907_v24  ;;  %v537_v26 = vpop.f32.mrf.mxu0  ;;  %v762_v27 = vpop.f32.mrf.mxu1 }
 0x15a   : > { %vm844_vm4 = vcmp.ge.f32.partialorder %v758_v25, 0.0  ;;  %v876_v28 = vmul.f32 0.1, %v758_v25  ;;  %v538_v29 = vadd.f32 %v1468_v1, %v537_v26 }
 0x15b   : > { %v539_v30 = vpop.f32.mrf.mxu0  ;;  %v764_v31 = vpop.f32.mrf.mxu1 }
 0x15c   : > { %v908_v32 = vsel %vm844_vm4, %v758_v25, %v876_v28  ;;  %v763_v33 = vadd.f32 %v762_v27, %v538_v29 }
 0x15d   : > { %941 = vst.msk [vmem:[%s1475_s26 + $0x90] sm:$0xff] %vm922_vm1, %v908_v32  ;;  %v542_v34 = vpop.f32.mrf.mxu0  ;;  %v767_v35 = vpop.f32.mrf.mxu1 }
 0x15e   : > { %vm845_vm5 = vcmp.ge.f32.partialorder %v763_v33, 0.0  ;;  %v877_v36 = vmul.f32 0.1, %v763_v33  ;;  %v543_v37 = vadd.f32 %v1468_v1, %v542_v34 }
 0x15f   : > { %v544_v38 = vpop.f32.mrf.mxu0  ;;  %v769_v39 = vpop.f32.mrf.mxu1 }
 0x160   : > { %v909_v40 = vsel %vm845_vm5, %v763_v33, %v877_v36  ;;  %v768_v41 = vadd.f32 %v767_v35, %v543_v37 }
 0x161   : > { %942 = vst.msk [vmem:[%s1475_s26 + $0x98] sm:$0xff] %vm922_vm1, %v909_v40  ;;  %v547_v42 = vpop.f32.mrf.mxu0  ;;  %v772_v43 = vpop.f32.mrf.mxu1 }
 0x162   : > { %vm846_vm6 = vcmp.ge.f32.partialorder %v768_v41, 0.0  ;;  %v878_v44 = vmul.f32 0.1, %v768_v41  ;;  %v548_v45 = vadd.f32 %v1468_v1, %v547_v42 }
 0x163   : > { %v549_v46 = vpop.f32.mrf.mxu0  ;;  %v774_v47 = vpop.f32.mrf.mxu1 }
 0x164   : > { %v910_v48 = vsel %vm846_vm6, %v768_v41, %v878_v44  ;;  %v773_v49 = vadd.f32 %v772_v43, %v548_v45 }
 0x165   : > { %943 = vst.msk [vmem:[%s1475_s26 + $0xa0] sm:$0xff] %vm922_vm1, %v910_v48  ;;  %v552_v50 = vpop.f32.mrf.mxu0  ;;  %v777_v51 = vpop.f32.mrf.mxu1 }
 0x166   : > { %vm847_vm7 = vcmp.ge.f32.partialorder %v773_v49, 0.0  ;;  %v879_v52 = vmul.f32 0.1, %v773_v49  ;;  %v553_v53 = vadd.f32 %v1468_v1, %v552_v50 }
 0x167   : > { %v554_v54 = vpop.f32.mrf.mxu0  ;;  %v779_v55 = vpop.f32.mrf.mxu1 }
 0x168   : > { %v911_v56 = vsel %vm847_vm7, %v773_v49, %v879_v52  ;;  %v778_v57 = vadd.f32 %v777_v51, %v553_v53 }
 0x169   : > { %944 = vst.msk [vmem:[%s1475_s26 + $0xa8] sm:$0xff] %vm922_vm1, %v911_v56  ;;  %v557_v58 = vpop.f32.mrf.mxu0  ;;  %v782_v59 = vpop.f32.mrf.mxu1 }
 0x16a   : > { %vm848_vm8 = vcmp.ge.f32.partialorder %v778_v57, 0.0  ;;  %v880_v60 = vmul.f32 0.1, %v778_v57  ;;  %v558_v61 = vadd.f32 %v1468_v1, %v557_v58 }
 0x16b   : > { %v559_v62 = vpop.f32.mrf.mxu0  ;;  %v784_v63 = vpop.f32.mrf.mxu1 }
 0x16c   : > { %v912_v0 = vsel %vm848_vm8, %v778_v57, %v880_v60  ;;  %v783_v3 = vadd.f32 %v782_v59, %v558_v61 }
 0x16d   : > { %945 = vst.msk [vmem:[%s1475_s26 + $0xb0] sm:$0xff] %vm922_vm1, %v912_v0  ;;  %v562_v4 = vpop.f32.mrf.mxu0  ;;  %v787_v5 = vpop.f32.mrf.mxu1 }
 0x16e   : > { %vm849_vm9 = vcmp.ge.f32.partialorder %v783_v3, 0.0  ;;  %v881_v6 = vmul.f32 0.1, %v783_v3  ;;  %v563_v7 = vadd.f32 %v1468_v1, %v562_v4 }
 0x16f   : > { %v564_v8 = vpop.f32.mrf.mxu0  ;;  %v789_v2 = vpop.f32.mrf.mxu1 }
 0x170   : > { %v913_v9 = vsel %vm849_vm9, %v783_v3, %v881_v6  ;;  %v788_v10 = vadd.f32 %v787_v5, %v563_v7 }
 0x171   : > { %946 = vst.msk [vmem:[%s1475_s26 + $0xb8] sm:$0xff] %vm922_vm1, %v913_v9  ;;  %v567_v11 = vpop.f32.mrf.mxu0  ;;  %v792_v12 = vpop.f32.mrf.mxu1 }
 0x172   : > { %vm850_vm10 = vcmp.ge.f32.partialorder %v788_v10, 0.0  ;;  %v882_v13 = vmul.f32 0.1, %v788_v10  ;;  %v568_v14 = vadd.f32 %v1468_v1, %v567_v11 }
 0x173   : > { %v569_v15 = vpop.f32.mrf.mxu0  ;;  %v794_v16 = vpop.f32.mrf.mxu1 }
 0x174   : > { %v914_v17 = vsel %vm850_vm10, %v788_v10, %v882_v13  ;;  %v793_v18 = vadd.f32 %v792_v12, %v568_v14 }
 0x175   : > { %947 = vst.msk [vmem:[%s1475_s26 + $0xc0] sm:$0xff] %vm922_vm1, %v914_v17  ;;  %v572_v19 = vpop.f32.mrf.mxu0  ;;  %v797_v20 = vpop.f32.mrf.mxu1 }
 0x176   : > { %vm851_vm11 = vcmp.ge.f32.partialorder %v793_v18, 0.0  ;;  %v883_v21 = vmul.f32 0.1, %v793_v18  ;;  %v573_v22 = vadd.f32 %v1468_v1, %v572_v19 }
 0x177   : > { %v574_v23 = vpop.f32.mrf.mxu0  ;;  %v799_v24 = vpop.f32.mrf.mxu1 }
 0x178   : > { %v915_v25 = vsel %vm851_vm11, %v793_v18, %v883_v21  ;;  %v798_v26 = vadd.f32 %v797_v20, %v573_v22 }
 0x179   : > { %948 = vst.msk [vmem:[%s1475_s26 + $0xc8] sm:$0xff] %vm922_vm1, %v915_v25  ;;  %v577_v27 = vpop.f32.mrf.mxu0  ;;  %v802_v28 = vpop.f32.mrf.mxu1 }
 0x17a   : > { %vm852_vm12 = vcmp.ge.f32.partialorder %v798_v26, 0.0  ;;  %v884_v29 = vmul.f32 0.1, %v798_v26  ;;  %v578_v30 = vadd.f32 %v1468_v1, %v577_v27 }
 0x17b   : > { %v579_v31 = vpop.f32.mrf.mxu0  ;;  %v804_v32 = vpop.f32.mrf.mxu1 }
 0x17c   : > { %v916_v33 = vsel %vm852_vm12, %v798_v26, %v884_v29  ;;  %v803_v34 = vadd.f32 %v802_v28, %v578_v30 }
 0x17d   : > { %949 = vst.msk [vmem:[%s1475_s26 + $0xd0] sm:$0xff] %vm922_vm1, %v916_v33  ;;  %v582_v35 = vpop.f32.mrf.mxu0  ;;  %v807_v36 = vpop.f32.mrf.mxu1 }
 0x17e   : > { %vm853_vm13 = vcmp.ge.f32.partialorder %v803_v34, 0.0  ;;  %v885_v37 = vmul.f32 0.1, %v803_v34  ;;  %v583_v38 = vadd.f32 %v1468_v1, %v582_v35 }
 0x17f   : > { %v584_v39 = vpop.f32.mrf.mxu0  ;;  %v809_v40 = vpop.f32.mrf.mxu1 }
 0x180   : > { %v917_v41 = vsel %vm853_vm13, %v803_v34, %v885_v37  ;;  %v808_v42 = vadd.f32 %v807_v36, %v583_v38 }
 0x181   : > { %950 = vst.msk [vmem:[%s1475_s26 + $0xd8] sm:$0xff] %vm922_vm1, %v917_v41  ;;  %v587_v43 = vpop.f32.mrf.mxu0  ;;  %v812_v44 = vpop.f32.mrf.mxu1 }
 0x182   : > { %vm854_vm14 = vcmp.ge.f32.partialorder %v808_v42, 0.0  ;;  %v886_v45 = vmul.f32 0.1, %v808_v42  ;;  %v588_v46 = vadd.f32 %v1468_v1, %v587_v43 }
 0x183   : > { %v589_v47 = vpop.f32.mrf.mxu0  ;;  %v814_v48 = vpop.f32.mrf.mxu1 }
 0x184   : > { %v918_v49 = vsel %vm854_vm14, %v808_v42, %v886_v45  ;;  %v813_v50 = vadd.f32 %v812_v44, %v588_v46 }
 0x185   : > { %951 = vst.msk [vmem:[%s1475_s26 + $0xe0] sm:$0xff] %vm922_vm1, %v918_v49  ;;  %v592_v51 = vpop.f32.mrf.mxu0  ;;  %v817_v52 = vpop.f32.mrf.mxu1 }
 0x186   : > { %vm855_vm15 = vcmp.ge.f32.partialorder %v813_v50, 0.0  ;;  %v887_v53 = vmul.f32 0.1, %v813_v50  ;;  %v593_v54 = vadd.f32 %v1468_v1, %v592_v51 }
 0x187   : > { %v594_v55 = vpop.f32.mrf.mxu0  ;;  %v819_v56 = vpop.f32.mrf.mxu1 }
 0x188   : > { %v919_v57 = vsel %vm855_vm15, %v813_v50, %v887_v53  ;;  %v818_v58 = vadd.f32 %v817_v52, %v593_v54 }
 0x189   : > { %952 = vst.msk [vmem:[%s1475_s26 + $0xe8] sm:$0xff] %vm922_vm1, %v919_v57  ;;  %v597_v59 = vpop.f32.mrf.mxu0  ;;  %v822_v60 = vpop.f32.mrf.mxu1 }
 0x18a   : > { %vm856_vm0 = vcmp.ge.f32.partialorder %v818_v58, 0.0  ;;  %v888_v61 = vmul.f32 0.1, %v818_v58  ;;  %v598_v62 = vadd.f32 %v1468_v1, %v597_v59 }
 0x18b   : > { %v599_v63 = vpop.f32.mrf.mxu0  ;;  %v824_v0 = vpop.f32.mrf.mxu1 }
 0x18c   : > { %v920_v3 = vsel %vm856_vm0, %v818_v58, %v888_v61  ;;  %v823_v4 = vadd.f32 %v822_v60, %v598_v62 }
 0x18d   : > { %953 = vst.msk [vmem:[%s1475_s26 + $0xf0] sm:$0xff] %vm922_vm1, %v920_v3 }
 0x18e   : > { %vm857_vm2 = vcmp.ge.f32.partialorder %v823_v4, 0.0  ;;  %v889_v5 = vmul.f32 0.1, %v823_v4 }
 0x190   : > { %v921_v6 = vsel %vm857_vm2, %v823_v4, %v889_v5 }
 0x191   : > { %954 = vst.msk [vmem:[%s1475_s26 + $0xf8] sm:$0xff] %vm922_vm1, %v921_v6 }
 0x192 PF: > { %s13_s12 = sadd.s32 1, %s1040_s12  }
 0x193   : > { %p10_p4 = scmp.ge.s32.totalorder %s13_s12, 4  }
 0x195   :  { %12 = sbr.rel (!%p10_p4) target bundleno = 1 (0x1), region = 62 }

// kernel: encoder_forward.6
= control target key start
LH: loop header
LB: loop body
LE: loop exit
PB: predicated region body
PF: predicated region fallthrough
CT: control target
= control target key end

     0   :  { %vm487_vm0 = vcmask 523264   ;;  %s1158_s1 = inlined_call_operand.vmem [shape: f32[512,64], index: 1, kind: input, shape index: {}]   ;;  %s1159_s0 = inlined_call_operand.vmem [shape: f32[128,512], index: 0, kind: input, shape index: {}]   ;;  %s1160_s2 = inlined_call_operand.vmem [shape: f32[1,64], index: 2, kind: input, shape index: {}]   ;;  %s1161_s3 = inlined_call_operand.vmem [shape: f32[128,64], index: 3, kind: output, shape index: {}]  }
   0x1   :  { %v109_v0 = vld [vmem:[%s1158_s1 + $0xf8] sm:$0xff]  ;;  %v108_v4 = vld [vmem:[%s1158_s1 + $0xf0] sm:$0xff]  ;;  %v107_v8 = vld [vmem:[%s1158_s1 + $0xe8] sm:$0xff] }
   0x2   :  { %v141_v1 = vld [vmem:[%s1158_s1 + $0x1f8] sm:$0xff]  ;;  %509 = vmatprep.subr.mxu0 %v109_v0  ;;  %v140_v5 = vld [vmem:[%s1158_s1 + $0x1f0] sm:$0xff]  ;;  %v139_v9 = vld [vmem:[%s1158_s1 + $0x1e8] sm:$0xff] }
   0x3   :  { %v93_v2 = vld [vmem:[%s1158_s1 + $0x78] sm:$0xff]  ;;  %589 = vmatprep.subr.mxu1 %v141_v1  ;;  %v92_v6 = vld [vmem:[%s1158_s1 + $0x70] sm:$0xff]  ;;  %v91_v10 = vld [vmem:[%s1158_s1 + $0x68] sm:$0xff] }
   0x4   :  { %v125_v3 = vld [vmem:[%s1158_s1 + $0x178] sm:$0xff]  ;;  %510 = vmatpush3.msra.mxu0 %v93_v2  ;;  %v124_v7 = vld [vmem:[%s1158_s1 + $0x170] sm:$0xff]  ;;  %v123_v11 = vld [vmem:[%s1158_s1 + $0x168] sm:$0xff] }
   0x5   :  { %590 = vmatpush3.msra.mxu1 %v125_v3  ;;  %511 = vmatprep.subr.mxu0 %v108_v4  ;;  %v106_v12 = vld [vmem:[%s1158_s1 + $0xe0] sm:$0xff]  ;;  %v105_v16 = vld [vmem:[%s1158_s1 + $0xd8] sm:$0xff]  ;;  %v104_v20 = vld [vmem:[%s1158_s1 + $0xd0] sm:$0xff] }
   0x6   :  { %591 = vmatprep.subr.mxu1 %v140_v5  ;;  %512 = vmatpush3.msra.mxu0 %v92_v6  ;;  %v138_v13 = vld [vmem:[%s1158_s1 + $0x1e0] sm:$0xff]  ;;  %v137_v17 = vld [vmem:[%s1158_s1 + $0x1d8] sm:$0xff]  ;;  %v136_v21 = vld [vmem:[%s1158_s1 + $0x1d0] sm:$0xff] }
   0x7   :  { %592 = vmatpush3.msra.mxu1 %v124_v7  ;;  %513 = vmatprep.subr.mxu0 %v107_v8  ;;  %v90_v14 = vld [vmem:[%s1158_s1 + $0x60] sm:$0xff]  ;;  %v89_v18 = vld [vmem:[%s1158_s1 + $0x58] sm:$0xff]  ;;  %v88_v22 = vld [vmem:[%s1158_s1 + $0x50] sm:$0xff] }
   0x8   :  { %593 = vmatprep.subr.mxu1 %v139_v9  ;;  %v122_v15 = vld [vmem:[%s1158_s1 + $0x160] sm:$0xff]  ;;  %514 = vmatpush3.msra.mxu0 %v91_v10  ;;  %v121_v19 = vld [vmem:[%s1158_s1 + $0x158] sm:$0xff]  ;;  %v120_v23 = vld [vmem:[%s1158_s1 + $0x150] sm:$0xff] }
   0x9   :  { %594 = vmatpush3.msra.mxu1 %v123_v11  ;;  %515 = vmatprep.subr.mxu0 %v106_v12  ;;  %v103_v24 = vld [vmem:[%s1158_s1 + $0xc8] sm:$0xff]  ;;  %v102_v28 = vld [vmem:[%s1158_s1 + $0xc0] sm:$0xff]  ;;  %v101_v32 = vld [vmem:[%s1158_s1 + $0xb8] sm:$0xff] }
   0xa   :  { %595 = vmatprep.subr.mxu1 %v138_v13  ;;  %516 = vmatpush3.msra.mxu0 %v90_v14  ;;  %v135_v25 = vld [vmem:[%s1158_s1 + $0x1c8] sm:$0xff]  ;;  %v134_v29 = vld [vmem:[%s1158_s1 + $0x1c0] sm:$0xff]  ;;  %v133_v33 = vld [vmem:[%s1158_s1 + $0x1b8] sm:$0xff] }
   0xb   :  { %596 = vmatpush3.msra.mxu1 %v122_v15  ;;  %517 = vmatprep.subr.mxu0 %v105_v16  ;;  %v87_v26 = vld [vmem:[%s1158_s1 + $0x48] sm:$0xff]  ;;  %v86_v30 = vld [vmem:[%s1158_s1 + $0x40] sm:$0xff]  ;;  %v85_v34 = vld [vmem:[%s1158_s1 + $0x38] sm:$0xff] }
   0xc   :  { %597 = vmatprep.subr.mxu1 %v137_v17  ;;  %518 = vmatpush3.msra.mxu0 %v89_v18  ;;  %v119_v27 = vld [vmem:[%s1158_s1 + $0x148] sm:$0xff]  ;;  %v118_v31 = vld [vmem:[%s1158_s1 + $0x140] sm:$0xff]  ;;  %v117_v35 = vld [vmem:[%s1158_s1 + $0x138] sm:$0xff] }
   0xd   :  { %598 = vmatpush3.msra.mxu1 %v121_v19  ;;  %519 = vmatprep.subr.mxu0 %v104_v20  ;;  %v100_v36 = vld [vmem:[%s1158_s1 + $0xb0] sm:$0xff]  ;;  %v99_v40 = vld [vmem:[%s1158_s1 + $0xa8] sm:$0xff]  ;;  %v98_v44 = vld [vmem:[%s1158_s1 + $0xa0] sm:$0xff] }
   0xe   :  { %599 = vmatprep.subr.mxu1 %v136_v21  ;;  %520 = vmatpush3.msra.mxu0 %v88_v22  ;;  %v132_v37 = vld [vmem:[%s1158_s1 + $0x1b0] sm:$0xff]  ;;  %v131_v41 = vld [vmem:[%s1158_s1 + $0x1a8] sm:$0xff]  ;;  %v130_v45 = vld [vmem:[%s1158_s1 + $0x1a0] sm:$0xff] }
   0xf   :  { %600 = vmatpush3.msra.mxu1 %v120_v23  ;;  %521 = vmatprep.subr.mxu0 %v103_v24  ;;  %v84_v38 = vld [vmem:[%s1158_s1 + $0x30] sm:$0xff]  ;;  %v83_v42 = vld [vmem:[%s1158_s1 + $0x28] sm:$0xff]  ;;  %v82_v46 = vld [vmem:[%s1158_s1 + $0x20] sm:$0xff] }
  0x10   :  { %601 = vmatprep.subr.mxu1 %v135_v25  ;;  %522 = vmatpush3.msra.mxu0 %v87_v26  ;;  %v116_v39 = vld [vmem:[%s1158_s1 + $0x130] sm:$0xff]  ;;  %v115_v43 = vld [vmem:[%s1158_s1 + $0x128] sm:$0xff]  ;;  %v114_v47 = vld [vmem:[%s1158_s1 + $0x120] sm:$0xff] }
  0x11   :  { %602 = vmatpush3.msra.mxu1 %v119_v27  ;;  %523 = vmatprep.subr.mxu0 %v102_v28  ;;  %v97_v48 = vld [vmem:[%s1158_s1 + $0x98] sm:$0xff]  ;;  %v96_v52 = vld [vmem:[%s1158_s1 + $0x90] sm:$0xff]  ;;  %v95_v56 = vld [vmem:[%s1158_s1 + $0x88] sm:$0xff] }
  0x12   :  { %603 = vmatprep.subr.mxu1 %v134_v29  ;;  %524 = vmatpush3.msra.mxu0 %v86_v30  ;;  %v129_v49 = vld [vmem:[%s1158_s1 + $0x198] sm:$0xff]  ;;  %v128_v53 = vld [vmem:[%s1158_s1 + $0x190] sm:$0xff]  ;;  %v127_v57 = vld [vmem:[%s1158_s1 + $0x188] sm:$0xff] }
  0x13   :  { %604 = vmatpush3.msra.mxu1 %v118_v31  ;;  %525 = vmatprep.subr.mxu0 %v101_v32  ;;  %v81_v50 = vld [vmem:[%s1158_s1 + $0x18] sm:$0xff]  ;;  %v80_v54 = vld [vmem:[%s1158_s1 + $0x10] sm:$0xff]  ;;  %v79_v58 = vld [vmem:[%s1158_s1 + $0x8] sm:$0xff] }
  0x14   :  { %605 = vmatprep.subr.mxu1 %v133_v33  ;;  %526 = vmatpush3.msra.mxu0 %v85_v34  ;;  %v113_v51 = vld [vmem:[%s1158_s1 + $0x118] sm:$0xff]  ;;  %v112_v55 = vld [vmem:[%s1158_s1 + $0x110] sm:$0xff]  ;;  %v111_v59 = vld [vmem:[%s1158_s1 + $0x108] sm:$0xff] }
  0x15   :  { %606 = vmatpush3.msra.mxu1 %v117_v35  ;;  %527 = vmatprep.subr.mxu0 %v100_v36  ;;  %v94_v60 = vld [vmem:[%s1158_s1 + $0x80] sm:$0xff]  ;;  %v15_v63 = vld [vmem:[%s1159_s0 + $0x8] sm:$0xff]  ;;  %v17_v1 = vld [vmem:[%s1159_s0 + $0x18] sm:$0xff] }
  0x16   :  { %607 = vmatprep.subr.mxu1 %v132_v37  ;;  %528 = vmatpush3.msra.mxu0 %v84_v38  ;;  %v126_v61 = vld [vmem:[%s1158_s1 + $0x180] sm:$0xff]  ;;  %v16_v3 = vld [vmem:[%s1159_s0 + $0x10] sm:$0xff]  ;;  %v19_v4 = vld [vmem:[%s1159_s0 + $0x28] sm:$0xff] }
  0x17   :  { %608 = vmatpush3.msra.mxu1 %v116_v39  ;;  %529 = vmatprep.subr.mxu0 %v99_v40  ;;  %v78_v62 = vld [vmem:[%s1158_s1] sm:$0xff]  ;;  %v21_v5 = vld [vmem:[%s1159_s0 + $0x38] sm:$0xff]  ;;  %v20_v7 = vld [vmem:[%s1159_s0 + $0x30] sm:$0xff] }
  0x18   :  { %609 = vmatprep.subr.mxu1 %v131_v41  ;;  %530 = vmatpush3.msra.mxu0 %v83_v42  ;;  %v110_v0 = vld [vmem:[%s1158_s1 + $0x100] sm:$0xff]  ;;  %v23_v8 = vld [vmem:[%s1159_s0 + $0x48] sm:$0xff]  ;;  %v25_v9 = vld [vmem:[%s1159_s0 + $0x58] sm:$0xff] }
  0x19   :  { %610 = vmatpush3.msra.mxu1 %v115_v43  ;;  %531 = vmatprep.subr.mxu0 %v98_v44  ;;  %v14_v2 = vld [vmem:[%s1159_s0] sm:$0xff]  ;;  %v24_v11 = vld [vmem:[%s1159_s0 + $0x50] sm:$0xff]  ;;  %v27_v12 = vld [vmem:[%s1159_s0 + $0x68] sm:$0xff] }
  0x1a   :  { %611 = vmatprep.subr.mxu1 %v130_v45  ;;  %532 = vmatpush3.msra.mxu0 %v82_v46  ;;  %v18_v6 = vld [vmem:[%s1159_s0 + $0x20] sm:$0xff]  ;;  %v29_v13 = vld [vmem:[%s1159_s0 + $0x78] sm:$0xff]  ;;  %v28_v15 = vld [vmem:[%s1159_s0 + $0x70] sm:$0xff] }
  0x1b   :  { %612 = vmatpush3.msra.mxu1 %v114_v47  ;;  %533 = vmatprep.subr.mxu0 %v97_v48  ;;  %v22_v10 = vld [vmem:[%s1159_s0 + $0x40] sm:$0xff]  ;;  %v31_v16 = vld [vmem:[%s1159_s0 + $0x88] sm:$0xff]  ;;  %v33_v17 = vld [vmem:[%s1159_s0 + $0x98] sm:$0xff] }
  0x1c   :  { %613 = vmatprep.subr.mxu1 %v129_v49  ;;  %534 = vmatpush3.msra.mxu0 %v81_v50  ;;  %v26_v14 = vld [vmem:[%s1159_s0 + $0x60] sm:$0xff]  ;;  %v32_v19 = vld [vmem:[%s1159_s0 + $0x90] sm:$0xff]  ;;  %v35_v20 = vld [vmem:[%s1159_s0 + $0xa8] sm:$0xff] }
  0x1d   :  { %614 = vmatpush3.msra.mxu1 %v113_v51  ;;  %535 = vmatprep.subr.mxu0 %v96_v52  ;;  %v30_v18 = vld [vmem:[%s1159_s0 + $0x80] sm:$0xff]  ;;  %v37_v21 = vld [vmem:[%s1159_s0 + $0xb8] sm:$0xff]  ;;  %v36_v23 = vld [vmem:[%s1159_s0 + $0xb0] sm:$0xff] }
  0x1e   :  { %615 = vmatprep.subr.mxu1 %v128_v53  ;;  %536 = vmatpush3.msra.mxu0 %v80_v54  ;;  %v34_v22 = vld [vmem:[%s1159_s0 + $0xa0] sm:$0xff]  ;;  %v39_v24 = vld [vmem:[%s1159_s0 + $0xc8] sm:$0xff]  ;;  %v41_v25 = vld [vmem:[%s1159_s0 + $0xd8] sm:$0xff] }
  0x1f   :  { %616 = vmatpush3.msra.mxu1 %v112_v55  ;;  %537 = vmatprep.subr.mxu0 %v95_v56  ;;  %v38_v26 = vld [vmem:[%s1159_s0 + $0xc0] sm:$0xff]  ;;  %v40_v27 = vld [vmem:[%s1159_s0 + $0xd0] sm:$0xff]  ;;  %v43_v28 = vld [vmem:[%s1159_s0 + $0xe8] sm:$0xff] }
  0x20   :  { %617 = vmatprep.subr.mxu1 %v127_v57  ;;  %538 = vmatpush3.msra.mxu0 %v79_v58  ;;  %v45_v29 = vld [vmem:[%s1159_s0 + $0xf8] sm:$0xff]  ;;  %v42_v30 = vld [vmem:[%s1159_s0 + $0xe0] sm:$0xff]  ;;  %v44_v31 = vld [vmem:[%s1159_s0 + $0xf0] sm:$0xff] }
  0x21   :  { %618 = vmatpush3.msra.mxu1 %v111_v59  ;;  %539 = vmatprep.subr.mxu0 %v94_v60  ;;  %v47_v32 = vld [vmem:[%s1159_s0 + $0x108] sm:$0xff]  ;;  %v49_v33 = vld [vmem:[%s1159_s0 + $0x118] sm:$0xff]  ;;  %v46_v34 = vld [vmem:[%s1159_s0 + $0x100] sm:$0xff] }
  0x22   :  { %619 = vmatprep.subr.mxu1 %v126_v61  ;;  %540 = vmatpush3.msra.mxu0 %v78_v62  ;;  %v48_v35 = vld [vmem:[%s1159_s0 + $0x110] sm:$0xff]  ;;  %v51_v36 = vld [vmem:[%s1159_s0 + $0x128] sm:$0xff]  ;;  %v53_v37 = vld [vmem:[%s1159_s0 + $0x138] sm:$0xff] }
  0x23   :  { %213 = vmatprep.mubr.f32.mxu0 %v15_v63  ;;  %620 = vmatpush3.msra.mxu1 %v110_v0  ;;  %v50_v38 = vld [vmem:[%s1159_s0 + $0x120] sm:$0xff]  ;;  %v52_v39 = vld [vmem:[%s1159_s0 + $0x130] sm:$0xff]  ;;  %v55_v40 = vld [vmem:[%s1159_s0 + $0x148] sm:$0xff] }
  0x24   :  { %358 = vmatprep.mubr.f32.mxu1 %v17_v1  ;;  %214 = vmatmul.mubr.f32.vlgmr.msra.gmra.mxu0 %v14_v2  ;;  %v57_v41 = vld [vmem:[%s1159_s0 + $0x158] sm:$0xff]  ;;  %v54_v42 = vld [vmem:[%s1159_s0 + $0x140] sm:$0xff]  ;;  %v56_v43 = vld [vmem:[%s1159_s0 + $0x150] sm:$0xff] }
  0x25   :  { %359 = vmatmul.mubr.f32.vlgmr.msra.gmra.mxu1 %v16_v3  ;;  %218 = vmatprep.mubr.f32.mxu0 %v19_v4  ;;  %v59_v44 = vld [vmem:[%s1159_s0 + $0x168] sm:$0xff]  ;;  %v61_v45 = vld [vmem:[%s1159_s0 + $0x178] sm:$0xff]  ;;  %v58_v46 = vld [vmem:[%s1159_s0 + $0x160] sm:$0xff] }
  0x26   :  { %363 = vmatprep.mubr.f32.mxu1 %v21_v5  ;;  %v60_v47 = vld [vmem:[%s1159_s0 + $0x170] sm:$0xff]  ;;  %v63_v48 = vld [vmem:[%s1159_s0 + $0x188] sm:$0xff]  ;;  %v65_v49 = vld [vmem:[%s1159_s0 + $0x198] sm:$0xff] }
  0x27   :  { %v62_v50 = vld [vmem:[%s1159_s0 + $0x180] sm:$0xff]  ;;  %v64_v51 = vld [vmem:[%s1159_s0 + $0x190] sm:$0xff]  ;;  %v67_v52 = vld [vmem:[%s1159_s0 + $0x1a8] sm:$0xff] }
  0x28   :  { %219 = vmatmul.mubr.f32.gmra.mxu0 %v18_v6  ;;  %v69_v53 = vld [vmem:[%s1159_s0 + $0x1b8] sm:$0xff]  ;;  %v66_v54 = vld [vmem:[%s1159_s0 + $0x1a0] sm:$0xff]  ;;  %v68_v55 = vld [vmem:[%s1159_s0 + $0x1b0] sm:$0xff] }
  0x29   :  { %364 = vmatmul.mubr.f32.gmra.mxu1 %v20_v7  ;;  %223 = vmatprep.mubr.f32.mxu0 %v23_v8  ;;  %v71_v56 = vld [vmem:[%s1159_s0 + $0x1c8] sm:$0xff]  ;;  %v73_v57 = vld [vmem:[%s1159_s0 + $0x1d8] sm:$0xff]  ;;  %v70_v58 = vld [vmem:[%s1159_s0 + $0x1c0] sm:$0xff] }
  0x2a   :  { %368 = vmatprep.mubr.f32.mxu1 %v25_v9  ;;  %v72_v59 = vld [vmem:[%s1159_s0 + $0x1d0] sm:$0xff]  ;;  %v75_v60 = vld [vmem:[%s1159_s0 + $0x1e8] sm:$0xff]  ;;  %v77_v61 = vld [vmem:[%s1159_s0 + $0x1f8] sm:$0xff] }
  0x2b   :  { %v74_v62 = vld [vmem:[%s1159_s0 + $0x1e0] sm:$0xff]  ;;  %v76_v63 = vld [vmem:[%s1159_s0 + $0x1f0] sm:$0xff] }
  0x2c   :  { %224 = vmatmul.mubr.f32.gmra.mxu0 %v22_v10  ;;  %v1076_v2 = vld [vmem:[%s1160_s2] ss:$0 sm:$0xff] }
  0x2d   :  { %369 = vmatmul.mubr.f32.gmra.mxu1 %v24_v11  ;;  %228 = vmatprep.mubr.f32.mxu0 %v27_v12 }
  0x2e   :  { %373 = vmatprep.mubr.f32.mxu1 %v29_v13 }
  0x30   :  { %229 = vmatmul.mubr.f32.gmra.mxu0 %v26_v14 }
  0x31   :  { %374 = vmatmul.mubr.f32.gmra.mxu1 %v28_v15  ;;  %233 = vmatprep.mubr.f32.mxu0 %v31_v16 }
  0x32   :  { %378 = vmatprep.mubr.f32.mxu1 %v33_v17 }
  0x34   :  { %234 = vmatmul.mubr.f32.gmra.mxu0 %v30_v18 }
  0x35   :  { %379 = vmatmul.mubr.f32.gmra.mxu1 %v32_v19  ;;  %238 = vmatprep.mubr.f32.mxu0 %v35_v20 }
  0x36   :  { %383 = vmatprep.mubr.f32.mxu1 %v37_v21 }
  0x38   :  { %239 = vmatmul.mubr.f32.gmra.mxu0 %v34_v22 }
  0x39   :  { %384 = vmatmul.mubr.f32.gmra.mxu1 %v36_v23  ;;  %243 = vmatprep.mubr.f32.mxu0 %v39_v24 }
  0x3a   :  { %388 = vmatprep.mubr.f32.mxu1 %v41_v25 }
  0x3c   :  { %244 = vmatmul.mubr.f32.gmra.mxu0 %v38_v26 }
  0x3d   :  { %389 = vmatmul.mubr.f32.gmra.mxu1 %v40_v27  ;;  %248 = vmatprep.mubr.f32.mxu0 %v43_v28 }
  0x3e   :  { %393 = vmatprep.mubr.f32.mxu1 %v45_v29 }
  0x40   :  { %249 = vmatmul.mubr.f32.gmra.mxu0 %v42_v30 }
  0x41   :  { %394 = vmatmul.mubr.f32.gmra.mxu1 %v44_v31  ;;  %253 = vmatprep.mubr.f32.mxu0 %v47_v32 }
  0x42   :  { %398 = vmatprep.mubr.f32.mxu1 %v49_v33 }
  0x44   :  { %254 = vmatmul.mubr.f32.gmra.mxu0 %v46_v34 }
  0x45   :  { %399 = vmatmul.mubr.f32.gmra.mxu1 %v48_v35  ;;  %258 = vmatprep.mubr.f32.mxu0 %v51_v36 }
  0x46   :  { %403 = vmatprep.mubr.f32.mxu1 %v53_v37 }
  0x48   :  { %259 = vmatmul.mubr.f32.gmra.mxu0 %v50_v38 }
  0x49   :  { %404 = vmatmul.mubr.f32.gmra.mxu1 %v52_v39  ;;  %263 = vmatprep.mubr.f32.mxu0 %v55_v40 }
  0x4a   :  { %408 = vmatprep.mubr.f32.mxu1 %v57_v41 }
  0x4c   :  { %264 = vmatmul.mubr.f32.gmra.mxu0 %v54_v42 }
  0x4d   :  { %409 = vmatmul.mubr.f32.gmra.mxu1 %v56_v43  ;;  %268 = vmatprep.mubr.f32.mxu0 %v59_v44 }
  0x4e   :  { %413 = vmatprep.mubr.f32.mxu1 %v61_v45 }
  0x50   :  { %269 = vmatmul.mubr.f32.gmra.mxu0 %v58_v46 }
  0x51   :  { %414 = vmatmul.mubr.f32.gmra.mxu1 %v60_v47  ;;  %273 = vmatprep.mubr.f32.mxu0 %v63_v48 }
  0x52   :  { %418 = vmatprep.mubr.f32.mxu1 %v65_v49 }
  0x54   :  { %274 = vmatmul.mubr.f32.gmra.mxu0 %v62_v50 }
  0x55   :  { %419 = vmatmul.mubr.f32.gmra.mxu1 %v64_v51  ;;  %278 = vmatprep.mubr.f32.mxu0 %v67_v52 }
  0x56   :  { %423 = vmatprep.mubr.f32.mxu1 %v69_v53 }
  0x58   :  { %279 = vmatmul.mubr.f32.gmra.mxu0 %v66_v54 }
  0x59   :  { %424 = vmatmul.mubr.f32.gmra.mxu1 %v68_v55  ;;  %283 = vmatprep.mubr.f32.mxu0 %v71_v56 }
  0x5a   :  { %428 = vmatprep.mubr.f32.mxu1 %v73_v57 }
  0x5c   :  { %284 = vmatmul.mubr.f32.gmra.mxu0 %v70_v58 }
  0x5d   :  { %429 = vmatmul.mubr.f32.gmra.mxu1 %v72_v59  ;;  %288 = vmatprep.mubr.f32.mxu0 %v75_v60 }
  0x5e   :  { %433 = vmatprep.mubr.f32.mxu1 %v77_v61 }
  0x60   :  { %289 = vmatmul.mubr.f32.gmra.mxu0 %v74_v62 }
  0x61   :  { %434 = vmatmul.mubr.f32.gmra.mxu1 %v76_v63 }
  0xe4   :  { %v541_v0 = vpop.f32.mrf.mxu0 }
  0xe5   :  { %v621_v1 = vpop.f32.mrf.mxu1 }
  0xe6   :  { %v542_v3 = vpop.f32.mrf.mxu0 }
  0xe7   :  { %v622_v4 = vpop.f32.mrf.mxu1  ;;  %v543_v5 = vadd.f32 %v542_v3, %v541_v0 }
  0xe8   :  { %v544_v6 = vpop.f32.mrf.mxu0  ;;  %v623_v9 = vadd.f32 %v622_v4, %v621_v1 }
  0xe9   :  { %v624_v7 = vpop.f32.mrf.mxu1  ;;  %v216_v8 = vadd.f32 %v543_v5, %v1076_v2 }
  0xea   :  { %v545_v10 = vpop.f32.mrf.mxu0 }
  0xeb   :  { %v625_v11 = vpop.f32.mrf.mxu1  ;;  %v361_v12 = vadd.f32 %v623_v9, %v216_v8  ;;  %v546_v13 = vadd.f32 %v545_v10, %v544_v6 }
  0xec   :  { %v547_v14 = vpop.f32.mrf.mxu0  ;;  %v626_v18 = vadd.f32 %v625_v11, %v624_v7 }
  0xed   :  { %v627_v15 = vpop.f32.mrf.mxu1  ;;  %vm439_vm1 = vcmp.ge.f32.partialorder %v361_v12, 0.0  ;;  %v455_v16 = vmul.f32 0.1, %v361_v12  ;;  %v221_v17 = vadd.f32 %v546_v13, %v1076_v2 }
  0xee   :  { %v548_v19 = vpop.f32.mrf.mxu0 }
  0xef   :  { %v628_v20 = vpop.f32.mrf.mxu1  ;;  %v471_v21 = vsel %vm439_vm1, %v361_v12, %v455_v16  ;;  %v366_v22 = vadd.f32 %v626_v18, %v221_v17  ;;  %v549_v23 = vadd.f32 %v548_v19, %v547_v14 }
  0xf0   :  { %488 = vst.msk [vmem:[%s1161_s3] sm:$0xff] %vm487_vm0, %v471_v21  ;;  %v550_v24 = vpop.f32.mrf.mxu0  ;;  %v629_v28 = vadd.f32 %v628_v20, %v627_v15 }
  0xf1   :  { %v630_v25 = vpop.f32.mrf.mxu1  ;;  %vm440_vm2 = vcmp.ge.f32.partialorder %v366_v22, 0.0  ;;  %v456_v26 = vmul.f32 0.1, %v366_v22  ;;  %v226_v27 = vadd.f32 %v549_v23, %v1076_v2 }
  0xf2   :  { %v551_v29 = vpop.f32.mrf.mxu0 }
  0xf3   :  { %v631_v30 = vpop.f32.mrf.mxu1  ;;  %v472_v31 = vsel %vm440_vm2, %v366_v22, %v456_v26  ;;  %v371_v32 = vadd.f32 %v629_v28, %v226_v27  ;;  %v552_v33 = vadd.f32 %v551_v29, %v550_v24 }
  0xf4   :  { %489 = vst.msk [vmem:[%s1161_s3 + $0x8] sm:$0xff] %vm487_vm0, %v472_v31  ;;  %v553_v34 = vpop.f32.mrf.mxu0  ;;  %v632_v38 = vadd.f32 %v631_v30, %v630_v25 }
  0xf5   :  { %v633_v35 = vpop.f32.mrf.mxu1  ;;  %vm441_vm3 = vcmp.ge.f32.partialorder %v371_v32, 0.0  ;;  %v457_v36 = vmul.f32 0.1, %v371_v32  ;;  %v231_v37 = vadd.f32 %v552_v33, %v1076_v2 }
  0xf6   :  { %v554_v39 = vpop.f32.mrf.mxu0 }
  0xf7   :  { %v634_v40 = vpop.f32.mrf.mxu1  ;;  %v473_v41 = vsel %vm441_vm3, %v371_v32, %v457_v36  ;;  %v376_v42 = vadd.f32 %v632_v38, %v231_v37  ;;  %v555_v43 = vadd.f32 %v554_v39, %v553_v34 }
  0xf8   :  { %490 = vst.msk [vmem:[%s1161_s3 + $0x10] sm:$0xff] %vm487_vm0, %v473_v41  ;;  %v556_v44 = vpop.f32.mrf.mxu0  ;;  %v635_v48 = vadd.f32 %v634_v40, %v633_v35 }
  0xf9   :  { %v636_v45 = vpop.f32.mrf.mxu1  ;;  %vm442_vm4 = vcmp.ge.f32.partialorder %v376_v42, 0.0  ;;  %v458_v46 = vmul.f32 0.1, %v376_v42  ;;  %v236_v47 = vadd.f32 %v555_v43, %v1076_v2 }
  0xfa   :  { %v557_v49 = vpop.f32.mrf.mxu0 }
  0xfb   :  { %v637_v50 = vpop.f32.mrf.mxu1  ;;  %v474_v51 = vsel %vm442_vm4, %v376_v42, %v458_v46  ;;  %v381_v52 = vadd.f32 %v635_v48, %v236_v47  ;;  %v558_v53 = vadd.f32 %v557_v49, %v556_v44 }
  0xfc   :  { %491 = vst.msk [vmem:[%s1161_s3 + $0x18] sm:$0xff] %vm487_vm0, %v474_v51  ;;  %v559_v54 = vpop.f32.mrf.mxu0  ;;  %v638_v58 = vadd.f32 %v637_v50, %v636_v45 }
  0xfd   :  { %v639_v55 = vpop.f32.mrf.mxu1  ;;  %vm443_vm5 = vcmp.ge.f32.partialorder %v381_v52, 0.0  ;;  %v459_v56 = vmul.f32 0.1, %v381_v52  ;;  %v241_v57 = vadd.f32 %v558_v53, %v1076_v2 }
  0xfe   :  { %v560_v59 = vpop.f32.mrf.mxu0 }
  0xff   :  { %v640_v60 = vpop.f32.mrf.mxu1  ;;  %v475_v61 = vsel %vm443_vm5, %v381_v52, %v459_v56  ;;  %v386_v62 = vadd.f32 %v638_v58, %v241_v57  ;;  %v561_v63 = vadd.f32 %v560_v59, %v559_v54 }
 0x100   :  { %492 = vst.msk [vmem:[%s1161_s3 + $0x20] sm:$0xff] %vm487_vm0, %v475_v61  ;;  %v562_v0 = vpop.f32.mrf.mxu0  ;;  %v641_v5 = vadd.f32 %v640_v60, %v639_v55 }
 0x101   :  { %v642_v1 = vpop.f32.mrf.mxu1  ;;  %vm444_vm6 = vcmp.ge.f32.partialorder %v386_v62, 0.0  ;;  %v460_v3 = vmul.f32 0.1, %v386_v62  ;;  %v246_v4 = vadd.f32 %v561_v63, %v1076_v2 }
 0x102   :  { %v563_v6 = vpop.f32.mrf.mxu0 }
 0x103   :  { %v643_v7 = vpop.f32.mrf.mxu1  ;;  %v476_v8 = vsel %vm444_vm6, %v386_v62, %v460_v3  ;;  %v391_v9 = vadd.f32 %v641_v5, %v246_v4  ;;  %v564_v10 = vadd.f32 %v563_v6, %v562_v0 }
 0x104   :  { %493 = vst.msk [vmem:[%s1161_s3 + $0x28] sm:$0xff] %vm487_vm0, %v476_v8  ;;  %v565_v11 = vpop.f32.mrf.mxu0  ;;  %v644_v15 = vadd.f32 %v643_v7, %v642_v1 }
 0x105   :  { %v645_v12 = vpop.f32.mrf.mxu1  ;;  %vm445_vm7 = vcmp.ge.f32.partialorder %v391_v9, 0.0  ;;  %v461_v13 = vmul.f32 0.1, %v391_v9  ;;  %v251_v14 = vadd.f32 %v564_v10, %v1076_v2 }
 0x106   :  { %v566_v16 = vpop.f32.mrf.mxu0 }
 0x107   :  { %v646_v17 = vpop.f32.mrf.mxu1  ;;  %v477_v18 = vsel %vm445_vm7, %v391_v9, %v461_v13  ;;  %v396_v19 = vadd.f32 %v644_v15, %v251_v14  ;;  %v567_v20 = vadd.f32 %v566_v16, %v565_v11 }
 0x108   :  { %494 = vst.msk [vmem:[%s1161_s3 + $0x30] sm:$0xff] %vm487_vm0, %v477_v18  ;;  %v568_v21 = vpop.f32.mrf.mxu0  ;;  %v647_v25 = vadd.f32 %v646_v17, %v645_v12 }
 0x109   :  { %v648_v22 = vpop.f32.mrf.mxu1  ;;  %vm446_vm8 = vcmp.ge.f32.partialorder %v396_v19, 0.0  ;;  %v462_v23 = vmul.f32 0.1, %v396_v19  ;;  %v256_v24 = vadd.f32 %v567_v20, %v1076_v2 }
 0x10a   :  { %v569_v26 = vpop.f32.mrf.mxu0 }
 0x10b   :  { %v649_v27 = vpop.f32.mrf.mxu1  ;;  %v478_v28 = vsel %vm446_vm8, %v396_v19, %v462_v23  ;;  %v401_v29 = vadd.f32 %v647_v25, %v256_v24  ;;  %v570_v30 = vadd.f32 %v569_v26, %v568_v21 }
 0x10c   :  { %495 = vst.msk [vmem:[%s1161_s3 + $0x38] sm:$0xff] %vm487_vm0, %v478_v28  ;;  %v571_v31 = vpop.f32.mrf.mxu0  ;;  %v650_v35 = vadd.f32 %v649_v27, %v648_v22 }
 0x10d   :  { %v651_v32 = vpop.f32.mrf.mxu1  ;;  %vm447_vm9 = vcmp.ge.f32.partialorder %v401_v29, 0.0  ;;  %v463_v33 = vmul.f32 0.1, %v401_v29  ;;  %v261_v34 = vadd.f32 %v570_v30, %v1076_v2 }
 0x10e   :  { %v572_v36 = vpop.f32.mrf.mxu0 }
 0x10f   :  { %v652_v37 = vpop.f32.mrf.mxu1  ;;  %v479_v38 = vsel %vm447_vm9, %v401_v29, %v463_v33  ;;  %v406_v39 = vadd.f32 %v650_v35, %v261_v34  ;;  %v573_v40 = vadd.f32 %v572_v36, %v571_v31 }
 0x110   :  { %496 = vst.msk [vmem:[%s1161_s3 + $0x40] sm:$0xff] %vm487_vm0, %v479_v38  ;;  %v574_v41 = vpop.f32.mrf.mxu0  ;;  %v653_v45 = vadd.f32 %v652_v37, %v651_v32 }
 0x111   :  { %v654_v42 = vpop.f32.mrf.mxu1  ;;  %vm448_vm10 = vcmp.ge.f32.partialorder %v406_v39, 0.0  ;;  %v464_v43 = vmul.f32 0.1, %v406_v39  ;;  %v266_v44 = vadd.f32 %v573_v40, %v1076_v2 }
 0x112   :  { %v575_v46 = vpop.f32.mrf.mxu0 }
 0x113   :  { %v655_v47 = vpop.f32.mrf.mxu1  ;;  %v480_v48 = vsel %vm448_vm10, %v406_v39, %v464_v43  ;;  %v411_v49 = vadd.f32 %v653_v45, %v266_v44  ;;  %v576_v50 = vadd.f32 %v575_v46, %v574_v41 }
 0x114   :  { %497 = vst.msk [vmem:[%s1161_s3 + $0x48] sm:$0xff] %vm487_vm0, %v480_v48  ;;  %v577_v51 = vpop.f32.mrf.mxu0  ;;  %v656_v55 = vadd.f32 %v655_v47, %v654_v42 }
 0x115   :  { %v657_v52 = vpop.f32.mrf.mxu1  ;;  %vm449_vm11 = vcmp.ge.f32.partialorder %v411_v49, 0.0  ;;  %v465_v53 = vmul.f32 0.1, %v411_v49  ;;  %v271_v54 = vadd.f32 %v576_v50, %v1076_v2 }
 0x116   :  { %v578_v56 = vpop.f32.mrf.mxu0 }
 0x117   :  { %v658_v57 = vpop.f32.mrf.mxu1  ;;  %v481_v58 = vsel %vm449_vm11, %v411_v49, %v465_v53  ;;  %v416_v59 = vadd.f32 %v656_v55, %v271_v54  ;;  %v579_v60 = vadd.f32 %v578_v56, %v577_v51 }
 0x118   :  { %498 = vst.msk [vmem:[%s1161_s3 + $0x50] sm:$0xff] %vm487_vm0, %v481_v58  ;;  %v580_v61 = vpop.f32.mrf.mxu0  ;;  %v659_v1 = vadd.f32 %v658_v57, %v657_v52 }
 0x119   :  { %v660_v62 = vpop.f32.mrf.mxu1  ;;  %vm450_vm12 = vcmp.ge.f32.partialorder %v416_v59, 0.0  ;;  %v466_v63 = vmul.f32 0.1, %v416_v59  ;;  %v276_v0 = vadd.f32 %v579_v60, %v1076_v2 }
 0x11a   :  { %v581_v3 = vpop.f32.mrf.mxu0 }
 0x11b   :  { %v661_v4 = vpop.f32.mrf.mxu1  ;;  %v482_v5 = vsel %vm450_vm12, %v416_v59, %v466_v63  ;;  %v421_v6 = vadd.f32 %v659_v1, %v276_v0  ;;  %v582_v7 = vadd.f32 %v581_v3, %v580_v61 }
 0x11c   :  { %499 = vst.msk [vmem:[%s1161_s3 + $0x58] sm:$0xff] %vm487_vm0, %v482_v5  ;;  %v583_v8 = vpop.f32.mrf.mxu0  ;;  %v662_v12 = vadd.f32 %v661_v4, %v660_v62 }
 0x11d   :  { %v663_v9 = vpop.f32.mrf.mxu1  ;;  %vm451_vm13 = vcmp.ge.f32.partialorder %v421_v6, 0.0  ;;  %v467_v10 = vmul.f32 0.1, %v421_v6  ;;  %v281_v11 = vadd.f32 %v582_v7, %v1076_v2 }
 0x11e   :  { %v584_v13 = vpop.f32.mrf.mxu0 }
 0x11f   :  { %v664_v14 = vpop.f32.mrf.mxu1  ;;  %v483_v15 = vsel %vm451_vm13, %v421_v6, %v467_v10  ;;  %v426_v16 = vadd.f32 %v662_v12, %v281_v11  ;;  %v585_v17 = vadd.f32 %v584_v13, %v583_v8 }
 0x120   :  { %500 = vst.msk [vmem:[%s1161_s3 + $0x60] sm:$0xff] %vm487_vm0, %v483_v15  ;;  %v586_v18 = vpop.f32.mrf.mxu0  ;;  %v665_v22 = vadd.f32 %v664_v14, %v663_v9 }
 0x121   :  { %v666_v19 = vpop.f32.mrf.mxu1  ;;  %vm452_vm14 = vcmp.ge.f32.partialorder %v426_v16, 0.0  ;;  %v468_v20 = vmul.f32 0.1, %v426_v16  ;;  %v286_v21 = vadd.f32 %v585_v17, %v1076_v2 }
 0x122   :  { %v587_v23 = vpop.f32.mrf.mxu0 }
 0x123   :  { %v667_v24 = vpop.f32.mrf.mxu1  ;;  %v484_v25 = vsel %vm452_vm14, %v426_v16, %v468_v20  ;;  %v431_v26 = vadd.f32 %v665_v22, %v286_v21  ;;  %v588_v27 = vadd.f32 %v587_v23, %v586_v18 }
 0x124   :  { %501 = vst.msk [vmem:[%s1161_s3 + $0x68] sm:$0xff] %vm487_vm0, %v484_v25  ;;  %v668_v30 = vadd.f32 %v667_v24, %v666_v19 }
 0x125   :  { %vm453_vm15 = vcmp.ge.f32.partialorder %v431_v26, 0.0  ;;  %v469_v28 = vmul.f32 0.1, %v431_v26  ;;  %v291_v29 = vadd.f32 %v588_v27, %v1076_v2 }
 0x127   :  { %v485_v31 = vsel %vm453_vm15, %v431_v26, %v469_v28  ;;  %v436_v32 = vadd.f32 %v668_v30, %v291_v29 }
 0x128   :  { %502 = vst.msk [vmem:[%s1161_s3 + $0x70] sm:$0xff] %vm487_vm0, %v485_v31 }
 0x129   :  { %vm454_vm1 = vcmp.ge.f32.partialorder %v436_v32, 0.0  ;;  %v470_v33 = vmul.f32 0.1, %v436_v32 }
 0x12b   :  { %v486_v34 = vsel %vm454_vm1, %v436_v32, %v470_v33 }
 0x12c   :  { %503 = vst.msk [vmem:[%s1161_s3 + $0x78] sm:$0xff] %vm487_vm0, %v486_v34 }

// kernel: encoder_forward.7
= control target key start
LH: loop header
LB: loop body
LE: loop exit
PB: predicated region body
PF: predicated region fallthrough
CT: control target
= control target key end

     0   :  { %s1762_s0 = inlined_call_operand.vmem [shape: f32[32,1024], index: 0, kind: input, shape index: {}]   ;;  %s1763_s1 = inlined_call_operand.vmem [shape: f32[1024,64], index: 1, kind: input, shape index: {}]   ;;  %s1764_s2 = inlined_call_operand.vmem [shape: f32[1,64], index: 2, kind: input, shape index: {}]   ;;  %s1765_s3 = inlined_call_operand.vmem [shape: f32[64,96], index: 3, kind: input, shape index: {}]   ;;  %s1766_s4 = inlined_call_operand.vmem [shape: f32[32,96], index: 4, kind: input, shape index: {}]   ;;  %s1767_s5 = inlined_call_operand.vmem [shape: f32[2,32], index: 5, kind: input, shape index: {}]   ;;  %s1768_s6 = inlined_call_operand.vmem [shape: f32[96,6], index: 6, kind: input, shape index: {}]   ;;  %s1769_s7 = inlined_call_operand.vmem [shape: f32[1,6], index: 7, kind: input, shape index: {}]   ;;  %s1770_s8 = inlined_call_operand.hbm [shape: f32[2,6], index: 8, kind: output, shape index: {}]  }
   0x1   :  { %v93_v0 = vld [vmem:[%s1763_s1 + $0xf8] sm:$0xff]  ;;  %v92_v4 = vld [vmem:[%s1763_s1 + $0xf0] sm:$0xff]  ;;  %v91_v8 = vld [vmem:[%s1763_s1 + $0xe8] sm:$0xff] }
   0x2   :  { %v125_v1 = vld [vmem:[%s1763_s1 + $0x1f8] sm:$0xff]  ;;  %855 = vmatprep.subr.mxu0 %v93_v0  ;;  %v124_v5 = vld [vmem:[%s1763_s1 + $0x1f0] sm:$0xff]  ;;  %v123_v9 = vld [vmem:[%s1763_s1 + $0x1e8] sm:$0xff] }
   0x3   :  { %v77_v2 = vld [vmem:[%s1763_s1 + $0x78] sm:$0xff]  ;;  %899 = vmatprep.subr.mxu1 %v125_v1  ;;  %v76_v6 = vld [vmem:[%s1763_s1 + $0x70] sm:$0xff]  ;;  %v75_v10 = vld [vmem:[%s1763_s1 + $0x68] sm:$0xff] }
   0x4   :  { %v109_v3 = vld [vmem:[%s1763_s1 + $0x178] sm:$0xff]  ;;  %856 = vmatpush3.msra.mxu0 %v77_v2  ;;  %v108_v7 = vld [vmem:[%s1763_s1 + $0x170] sm:$0xff]  ;;  %v107_v11 = vld [vmem:[%s1763_s1 + $0x168] sm:$0xff] }
   0x5   :  { %900 = vmatpush3.msra.mxu1 %v109_v3  ;;  %857 = vmatprep.subr.mxu0 %v92_v4  ;;  %v90_v12 = vld [vmem:[%s1763_s1 + $0xe0] sm:$0xff]  ;;  %v89_v16 = vld [vmem:[%s1763_s1 + $0xd8] sm:$0xff]  ;;  %v88_v20 = vld [vmem:[%s1763_s1 + $0xd0] sm:$0xff] }
   0x6   :  { %901 = vmatprep.subr.mxu1 %v124_v5  ;;  %858 = vmatpush3.msra.mxu0 %v76_v6  ;;  %v122_v13 = vld [vmem:[%s1763_s1 + $0x1e0] sm:$0xff]  ;;  %v121_v17 = vld [vmem:[%s1763_s1 + $0x1d8] sm:$0xff]  ;;  %v120_v21 = vld [vmem:[%s1763_s1 + $0x1d0] sm:$0xff] }
   0x7   :  { %902 = vmatpush3.msra.mxu1 %v108_v7  ;;  %859 = vmatprep.subr.mxu0 %v91_v8  ;;  %v74_v14 = vld [vmem:[%s1763_s1 + $0x60] sm:$0xff]  ;;  %v73_v18 = vld [vmem:[%s1763_s1 + $0x58] sm:$0xff]  ;;  %v72_v22 = vld [vmem:[%s1763_s1 + $0x50] sm:$0xff] }
   0x8   :  { %903 = vmatprep.subr.mxu1 %v123_v9  ;;  %v106_v15 = vld [vmem:[%s1763_s1 + $0x160] sm:$0xff]  ;;  %860 = vmatpush3.msra.mxu0 %v75_v10  ;;  %v105_v19 = vld [vmem:[%s1763_s1 + $0x158] sm:$0xff]  ;;  %v104_v23 = vld [vmem:[%s1763_s1 + $0x150] sm:$0xff] }
   0x9   :  { %904 = vmatpush3.msra.mxu1 %v107_v11  ;;  %861 = vmatprep.subr.mxu0 %v90_v12  ;;  %v87_v24 = vld [vmem:[%s1763_s1 + $0xc8] sm:$0xff]  ;;  %v86_v28 = vld [vmem:[%s1763_s1 + $0xc0] sm:$0xff]  ;;  %v85_v32 = vld [vmem:[%s1763_s1 + $0xb8] sm:$0xff] }
   0xa   :  { %905 = vmatprep.subr.mxu1 %v122_v13  ;;  %862 = vmatpush3.msra.mxu0 %v74_v14  ;;  %v119_v25 = vld [vmem:[%s1763_s1 + $0x1c8] sm:$0xff]  ;;  %v118_v29 = vld [vmem:[%s1763_s1 + $0x1c0] sm:$0xff]  ;;  %v117_v33 = vld [vmem:[%s1763_s1 + $0x1b8] sm:$0xff] }
   0xb   :  { %906 = vmatpush3.msra.mxu1 %v106_v15  ;;  %863 = vmatprep.subr.mxu0 %v89_v16  ;;  %v71_v26 = vld [vmem:[%s1763_s1 + $0x48] sm:$0xff]  ;;  %v70_v30 = vld [vmem:[%s1763_s1 + $0x40] sm:$0xff]  ;;  %v69_v34 = vld [vmem:[%s1763_s1 + $0x38] sm:$0xff] }
   0xc   :  { %907 = vmatprep.subr.mxu1 %v121_v17  ;;  %864 = vmatpush3.msra.mxu0 %v73_v18  ;;  %v103_v27 = vld [vmem:[%s1763_s1 + $0x148] sm:$0xff]  ;;  %v102_v31 = vld [vmem:[%s1763_s1 + $0x140] sm:$0xff]  ;;  %v101_v35 = vld [vmem:[%s1763_s1 + $0x138] sm:$0xff] }
   0xd   :  { %908 = vmatpush3.msra.mxu1 %v105_v19  ;;  %865 = vmatprep.subr.mxu0 %v88_v20  ;;  %v84_v36 = vld [vmem:[%s1763_s1 + $0xb0] sm:$0xff]  ;;  %v83_v40 = vld [vmem:[%s1763_s1 + $0xa8] sm:$0xff]  ;;  %v82_v44 = vld [vmem:[%s1763_s1 + $0xa0] sm:$0xff] }
   0xe   :  { %909 = vmatprep.subr.mxu1 %v120_v21  ;;  %866 = vmatpush3.msra.mxu0 %v72_v22  ;;  %v116_v37 = vld [vmem:[%s1763_s1 + $0x1b0] sm:$0xff]  ;;  %v115_v41 = vld [vmem:[%s1763_s1 + $0x1a8] sm:$0xff]  ;;  %v114_v45 = vld [vmem:[%s1763_s1 + $0x1a0] sm:$0xff] }
   0xf   :  { %910 = vmatpush3.msra.mxu1 %v104_v23  ;;  %867 = vmatprep.subr.mxu0 %v87_v24  ;;  %v68_v38 = vld [vmem:[%s1763_s1 + $0x30] sm:$0xff]  ;;  %v67_v42 = vld [vmem:[%s1763_s1 + $0x28] sm:$0xff]  ;;  %v66_v46 = vld [vmem:[%s1763_s1 + $0x20] sm:$0xff] }
  0x10   :  { %911 = vmatprep.subr.mxu1 %v119_v25  ;;  %868 = vmatpush3.msra.mxu0 %v71_v26  ;;  %v100_v39 = vld [vmem:[%s1763_s1 + $0x130] sm:$0xff]  ;;  %v99_v43 = vld [vmem:[%s1763_s1 + $0x128] sm:$0xff]  ;;  %v98_v47 = vld [vmem:[%s1763_s1 + $0x120] sm:$0xff] }
  0x11   :  { %912 = vmatpush3.msra.mxu1 %v103_v27  ;;  %869 = vmatprep.subr.mxu0 %v86_v28  ;;  %v81_v48 = vld [vmem:[%s1763_s1 + $0x98] sm:$0xff]  ;;  %v80_v52 = vld [vmem:[%s1763_s1 + $0x90] sm:$0xff]  ;;  %v79_v56 = vld [vmem:[%s1763_s1 + $0x88] sm:$0xff] }
  0x12   :  { %913 = vmatprep.subr.mxu1 %v118_v29  ;;  %870 = vmatpush3.msra.mxu0 %v70_v30  ;;  %v113_v49 = vld [vmem:[%s1763_s1 + $0x198] sm:$0xff]  ;;  %v112_v53 = vld [vmem:[%s1763_s1 + $0x190] sm:$0xff]  ;;  %v111_v57 = vld [vmem:[%s1763_s1 + $0x188] sm:$0xff] }
  0x13   :  { %914 = vmatpush3.msra.mxu1 %v102_v31  ;;  %871 = vmatprep.subr.mxu0 %v85_v32  ;;  %v65_v50 = vld [vmem:[%s1763_s1 + $0x18] sm:$0xff]  ;;  %v64_v54 = vld [vmem:[%s1763_s1 + $0x10] sm:$0xff]  ;;  %v63_v58 = vld [vmem:[%s1763_s1 + $0x8] sm:$0xff] }
  0x14   :  { %915 = vmatprep.subr.mxu1 %v117_v33  ;;  %872 = vmatpush3.msra.mxu0 %v69_v34  ;;  %v97_v51 = vld [vmem:[%s1763_s1 + $0x118] sm:$0xff]  ;;  %v96_v55 = vld [vmem:[%s1763_s1 + $0x110] sm:$0xff]  ;;  %v95_v59 = vld [vmem:[%s1763_s1 + $0x108] sm:$0xff] }
  0x15   :  { %916 = vmatpush3.msra.mxu1 %v101_v35  ;;  %873 = vmatprep.subr.mxu0 %v84_v36  ;;  %v78_v60 = vld [vmem:[%s1763_s1 + $0x80] sm:$0xff]  ;;  %v31_v63 = vld [vmem:[%s1762_s0 + $0x8] sm:$0xff]  ;;  %v33_v2 = vld [vmem:[%s1762_s0 + $0x18] sm:$0xff] }
  0x16   :  { %917 = vmatprep.subr.mxu1 %v116_v37  ;;  %874 = vmatpush3.msra.mxu0 %v68_v38  ;;  %v110_v61 = vld [vmem:[%s1763_s1 + $0x180] sm:$0xff]  ;;  %v157_v3 = vld [vmem:[%s1763_s1 + $0x2f8] sm:$0xff]  ;;  %v32_v5 = vld [vmem:[%s1762_s0 + $0x10] sm:$0xff] }
  0x17   :  { %918 = vmatpush3.msra.mxu1 %v100_v39  ;;  %875 = vmatprep.subr.mxu0 %v83_v40  ;;  %v62_v62 = vld [vmem:[%s1763_s1] sm:$0xff]  ;;  %v189_v4 = vld [vmem:[%s1763_s1 + $0x3f8] sm:$0xff]  ;;  %v156_v8 = vld [vmem:[%s1763_s1 + $0x2f0] sm:$0xff] }
  0x18   :  { %919 = vmatprep.subr.mxu1 %v115_v41  ;;  %876 = vmatpush3.msra.mxu0 %v67_v42  ;;  %v94_v0 = vld [vmem:[%s1763_s1 + $0x100] sm:$0xff]  ;;  %v141_v6 = vld [vmem:[%s1763_s1 + $0x278] sm:$0xff]  ;;  %v188_v9 = vld [vmem:[%s1763_s1 + $0x3f0] sm:$0xff] }
  0x19   :  { %920 = vmatpush3.msra.mxu1 %v99_v43  ;;  %877 = vmatprep.subr.mxu0 %v82_v44  ;;  %v30_v1 = vld [vmem:[%s1762_s0] sm:$0xff]  ;;  %v173_v7 = vld [vmem:[%s1763_s1 + $0x378] sm:$0xff]  ;;  %v140_v10 = vld [vmem:[%s1763_s1 + $0x270] sm:$0xff] }
  0x1a   :  { %921 = vmatprep.subr.mxu1 %v114_v45  ;;  %878 = vmatpush3.msra.mxu0 %v66_v46  ;;  %v172_v11 = vld [vmem:[%s1763_s1 + $0x370] sm:$0xff]  ;;  %v155_v12 = vld [vmem:[%s1763_s1 + $0x2e8] sm:$0xff]  ;;  %v154_v16 = vld [vmem:[%s1763_s1 + $0x2e0] sm:$0xff] }
  0x1b   :  { %922 = vmatpush3.msra.mxu1 %v98_v47  ;;  %879 = vmatprep.subr.mxu0 %v81_v48  ;;  %v187_v13 = vld [vmem:[%s1763_s1 + $0x3e8] sm:$0xff]  ;;  %v186_v17 = vld [vmem:[%s1763_s1 + $0x3e0] sm:$0xff]  ;;  %v153_v20 = vld [vmem:[%s1763_s1 + $0x2d8] sm:$0xff] }
  0x1c   :  { %923 = vmatprep.subr.mxu1 %v113_v49  ;;  %880 = vmatpush3.msra.mxu0 %v65_v50  ;;  %v139_v14 = vld [vmem:[%s1763_s1 + $0x268] sm:$0xff]  ;;  %v138_v18 = vld [vmem:[%s1763_s1 + $0x260] sm:$0xff]  ;;  %v185_v21 = vld [vmem:[%s1763_s1 + $0x3d8] sm:$0xff] }
  0x1d   :  { %924 = vmatpush3.msra.mxu1 %v97_v51  ;;  %881 = vmatprep.subr.mxu0 %v80_v52  ;;  %v171_v15 = vld [vmem:[%s1763_s1 + $0x368] sm:$0xff]  ;;  %v170_v19 = vld [vmem:[%s1763_s1 + $0x360] sm:$0xff]  ;;  %v137_v22 = vld [vmem:[%s1763_s1 + $0x258] sm:$0xff] }
  0x1e   :  { %925 = vmatprep.subr.mxu1 %v112_v53  ;;  %882 = vmatpush3.msra.mxu0 %v64_v54  ;;  %v169_v23 = vld [vmem:[%s1763_s1 + $0x358] sm:$0xff]  ;;  %v152_v24 = vld [vmem:[%s1763_s1 + $0x2d0] sm:$0xff]  ;;  %v151_v28 = vld [vmem:[%s1763_s1 + $0x2c8] sm:$0xff] }
  0x1f   :  { %926 = vmatpush3.msra.mxu1 %v96_v55  ;;  %883 = vmatprep.subr.mxu0 %v79_v56  ;;  %v184_v25 = vld [vmem:[%s1763_s1 + $0x3d0] sm:$0xff]  ;;  %v183_v29 = vld [vmem:[%s1763_s1 + $0x3c8] sm:$0xff]  ;;  %v150_v32 = vld [vmem:[%s1763_s1 + $0x2c0] sm:$0xff] }
  0x20   :  { %927 = vmatprep.subr.mxu1 %v111_v57  ;;  %884 = vmatpush3.msra.mxu0 %v63_v58  ;;  %v136_v26 = vld [vmem:[%s1763_s1 + $0x250] sm:$0xff]  ;;  %v135_v30 = vld [vmem:[%s1763_s1 + $0x248] sm:$0xff]  ;;  %v182_v33 = vld [vmem:[%s1763_s1 + $0x3c0] sm:$0xff] }
  0x21   :  { %928 = vmatpush3.msra.mxu1 %v95_v59  ;;  %885 = vmatprep.subr.mxu0 %v78_v60  ;;  %v168_v27 = vld [vmem:[%s1763_s1 + $0x350] sm:$0xff]  ;;  %v167_v31 = vld [vmem:[%s1763_s1 + $0x348] sm:$0xff]  ;;  %v134_v34 = vld [vmem:[%s1763_s1 + $0x240] sm:$0xff] }
  0x22   :  { %929 = vmatprep.subr.mxu1 %v110_v61  ;;  %886 = vmatpush3.msra.mxu0 %v62_v62  ;;  %v166_v35 = vld [vmem:[%s1763_s1 + $0x340] sm:$0xff]  ;;  %v149_v36 = vld [vmem:[%s1763_s1 + $0x2b8] sm:$0xff]  ;;  %v39_v38 = vld [vmem:[%s1762_s0 + $0x48] sm:$0xff] }
  0x23   :  { %261 = vmatprep.mubr.f32.mxu0 %v31_v63  ;;  %930 = vmatpush3.msra.mxu1 %v94_v0  ;;  %v181_v37 = vld [vmem:[%s1763_s1 + $0x3b8] sm:$0xff]  ;;  %v38_v41 = vld [vmem:[%s1762_s0 + $0x40] sm:$0xff]  ;;  %v148_v42 = vld [vmem:[%s1763_s1 + $0x2b0] sm:$0xff] }
  0x24   :  { %262 = vmatmul.mubr.f32.vlgmr.msra.gmra.mxu0 %v30_v1  ;;  %346 = vmatprep.mubr.f32.mxu1 %v33_v2  ;;  %v133_v39 = vld [vmem:[%s1763_s1 + $0x238] sm:$0xff]  ;;  %v180_v43 = vld [vmem:[%s1763_s1 + $0x3b0] sm:$0xff]  ;;  %v147_v47 = vld [vmem:[%s1763_s1 + $0x2a8] sm:$0xff] }
  0x25   :  { %943 = vmatprep.subr.mxu0 %v157_v3  ;;  %987 = vmatprep.subr.mxu1 %v189_v4  ;;  %v165_v40 = vld [vmem:[%s1763_s1 + $0x338] sm:$0xff]  ;;  %v132_v45 = vld [vmem:[%s1763_s1 + $0x230] sm:$0xff] }
  0x26   :  { %347 = vmatmul.mubr.f32.vlgmr.msra.gmra.mxu1 %v32_v5  ;;  %944 = vmatpush3.msra.mxu0 %v141_v6  ;;  %v41_v44 = vld [vmem:[%s1762_s0 + $0x58] sm:$0xff]  ;;  %v164_v46 = vld [vmem:[%s1763_s1 + $0x330] sm:$0xff] }
  0x27   :  { %988 = vmatpush3.msra.mxu1 %v173_v7  ;;  %945 = vmatprep.subr.mxu0 %v156_v8 }
  0x28   :  { %989 = vmatprep.subr.mxu1 %v188_v9  ;;  %946 = vmatpush3.msra.mxu0 %v140_v10 }
  0x29   :  { %990 = vmatpush3.msra.mxu1 %v172_v11  ;;  %947 = vmatprep.subr.mxu0 %v155_v12 }
  0x2a   :  { %991 = vmatprep.subr.mxu1 %v187_v13  ;;  %948 = vmatpush3.msra.mxu0 %v139_v14 }
  0x2b   :  { %992 = vmatpush3.msra.mxu1 %v171_v15  ;;  %949 = vmatprep.subr.mxu0 %v154_v16 }
  0x2c   :  { %993 = vmatprep.subr.mxu1 %v186_v17  ;;  %950 = vmatpush3.msra.mxu0 %v138_v18 }
  0x2d   :  { %994 = vmatpush3.msra.mxu1 %v170_v19  ;;  %951 = vmatprep.subr.mxu0 %v153_v20 }
  0x2e   :  { %995 = vmatprep.subr.mxu1 %v185_v21  ;;  %952 = vmatpush3.msra.mxu0 %v137_v22 }
  0x2f   :  { %996 = vmatpush3.msra.mxu1 %v169_v23  ;;  %953 = vmatprep.subr.mxu0 %v152_v24 }
  0x30   :  { %997 = vmatprep.subr.mxu1 %v184_v25  ;;  %954 = vmatpush3.msra.mxu0 %v136_v26 }
  0x31   :  { %998 = vmatpush3.msra.mxu1 %v168_v27  ;;  %955 = vmatprep.subr.mxu0 %v151_v28 }
  0x32   :  { %999 = vmatprep.subr.mxu1 %v183_v29  ;;  %956 = vmatpush3.msra.mxu0 %v135_v30 }
  0x33   :  { %1000 = vmatpush3.msra.mxu1 %v167_v31  ;;  %957 = vmatprep.subr.mxu0 %v150_v32 }
  0x34   :  { %1001 = vmatprep.subr.mxu1 %v182_v33  ;;  %958 = vmatpush3.msra.mxu0 %v134_v34 }
  0x35   :  { %1002 = vmatpush3.msra.mxu1 %v166_v35  ;;  %959 = vmatprep.subr.mxu0 %v149_v36 }
  0x36   :  { %1003 = vmatprep.subr.mxu1 %v181_v37  ;;  %266 = vmatprep.mubr.f32.mxu0 %v39_v38 }
  0x37   :  { %960 = vmatpush3.msra.mxu0 %v133_v39  ;;  %1004 = vmatpush3.msra.mxu1 %v165_v40 }
  0x38   :  { %267 = vmatmul.mubr.f32.gmra.mxu0 %v38_v41 }
  0x39   :  { %13 = vsyncpa [#allocation3], 0  ;;  %961 = vmatprep.subr.mxu0 %v148_v42  ;;  %1005 = vmatprep.subr.mxu1 %v180_v43  ;;  %v40_v48 = vld [vmem:[%s1762_s0 + $0x50] sm:$0xff]  ;;  %v179_v49 = vld [vmem:[%s1763_s1 + $0x3a8] sm:$0xff]  ;;  %vm557_vm0 = vcmask 523264   ;;  %vm1147_vm5 = vmmov 0  }
  0x3a   :  { %351 = vmatprep.mubr.f32.mxu1 %v41_v44  ;;  %962 = vmatpush3.msra.mxu0 %v132_v45  ;;  %v47_v50 = vld [vmem:[%s1762_s0 + $0x88] sm:$0xff]  ;;  %v46_v53 = vld [vmem:[%s1762_s0 + $0x80] sm:$0xff]  ;;  %v49_v56 = vld [vmem:[%s1762_s0 + $0x98] sm:$0xff]  ;;  %vm664_vm6 = vcmask 261120   ;;  %vm757_vm7 = vcmask 785408   ;;  %vm831_vm8 = vcmask 41984  }
  0x3b   :  { %v131_v51 = vld [vmem:[%s1763_s1 + $0x228] sm:$0xff]  ;;  %1006 = vmatpush3.msra.mxu1 %v164_v46  ;;  %963 = vmatprep.subr.mxu0 %v147_v47  ;;  %v146_v54 = vld [vmem:[%s1763_s1 + $0x2a0] sm:$0xff]  ;;  %v145_v59 = vld [vmem:[%s1763_s1 + $0x298] sm:$0xff] }
  0x3c   :  { %v163_v52 = vld [vmem:[%s1763_s1 + $0x328] sm:$0xff]  ;;  %352 = vmatmul.mubr.f32.gmra.mxu1 %v40_v48  ;;  %1007 = vmatprep.subr.mxu1 %v179_v49  ;;  %v178_v55 = vld [vmem:[%s1763_s1 + $0x3a0] sm:$0xff]  ;;  %v48_v60 = vld [vmem:[%s1762_s0 + $0x90] sm:$0xff] }
  0x3d   :  { %271 = vmatprep.mubr.f32.mxu0 %v47_v50  ;;  %964 = vmatpush3.msra.mxu0 %v131_v51  ;;  %v130_v57 = vld [vmem:[%s1763_s1 + $0x220] sm:$0xff]  ;;  %v177_v61 = vld [vmem:[%s1763_s1 + $0x398] sm:$0xff]  ;;  %v55_v62 = vld [vmem:[%s1762_s0 + $0xc8] sm:$0xff] }
  0x3e   :  { %1008 = vmatpush3.msra.mxu1 %v163_v52  ;;  %272 = vmatmul.mubr.f32.gmra.mxu0 %v46_v53  ;;  %v162_v58 = vld [vmem:[%s1763_s1 + $0x320] sm:$0xff]  ;;  %v129_v63 = vld [vmem:[%s1763_s1 + $0x218] sm:$0xff]  ;;  %v144_v2 = vld [vmem:[%s1763_s1 + $0x290] sm:$0xff] }
  0x3f   :  { %965 = vmatprep.subr.mxu0 %v146_v54  ;;  %1009 = vmatprep.subr.mxu1 %v178_v55  ;;  %v161_v0 = vld [vmem:[%s1763_s1 + $0x318] sm:$0xff]  ;;  %v54_v1 = vld [vmem:[%s1762_s0 + $0xc0] sm:$0xff]  ;;  %v176_v3 = vld [vmem:[%s1763_s1 + $0x390] sm:$0xff] }
  0x40   :  { %356 = vmatprep.mubr.f32.mxu1 %v49_v56  ;;  %966 = vmatpush3.msra.mxu0 %v130_v57  ;;  %v57_v4 = vld [vmem:[%s1762_s0 + $0xd8] sm:$0xff]  ;;  %v128_v5 = vld [vmem:[%s1763_s1 + $0x210] sm:$0xff]  ;;  %v143_v7 = vld [vmem:[%s1763_s1 + $0x288] sm:$0xff] }
  0x41   :  { %1010 = vmatpush3.msra.mxu1 %v162_v58  ;;  %967 = vmatprep.subr.mxu0 %v145_v59  ;;  %v160_v6 = vld [vmem:[%s1763_s1 + $0x310] sm:$0xff]  ;;  %v175_v9 = vld [vmem:[%s1763_s1 + $0x388] sm:$0xff]  ;;  %v142_v12 = vld [vmem:[%s1763_s1 + $0x280] sm:$0xff] }
  0x42   :  { %357 = vmatmul.mubr.f32.gmra.mxu1 %v48_v60  ;;  %1011 = vmatprep.subr.mxu1 %v177_v61  ;;  %v56_v8 = vld [vmem:[%s1762_s0 + $0xd0] sm:$0xff]  ;;  %v127_v10 = vld [vmem:[%s1763_s1 + $0x208] sm:$0xff]  ;;  %v174_v13 = vld [vmem:[%s1763_s1 + $0x380] sm:$0xff] }
  0x43   :  { %276 = vmatprep.mubr.f32.mxu0 %v55_v62  ;;  %968 = vmatpush3.msra.mxu0 %v129_v63  ;;  %v159_v11 = vld [vmem:[%s1763_s1 + $0x308] sm:$0xff]  ;;  %v126_v14 = vld [vmem:[%s1763_s1 + $0x200] sm:$0xff]  ;;  %v37_v17 = vld [vmem:[%s1762_s0 + $0x38] sm:$0xff] }
  0x44   :  { %1012 = vmatpush3.msra.mxu1 %v161_v0  ;;  %277 = vmatmul.mubr.f32.gmra.mxu0 %v54_v1  ;;  %v35_v15 = vld [vmem:[%s1762_s0 + $0x28] sm:$0xff]  ;;  %v158_v16 = vld [vmem:[%s1763_s1 + $0x300] sm:$0xff]  ;;  %v36_v19 = vld [vmem:[%s1762_s0 + $0x30] sm:$0xff]  ;;  %s1148_s1 = smov [#allocation2]  }
  0x45   :  { %969 = vmatprep.subr.mxu0 %v144_v2  ;;  %1013 = vmatprep.subr.mxu1 %v176_v3  ;;  %v34_v18 = vld [vmem:[%s1762_s0 + $0x20] sm:$0xff]  ;;  %v43_v20 = vld [vmem:[%s1762_s0 + $0x68] sm:$0xff]  ;;  %v45_v21 = vld [vmem:[%s1762_s0 + $0x78] sm:$0xff]  ;;  %s839_s17 = sshll.u32 %s1148_s1, 4  ;;  %s840_s17 = int_to_ptr.vmem [resolvable:$true] %s839_s17 }
  0x46   :  { %361 = vmatprep.mubr.f32.mxu1 %v57_v4  ;;  %970 = vmatpush3.msra.mxu0 %v128_v5  ;;  %v42_v22 = vld [vmem:[%s1762_s0 + $0x60] sm:$0xff]  ;;  %v44_v23 = vld [vmem:[%s1762_s0 + $0x70] sm:$0xff]  ;;  %v51_v24 = vld [vmem:[%s1762_s0 + $0xa8] sm:$0xff]  ;;  %p1129_p1 = scmp.lt.s32.totalorder %s840_s17, %s840_s17 }
  0x47   :  { %1014 = vmatpush3.msra.mxu1 %v160_v6  ;;  %971 = vmatprep.subr.mxu0 %v143_v7  ;;  %v53_v25 = vld [vmem:[%s1762_s0 + $0xb8] sm:$0xff]  ;;  %v50_v26 = vld [vmem:[%s1762_s0 + $0xa0] sm:$0xff]  ;;  %v52_v27 = vld [vmem:[%s1762_s0 + $0xb0] sm:$0xff] }
  0x48   :  { %362 = vmatmul.mubr.f32.gmra.mxu1 %v56_v8  ;;  %1015 = vmatprep.subr.mxu1 %v175_v9  ;;  %v59_v28 = vld [vmem:[%s1762_s0 + $0xe8] sm:$0xff]  ;;  %v61_v29 = vld [vmem:[%s1762_s0 + $0xf8] sm:$0xff]  ;;  %v58_v30 = vld [vmem:[%s1762_s0 + $0xe0] sm:$0xff] }
  0x49   :  { %972 = vmatpush3.msra.mxu0 %v127_v10  ;;  %1016 = vmatpush3.msra.mxu1 %v159_v11  ;;  %v60_v31 = vld [vmem:[%s1762_s0 + $0xf0] sm:$0xff]  ;;  %v556_v32 = vld [vmem:[%s1765_s3 + $0x38] sm:$0xff]  ;;  %v554_v34 = vld [vmem:[%s1765_s3 + $0x28] sm:$0xff] }
  0x4a   :  { %973 = vmatprep.subr.mxu0 %v142_v12  ;;  %1017 = vmatprep.subr.mxu1 %v174_v13  ;;  %v555_v33 = vld [vmem:[%s1765_s3 + $0x30] sm:$0xff]  ;;  %v553_v35 = vld [vmem:[%s1765_s3 + $0x20] sm:$0xff]  ;;  %v552_v36 = vld [vmem:[%s1765_s3 + $0x18] sm:$0xff] }
  0x4b   :  { %974 = vmatpush3.msra.mxu0 %v126_v14  ;;  %431 = vmatprep.mubr.f32.mxu0 %v35_v15  ;;  %v551_v37 = vld [vmem:[%s1765_s3 + $0x10] sm:$0xff]  ;;  %v550_v38 = vld [vmem:[%s1765_s3 + $0x8] sm:$0xff]  ;;  %v549_v39 = vld [vmem:[%s1765_s3] sm:$0xff] }
  0x4c   :  { %1018 = vmatpush3.msra.mxu1 %v158_v16  ;;  %516 = vmatprep.mubr.f32.mxu1 %v37_v17  ;;  %v847_v55 = vld [vmem:[%s1764_s2] ss:$0 sm:$0xff] }
  0x4d   :  { %432 = vmatmul.mubr.f32.vlgmr.msra.gmra.mxu0 %v34_v18  ;;  %517 = vmatmul.mubr.f32.vlgmr.msra.gmra.mxu1 %v36_v19 }
  0x4e   :  { %436 = vmatprep.mubr.f32.mxu0 %v43_v20  ;;  %521 = vmatprep.mubr.f32.mxu1 %v45_v21 }
  0x4f   :  { %1061 = vmatprep.subr.mxu1 %v556_v32 }
  0x50   :  { %1062 = vmatpush3.msra.mxu1 %v556_v32 }
  0x51   :  { %437 = vmatmul.mubr.f32.gmra.mxu0 %v42_v22  ;;  %522 = vmatmul.mubr.f32.gmra.mxu1 %v44_v23 }
  0x52   :  { %441 = vmatprep.mubr.f32.mxu0 %v51_v24  ;;  %526 = vmatprep.mubr.f32.mxu1 %v53_v25 }
  0x53   :  { %1063 = vmatprep.subr.mxu1 %v555_v33 }
  0x54   :  { %1064 = vmatpush3.msra.mxu1 %v555_v33 }
  0x55   :  { %442 = vmatmul.mubr.f32.gmra.mxu0 %v50_v26  ;;  %527 = vmatmul.mubr.f32.gmra.mxu1 %v52_v27 }
  0x56   :  { %446 = vmatprep.mubr.f32.mxu0 %v59_v28  ;;  %531 = vmatprep.mubr.f32.mxu1 %v61_v29 }
  0x57   :  { %1065 = vmatprep.subr.mxu1 %v554_v34 }
  0x58   :  { %1066 = vmatpush3.msra.mxu1 %v554_v34 }
  0x59   :  { %447 = vmatmul.mubr.f32.gmra.mxu0 %v58_v30  ;;  %532 = vmatmul.mubr.f32.gmra.mxu1 %v60_v31 }
  0x5a   :  { %1067 = vmatprep.subr.mxu1 %v553_v35 }
  0x5b   :  { %1068 = vmatpush3.msra.mxu1 %v553_v35 }
  0x5c   :  { %1069 = vmatprep.subr.mxu1 %v552_v36 }
  0x5d   :  { %1070 = vmatpush3.msra.mxu1 %v552_v36 }
  0x5e   :  { %1071 = vmatprep.subr.mxu1 %v551_v37 }
  0x5f   :  { %1072 = vmatpush3.msra.mxu1 %v551_v37 }
  0x60   :  { %1073 = vmatprep.subr.mxu1 %v550_v38 }
  0x61   :  { %1074 = vmatpush3.msra.mxu1 %v550_v38 }
  0x62   :  { %1075 = vmatprep.subr.mxu1 %v549_v39 }
  0x63   :  { %1076 = vmatpush3.msra.mxu1 %v549_v39 }
  0xe4   :  { %v887_v40 = vpop.f32.mrf.mxu0 }
  0xe6   :  { %v931_v41 = vpop.f32.mrf.mxu1  ;;  %v888_v42 = vpop.f32.mrf.mxu0 }
  0xe7   :  { %v889_v53 = vadd.f32 %v888_v42, %v887_v40 }
  0xe8   :  { %v932_v44 = vpop.f32.mrf.mxu1 }
  0xe9   :  { %v264_v58 = vadd.f32 %v889_v53, %v847_v55  ;;  %v933_v59 = vadd.f32 %v932_v44, %v931_v41  ;;  %v746_v53 = vld [vmem:[%s1768_s6 + $0x40] sm:$0xff] }
  0xeb   :  { %v349_v2 = vadd.f32 %v933_v59, %v264_v58  ;;  %v741_v58 = vld [vmem:[%s1768_s6 + $0x18] sm:$0xff]  ;;  %v740_v59 = vld [vmem:[%s1768_s6 + $0x10] sm:$0xff] }
  0xf8   :  { %v890_v43 = vpop.f32.mrf.mxu0 }
  0xfa   :  { %v891_v45 = vpop.f32.mrf.mxu0 }
  0xfb   :  { %v892_v60 = vadd.f32 %v891_v45, %v890_v43 }
  0xfc   :  { %v934_v46 = vpop.f32.mrf.mxu1 }
  0xfd   :  { %v269_v3 = vadd.f32 %v892_v60, %v847_v55  ;;  %v739_v60 = vld [vmem:[%s1768_s6 + $0x8] sm:$0xff] }
  0xfe   :  { %v935_v47 = vpop.f32.mrf.mxu1  ;;  %v893_v48 = vpop.f32.mrf.mxu0 }
  0xff   :  { %v936_v4 = vadd.f32 %v935_v47, %v934_v46 }
 0x100   :  { %v894_v50 = vpop.f32.mrf.mxu0 }
 0x101   :  { %v895_v63 = vadd.f32 %v894_v50, %v893_v48  ;;  %v354_v15 = vadd.f32 %v936_v4, %v269_v3  ;;  %v749_v50 = vld [vmem:[%s1768_s6 + $0x58] sm:$0xff]  ;;  %v656_v3 = vld [vmem:[%s1766_s4 + $0x8] sm:$0xff] }
 0x102   :  { %v937_v49 = vpop.f32.mrf.mxu1 }
 0x103   :  { %v274_v10 = vadd.f32 %v895_v63, %v847_v55  ;;  %v658_v63 = vld [vmem:[%s1766_s4 + $0x18] sm:$0xff] }
 0x104   :  { %v938_v51 = vpop.f32.mrf.mxu1  ;;  %v896_v52 = vpop.f32.mrf.mxu0 }
 0x105   :  { %v939_v11 = vadd.f32 %v938_v51, %v937_v49  ;;  %v1146_v49 = vmov 0.0   ;;  %v748_v51 = vld [vmem:[%s1768_s6 + $0x50] sm:$0xff] }
 0x106   :  { %v897_v57 = vpop.f32.mrf.mxu0  ;;  %1083 = vmatprep.subr.mxu1 %v1146_v49  ;;  %1094 = vmatprep.subr.mxu0 %v1146_v49 }
 0x107   :  { %v898_v12 = vadd.f32 %v897_v57, %v896_v52  ;;  %v359_v23 = vadd.f32 %v939_v11, %v274_v10  ;;  %1118 = vmatprep.mubr.msk.f32.mxu0 %vm1147_vm5, %v1146_v49  ;;  %1095 = vmatpush3.msra.mxu0 %v749_v50  ;;  %v747_v52 = vld [vmem:[%s1768_s6 + $0x48] sm:$0xff]  ;;  %v742_v57 = vld [vmem:[%s1768_s6 + $0x20] sm:$0xff] }
 0x108   :  { %v940_v54 = vpop.f32.mrf.mxu1  ;;  %1096 = vmatprep.subr.mxu0 %v1146_v49  ;;  %v738_v10 = vld [vmem:[%s1768_s6] sm:$0xff] }
 0x109   :  { %v279_v24 = vadd.f32 %v898_v12, %v847_v55  ;;  %1097 = vmatpush3.msra.mxu0 %v748_v51  ;;  %v744_v55 = vld [vmem:[%s1768_s6 + $0x30] sm:$0xff] }
 0x10a   :  { %v941_v56 = vpop.f32.mrf.mxu1  ;;  %1098 = vmatprep.subr.mxu0 %v1146_v49 }
 0x10b   :  { %v942_v27 = vadd.f32 %v941_v56, %v940_v54  ;;  %1099 = vmatpush3.msra.mxu0 %v747_v52  ;;  %v745_v54 = vld [vmem:[%s1768_s6 + $0x38] sm:$0xff]  ;;  %v743_v56 = vld [vmem:[%s1768_s6 + $0x28] sm:$0xff] }
 0x10c   :  { %1100 = vmatprep.subr.mxu0 %v1146_v49 }
 0x10d   :  { %v975_v61 = vpop.f32.mrf.mxu0  ;;  %v1019_v62 = vpop.f32.mrf.mxu1  ;;  %v364_v38 = vadd.f32 %v942_v27, %v279_v24  ;;  %1101 = vmatpush3.msra.mxu0 %v746_v53 }
 0x10e   :  { %1102 = vmatprep.subr.mxu0 %v1146_v49 }
 0x10f   :  { %v976_v0 = vpop.f32.mrf.mxu0  ;;  %v1020_v1 = vpop.f32.mrf.mxu1  ;;  %1103 = vmatpush3.msra.mxu0 %v745_v54 }
 0x110   :  { %v977_v5 = vadd.f32 %v976_v0, %v975_v61  ;;  %v1021_v9 = vadd.f32 %v1020_v1, %v1019_v62  ;;  %1104 = vmatprep.subr.mxu0 %v1146_v49  ;;  %v657_v1 = vld [vmem:[%s1766_s4 + $0x10] sm:$0xff] }
 0x111   :  { %v978_v6 = vpop.f32.mrf.mxu0  ;;  %v1022_v7 = vpop.f32.mrf.mxu1  ;;  %1105 = vmatpush3.msra.mxu0 %v744_v55 }
 0x112   :  { %v434_v8 = vadd.f32 %v977_v5, %v349_v2  ;;  %1106 = vmatprep.subr.mxu0 %v1146_v49 }
 0x113   :  { %v979_v13 = vpop.f32.mrf.mxu0  ;;  %v1023_v14 = vpop.f32.mrf.mxu1  ;;  %1107 = vmatpush3.msra.mxu0 %v743_v56 }
 0x114   :  { %v519_v16 = vadd.f32 %v1021_v9, %v434_v8  ;;  %v980_v17 = vadd.f32 %v979_v13, %v978_v6  ;;  %v1024_v22 = vadd.f32 %v1023_v14, %v1022_v7  ;;  %1108 = vmatprep.subr.mxu0 %v1146_v49  ;;  %v655_v6 = vld [vmem:[%s1766_s4] sm:$0xff] }
 0x115   :  { %v981_v18 = vpop.f32.mrf.mxu0  ;;  %v1025_v19 = vpop.f32.mrf.mxu1  ;;  %1109 = vmatpush3.msra.mxu0 %v742_v57  ;;  %v663_v9 = vld [vmem:[%s1767_s5] sm:$0x3]  ;;  %s1124_s5 = scalar_lea.vmem %s840_s17, 32 }
 0x116   :  { %v541_v20 = vmul.f32 0.1, %v519_v16  ;;  %v439_v21 = vadd.f32 %v980_v17, %v354_v15  ;;  %vm537_vm1 = vcmp.ge.f32.partialorder %v519_v16, 0.0  ;;  %1110 = vmatprep.subr.mxu0 %v1146_v49  ;;  %v853_v13 = vld [vmem:[%s1769_s7] ss:$0 sm:$0xff]  ;;  %p1125_p0 = scmp.ne.s32.totalorder %s840_s17, %s1124_s5  ;;  %p1130_p2 = scmp.lt.s32.totalorder %s1124_s5, %s1124_s5 }
 0x117   :  { %v982_v25 = vpop.f32.mrf.mxu0  ;;  %v1026_v26 = vpop.f32.mrf.mxu1  ;;  %1111 = vmatpush3.msra.mxu0 %v741_v58 }
 0x118   :  { %v524_v28 = vadd.f32 %v1024_v22, %v439_v21  ;;  %v983_v29 = vadd.f32 %v982_v25, %v981_v18  ;;  %v545_v30 = vsel %vm537_vm1, %v519_v16, %v541_v20  ;;  %v1027_v35 = vadd.f32 %v1026_v26, %v1025_v19  ;;  %1112 = vmatprep.subr.mxu0 %v1146_v49  ;;  %p1131_p3 = por %p1130_p2, %p1129_p1 }
 0x119   :  { %v984_v31 = vpop.f32.mrf.mxu0  ;;  %v1028_v32 = vpop.f32.mrf.mxu1  ;;  %1077 = vmatprep.mubr.msk.f32.mxu1 %vm557_vm0, %v545_v30  ;;  %1113 = vmatpush3.msra.mxu0 %v740_v59 }
 0x11a   :  { %vm538_vm2 = vcmp.ge.f32.partialorder %v524_v28, 0.0  ;;  %v542_v33 = vmul.f32 0.1, %v524_v28  ;;  %v444_v34 = vadd.f32 %v983_v29, %v359_v23  ;;  %1114 = vmatprep.subr.mxu0 %v1146_v49  ;;  %p1132_p4 = pnand %p1131_p3, %p1125_p0 }
 0x11b   :  { %v985_v36 = vpop.f32.mrf.mxu0  ;;  %v1029_v37 = vpop.f32.mrf.mxu1  ;;  %1115 = vmatpush3.msra.mxu0 %v739_v60 }
 0x11c   :  { %v546_v39 = vsel %vm538_vm2, %v524_v28, %v542_v33  ;;  %v529_v40 = vadd.f32 %v1027_v35, %v444_v34  ;;  %v986_v41 = vadd.f32 %v985_v36, %v984_v31  ;;  %v1030_v44 = vadd.f32 %v1029_v37, %v1028_v32  ;;  %1116 = vmatprep.subr.mxu0 %v1146_v49 }
 0x11d   :  { %1078 = vmatmul.mubr.msk.f32.vlgmr.msra.gmra.mxu1 %vm557_vm0, %v546_v39  ;;  %1117 = vmatpush3.msra.mxu0 %v738_v10 }
 0x11e   :  { %v543_v42 = vmul.f32 0.1, %v529_v40  ;;  %v449_v43 = vadd.f32 %v986_v41, %v364_v38  ;;  %vm539_vm3 = vcmp.ge.f32.partialorder %v529_v40, 0.0 }
 0x120   :  { %v534_v45 = vadd.f32 %v1030_v44, %v449_v43  ;;  %v547_v46 = vsel %vm539_vm3, %v529_v40, %v543_v42 }
 0x121   :  { %1080 = vmatprep.mubr.msk.f32.mxu1 %vm557_vm0, %v547_v46 }
 0x122   :  { %v544_v47 = vmul.f32 0.1, %v534_v45  ;;  %vm540_vm4 = vcmp.ge.f32.partialorder %v534_v45, 0.0 }
 0x124   :  { %v548_v48 = vsel %vm540_vm4, %v534_v45, %v544_v47 }
 0x125   :  { %1081 = vmatmul.mubr.msk.f32.gmra.mxu1 %vm557_vm0, %v548_v48 }
 0x126   :  { %1091 = vmatprep.mubr.msk.f32.mxu1 %vm1147_vm5, %v1146_v49 }
 0x1dd   :  { %v1079_v61 = vpop.f32.mrf.mxu1 }
 0x1de   :  { %v660_v7 = vmul.f32 %v1079_v61, %v656_v3 }
 0x1df   :  { %v636_v62 = vpop.f32.mrf.mxu1 }
 0x1e0   :  { %v659_v8 = vmul.f32 %v655_v6, %v636_v62 }
 0x1e5   :  { %v1082_v0 = vpop.f32.mrf.mxu1 }
 0x1e6   :  { %v662_v2 = vmul.f32 %v1082_v0, %v658_v63 }
 0x1e7   :  { %v646_v4 = vpop.f32.mrf.mxu1 }
 0x1e8   :  { %v661_v5 = vmul.f32 %v657_v1, %v646_v4  ;;  %1084 = vmatpush3.msra.mxu1 %v662_v2 }
 0x1e9   :  { %1085 = vmatprep.subr.mxu1 %v1146_v49 }
 0x1ea   :  { %1086 = vmatpush3.msra.mxu1 %v661_v5 }
 0x1eb   :  { %1087 = vmatprep.subr.mxu1 %v1146_v49 }
 0x1ec   :  { %1088 = vmatpush3.msra.mxu1 %v660_v7 }
 0x1ed   :  { %1089 = vmatprep.subr.mxu1 %v1146_v49 }
 0x1ee   :  { %1090 = vmatpush3.msra.mxu1 %v659_v8 }
 0x1ef   :  { %1092 = vmatmul.mubr.msk.f32.vlgmr.msra.gmra.mxu1 %vm664_vm6, %v663_v9 }
 0x2af   :  { %v734_v11 = vpop.f32.mrf.mxu1 }
 0x2b0   :  { %1119 = vmatmul.mubr.msk.f32.vlgmr.msra.gmra.mxu0 %vm757_vm7, %v734_v11 }
 0x2b1   :  { %v1093_v12 = vpop.f32.mrf.mxu1 }
 0x370   :  { %v827_v14 = vpop.f32.mrf.mxu0 }
 0x371   :  { %v828_v15 = vadd.f32 %v853_v13, %v827_v14 }
 0x372   :  { %v1120_v16 = vpop.f32.mrf.mxu0 }
 0x373   :  { %832 = vst.msk [vmem:[#allocation2] sm:$0x3] %vm831_vm8, %v828_v15 }
 0x374   :  { %1135 = shalt.err (!%p1132_p4)
}
 0x375   :  { %842 = dma.vmem_to_hbm [thread:$0]  %s840_s17, 32, %s1770_s8, [#allocation3]  }
 0x376   :  { %1144 = dma.done.wait [#allocation3], 32  }
 0x377   :  { %1145 = vsyncadd [#allocation3], 4294967264 }
 0x378   :  { %846 = vsyncpa [#allocation3], 1 }

</bundles_post_ra>
